<compile_context>
chip_gen: v7x
topology: tpu7x:2x2x1
jax: 0.10.0
libtpu: 0.0.40
codegen_flags: <defaults>
</compile_context>

<pallas_src>
import functools

import jax
import jax.numpy as jnp
from jax.experimental import pallas as pl
from jax.experimental.pallas import tpu as pltpu

# ---- hyper-parameters from bigram_v3.py ----
N_EMBED = 384
N_HEAD = 6
HEAD_SIZE = N_EMBED // N_HEAD          # 64
N_LAYER = 6
BLOCK_SIZE = 256
LN_EPS = 1e-5                          # torch.nn.LayerNorm default
COMPUTE_DTYPE = jnp.bfloat16           # MXU operand dtype; accumulation is always f32


def _round_up(x, m):
    return ((x + m - 1) // m) * m


def _layernorm_f32(x, gamma, beta):
    """Row-wise LayerNorm in f32. gamma/beta broadcast as (1, E)."""
    mu = jnp.mean(x, axis=-1, keepdims=True)
    xc = x - mu
    var = jnp.mean(xc * xc, axis=-1, keepdims=True)
    return xc * jax.lax.rsqrt(var + LN_EPS) * gamma + beta


# =====================  attention block kernel  =====================

def _attn_block_kernel(x_ref, g_ref, be_ref, wq_ref, wk_ref, wv_ref,
                       wp_ref, bp_ref, o_ref, *, n_head, head_size):
    """out = x + Wp^T( MHA(LN(x)) ) + bp   for one batch element."""
    x = x_ref[0].astype(jnp.float32)                         # (T, E) residual input
    xn = _layernorm_f32(x, g_ref[...], be_ref[...])          # ln1
    xb = xn.astype(wq_ref.dtype)                             # single bf16 cast for the MXU

    q = jnp.dot(xb, wq_ref[...], preferred_element_type=jnp.float32)   # (T, E)
    k = jnp.dot(xb, wk_ref[...], preferred_element_type=jnp.float32)
    v = jnp.dot(xb, wv_ref[...], preferred_element_type=jnp.float32)

    T = x.shape[0]
    rows = jax.lax.broadcasted_iota(jnp.int32, (T, T), 0)
    cols = jax.lax.broadcasted_iota(jnp.int32, (T, T), 1)
    causal = rows >= cols
    scale = head_size ** -0.5

    proj = jnp.zeros_like(x)                                  # (T, E) f32
    for h in range(n_head):                                   # static unroll (6 heads)
        lo, hi = h * head_size, (h + 1) * head_size
        qh = q[:, lo:hi].astype(wq_ref.dtype)
        kh = k[:, lo:hi].astype(wq_ref.dtype)
        vh = v[:, lo:hi].astype(wq_ref.dtype)
        # scores = qh @ kh^T  (contraction on head dim), f32 accumulation
        s = jax.lax.dot_general(qh, kh, (((1,), (1,)), ((), ())),
                                preferred_element_type=jnp.float32) * scale
        s = jnp.where(causal, s, -jnp.inf)
        s = s - jnp.max(s, axis=-1, keepdims=True)
        p = jnp.exp(s)
        p = p / jnp.sum(p, axis=-1, keepdims=True)            # attention dropout == identity
        oh = jnp.dot(p.astype(wq_ref.dtype), vh, preferred_element_type=jnp.float32)
        # fold the output projection per head: concat(heads) @ Wp == sum_h head_h @ Wp[rows_h]
        proj += jnp.dot(oh.astype(wp_ref.dtype), wp_ref[lo:hi, :],
                        preferred_element_type=jnp.float32)

    o_ref[0] = (x + proj + bp_ref[...]).astype(o_ref.dtype)   # residual + proj bias


def attention_block(x, gamma, beta, wq, wk, wv, wp, bp):
    """x: (B, T_pad, E) f32 -> (B, T_pad, E) f32."""
    B, T, E = x.shape
    cd = COMPUTE_DTYPE
    kern = functools.partial(_attn_block_kernel, n_head=N_HEAD, head_size=HEAD_SIZE)
    return pl.pallas_call(
        kern,
        out_shape=jax.ShapeDtypeStruct((B, T, E), x.dtype),
        grid_spec=pltpu.PrefetchScalarGridSpec(
            num_scalar_prefetch=0,
            grid=(B,),
            in_specs=[
                pl.BlockSpec((1, T, E), lambda b: (b, 0, 0)),   # x (per batch)
                pl.BlockSpec((1, E),    lambda b: (0, 0)),      # ln1 gamma
                pl.BlockSpec((1, E),    lambda b: (0, 0)),      # ln1 beta
                pl.BlockSpec((E, E),    lambda b: (0, 0)),      # Wq
                pl.BlockSpec((E, E),    lambda b: (0, 0)),      # Wk
                pl.BlockSpec((E, E),    lambda b: (0, 0)),      # Wv
                pl.BlockSpec((E, E),    lambda b: (0, 0)),      # Wproj
                pl.BlockSpec((1, E),    lambda b: (0, 0)),      # bproj
            ],
            out_specs=pl.BlockSpec((1, T, E), lambda b: (b, 0, 0)),
        ),
        compiler_params=pltpu.CompilerParams(dimension_semantics=("parallel",)),
    )(x, gamma.reshape(1, E).astype(jnp.float32), beta.reshape(1, E).astype(jnp.float32),
      wq.astype(cd), wk.astype(cd), wv.astype(cd), wp.astype(cd),
      bp.reshape(1, E).astype(jnp.float32))


# =====================  feed-forward block kernel  =====================

def _ffn_block_kernel(x_ref, g_ref, be_ref, w1_ref, b1_ref, w2_ref, b2_ref,
                      o_ref, acc_ref, xn_ref):
    """out = x + relu(LN(x) @ W1 + b1) @ W2 + b2, hidden dim tiled over grid axis 1."""
    k = pl.program_id(1)

    @pl.when(k == 0)
    def _init():
        acc_ref[...] = jnp.zeros_like(acc_ref)
        xf = x_ref[...].astype(jnp.float32)
        xn = _layernorm_f32(xf, g_ref[...], be_ref[...])      # ln2, computed once per row tile
        xn_ref[...] = xn.astype(xn_ref.dtype)

    # (tm, E) @ (E, th) -> bias + ReLU in f32 -> (tm, th) @ (th, E), f32 accumulation.
    h = jnp.dot(xn_ref[...], w1_ref[...], preferred_element_type=jnp.float32)
    h = jnp.maximum(h + b1_ref[...], 0.0)
    acc_ref[...] += jnp.dot(h.astype(w2_ref.dtype), w2_ref[...],
                            preferred_element_type=jnp.float32)

    @pl.when(k == pl.num_programs(1) - 1)
    def _fin():
        # residual + b2 added exactly once; final dropout == identity (eval mode).
        o_ref[...] = (x_ref[...].astype(jnp.float32) + acc_ref[...]
                      + b2_ref[...]).astype(o_ref.dtype)


def ffn_block(x, gamma, beta, w1, b1, w2, b2, *, tile_m=256, tile_h=512):
    """x: (B, T_pad, E) f32 -> (B, T_pad, E) f32."""
    B, T, E = x.shape
    H = w1.shape[1]
    M = B * T
    cd = COMPUTE_DTYPE

    tm = min(tile_m, _round_up(M, 8))
    M_pad = _round_up(M, tm)
    th = min(tile_h, _round_up(H, 128))
    H_pad = _round_up(H, th)

    x2 = x.reshape(M, E)
    if M_pad != M:
        x2 = jnp.pad(x2, ((0, M_pad - M), (0, 0)))
    w1p = jnp.pad(w1.astype(cd), ((0, 0), (0, H_pad - H)))
    w2p = jnp.pad(w2.astype(cd), ((0, H_pad - H), (0, 0)))
    b1p = jnp.pad(b1.astype(jnp.float32).reshape(1, H), ((0, 0), (0, H_pad - H)))
    b2p = b2.astype(jnp.float32).reshape(1, E)

    grid = (M_pad // tm, H_pad // th)
    out = pl.pallas_call(
        _ffn_block_kernel,
        out_shape=jax.ShapeDtypeStruct((M_pad, E), x.dtype),
        grid_spec=pltpu.PrefetchScalarGridSpec(
            num_scalar_prefetch=0,
            grid=grid,
            in_specs=[
                pl.BlockSpec((tm, E), lambda i, k: (i, 0)),    # x rows (resident over k)
                pl.BlockSpec((1, E),  lambda i, k: (0, 0)),    # ln2 gamma
                pl.BlockSpec((1, E),  lambda i, k: (0, 0)),    # ln2 beta
                pl.BlockSpec((E, th), lambda i, k: (0, k)),    # W1 hidden slab
                pl.BlockSpec((1, th), lambda i, k: (0, k)),    # b1 slab
                pl.BlockSpec((th, E), lambda i, k: (k, 0)),    # W2 hidden slab
                pl.BlockSpec((1, E),  lambda i, k: (0, 0)),    # b2
            ],
            out_specs=pl.BlockSpec((tm, E), lambda i, k: (i, 0)),
            scratch_shapes=[pltpu.VMEM((tm, E), jnp.float32),   # f32 accumulator
                            pltpu.VMEM((tm, E), cd)],           # cached LN(x) in bf16
        ),
        compiler_params=pltpu.CompilerParams(
            dimension_semantics=("parallel", "arbitrary")),
    )(x2, gamma.reshape(1, E).astype(jnp.float32), beta.reshape(1, E).astype(jnp.float32),
      w1p, b1p, w2p, b2p)
    return out[:M].reshape(B, T, E)


# =====================  final LayerNorm + lm_head kernel  =====================

def _lm_head_kernel(x_ref, g_ref, be_ref, w_ref, bias_ref, o_ref):
    x = x_ref[...].astype(jnp.float32)
    xn = _layernorm_f32(x, g_ref[...], be_ref[...])
    o_ref[...] = (jnp.dot(xn.astype(w_ref.dtype), w_ref[...],
                          preferred_element_type=jnp.float32)
                  + bias_ref[...]).astype(o_ref.dtype)


def lm_head(x, gamma, beta, w, b, *, tile_m=256):
    """x: (B, T_pad, E) f32 -> logits (B, T_pad, vocab) f32."""
    B, T, E = x.shape
    V = w.shape[1]
    M = B * T
    cd = COMPUTE_DTYPE
    tm = min(tile_m, _round_up(M, 8))
    M_pad = _round_up(M, tm)
    V_pad = _round_up(V, 128)                                  # lane-dense logits

    x2 = x.reshape(M, E)
    if M_pad != M:
        x2 = jnp.pad(x2, ((0, M_pad - M), (0, 0)))
    wp = jnp.pad(w.astype(cd), ((0, 0), (0, V_pad - V)))
    bp = jnp.pad(b.astype(jnp.float32).reshape(1, V), ((0, 0), (0, V_pad - V)))

    out = pl.pallas_call(
        _lm_head_kernel,
        out_shape=jax.ShapeDtypeStruct((M_pad, V_pad), jnp.float32),
        grid_spec=pltpu.PrefetchScalarGridSpec(
            num_scalar_prefetch=0,
            grid=(M_pad // tm,),
            in_specs=[
                pl.BlockSpec((tm, E),    lambda i: (i, 0)),
                pl.BlockSpec((1, E),     lambda i: (0, 0)),
                pl.BlockSpec((1, E),     lambda i: (0, 0)),
                pl.BlockSpec((E, V_pad), lambda i: (0, 0)),
                pl.BlockSpec((1, V_pad), lambda i: (0, 0)),
            ],
            out_specs=pl.BlockSpec((tm, V_pad), lambda i: (i, 0)),
        ),
        compiler_params=pltpu.CompilerParams(dimension_semantics=("parallel",)),
    )(x2, gamma.reshape(1, E).astype(jnp.float32), beta.reshape(1, E).astype(jnp.float32),
      wp, bp)
    return out[:M].reshape(B, T, V_pad)[:, :, :V]


# =====================  full BigramLM forward  =====================

@jax.jit
def bigram_lm_forward(idx, params):
    """idx: (B, T) int32 token ids -> logits (B, T, vocab) f32 (targets=None path)."""
    B, T = idx.shape
    tok = jnp.take(params["tok_emb"], idx, axis=0)             # (B, T, E)   embedding gather
    pos = params["pos_emb"][:T]                                # (T, E)
    x = (tok + pos[None, :, :]).astype(jnp.float32)

    T_pad = _round_up(T, 8)
    if T_pad != T:                                             # causal mask keeps padding inert
        x = jnp.pad(x, ((0, 0), (0, T_pad - T), (0, 0)))

    for lyr in params["blocks"]:
        x = attention_block(x, lyr["ln1_g"], lyr["ln1_b"],
                            lyr["wq"], lyr["wk"], lyr["wv"], lyr["wp"], lyr["bp"])
        x = ffn_block(x, lyr["ln2_g"], lyr["ln2_b"],
                      lyr["w1"], lyr["b1"], lyr["w2"], lyr["b2"])

    logits = lm_head(x, params["lnf_g"], params["lnf_b"],
                     params["w_lm"], params["b_lm"])
    return logits[:, :T, :]


# =====================  init + pure-JAX reference  =====================

def _init_linear(key, fan_in, fan_out):
    """torch.nn.Linear init, weight stored transposed as (in_features, out_features)."""
    kw, kb = jax.random.split(key)
    bound = 1.0 / (fan_in ** 0.5)
    w = jax.random.uniform(kw, (fan_in, fan_out), jnp.float32, -bound, bound)
    b = jax.random.uniform(kb, (fan_out,), jnp.float32, -bound, bound)
    return w, b


def init_params(key, vocab_size):
    ks = jax.random.split(key, 3 + N_LAYER)
    params = {
        "tok_emb": jax.random.normal(ks[0], (vocab_size, N_EMBED), jnp.float32),
        "pos_emb": jax.random.normal(ks[1], (BLOCK_SIZE, N_EMBED), jnp.float32),
        "lnf_g": jnp.ones((N_EMBED,), jnp.float32),
        "lnf_b": jnp.zeros((N_EMBED,), jnp.float32),
    }
    params["w_lm"], params["b_lm"] = _init_linear(ks[2], N_EMBED, vocab_size)
    blocks = []
    for l in range(N_LAYER):
        kk = jax.random.split(ks[3 + l], 6)
        wq, _ = _init_linear(kk[0], N_EMBED, N_EMBED)          # Head linears: bias=False
        wk, _ = _init_linear(kk[1], N_EMBED, N_EMBED)
        wv, _ = _init_linear(kk[2], N_EMBED, N_EMBED)
        wp, bp = _init_linear(kk[3], N_EMBED, N_EMBED)
        w1, b1 = _init_linear(kk[4], N_EMBED, 4 * N_EMBED)
        w2, b2 = _init_linear(kk[5], 4 * N_EMBED, N_EMBED)
        blocks.append(dict(ln1_g=jnp.ones((N_EMBED,)), ln1_b=jnp.zeros((N_EMBED,)),
                           ln2_g=jnp.ones((N_EMBED,)), ln2_b=jnp.zeros((N_EMBED,)),
                           wq=wq, wk=wk, wv=wv, wp=wp, bp=bp,
                           w1=w1, b1=b1, w2=w2, b2=b2))
    params["blocks"] = blocks
    return params


def reference_forward(idx, params):
    """Pure-JAX eval-mode forward mirroring kernel numerics (bf16 MXU operands, f32 accum)."""
    cd = COMPUTE_DTYPE
    B, T = idx.shape

    def ln(x, g, b):
        mu = jnp.mean(x, -1, keepdims=True)
        xc = x - mu
        var = jnp.mean(xc * xc, -1, keepdims=True)
        return xc * jax.lax.rsqrt(var + LN_EPS) * g + b

    tok = jnp.take(params["tok_emb"], idx, axis=0)
    x = (tok + params["pos_emb"][:T][None]).astype(jnp.float32)
    causal = jnp.arange(T)[:, None] >= jnp.arange(T)[None, :]
    scale = HEAD_SIZE ** -0.5

    for lyr in params["blocks"]:
        xb = ln(x, lyr["ln1_g"], lyr["ln1_b"]).astype(cd)
        q = jnp.einsum("bte,ef->btf", xb, lyr["wq"].astype(cd),
                       preferred_element_type=jnp.float32)
        k = jnp.einsum("bte,ef->btf", xb, lyr["wk"].astype(cd),
                       preferred_element_type=jnp.float32)
        v = jnp.einsum("bte,ef->btf", xb, lyr["wv"].astype(cd),
                       preferred_element_type=jnp.float32)
        proj = jnp.zeros_like(x)
        for h in range(N_HEAD):
            sl = slice(h * HEAD_SIZE, (h + 1) * HEAD_SIZE)
            s = jnp.einsum("bqd,bkd->bqk", q[..., sl].astype(cd), k[..., sl].astype(cd),
                           preferred_element_type=jnp.float32) * scale
            s = jnp.where(causal[None], s, -jnp.inf)
            s = s - s.max(-1, keepdims=True)
            p = jnp.exp(s)
            p = p / p.sum(-1, keepdims=True)
            oh = jnp.einsum("bqk,bkd->bqd", p.astype(cd), v[..., sl].astype(cd),
                            preferred_element_type=jnp.float32)
            proj += jnp.einsum("bqd,de->bqe", oh.astype(cd),
                               lyr["wp"][sl, :].astype(cd),
                               preferred_element_type=jnp.float32)
        x = x + proj + lyr["bp"]
        xn2 = ln(x, lyr["ln2_g"], lyr["ln2_b"]).astype(cd)
        h1 = jnp.einsum("bte,eh->bth", xn2, lyr["w1"].astype(cd),
                        preferred_element_type=jnp.float32) + lyr["b1"]
        h1 = jnp.maximum(h1, 0.0)
        f = jnp.einsum("bth,he->bte", h1.astype(cd), lyr["w2"].astype(cd),
                       preferred_element_type=jnp.float32) + lyr["b2"]
        x = x + f

    xn = ln(x, params["lnf_g"], params["lnf_b"]).astype(cd)
    return jnp.einsum("bte,ev->btv", xn, params["w_lm"].astype(cd),
                      preferred_element_type=jnp.float32) + params["b_lm"]


if __name__ == "__main__":
    VOCAB = 65           # Shakespeare-sized char vocab
    B, T = 2, 8          # small batch / sequence

    key = jax.random.PRNGKey(0)
    kp, ki = jax.random.split(key)
    params = init_params(kp, VOCAB)
    idx = jax.random.randint(ki, (B, T), 0, VOCAB, dtype=jnp.int32)

    logits = bigram_lm_forward(idx, params)
    logits = jax.block_until_ready(logits)

    ref = reference_forward(idx, params)

    assert logits.shape == (B, T, VOCAB), logits.shape
    max_err = float(jnp.max(jnp.abs(logits - ref)))
    assert jnp.allclose(logits, ref, atol=2e-2, rtol=2e-2), max_err

    print("KERNEL_OK")
</pallas_src>

<mosaic_0001>
module attributes {stable_mosaic.version = 11 : i64} {
  func.func @_attn_block_kernel(%arg0: i32, %arg1: memref<1x8x384xf32, #tpu.memory_space<vmem>>, %arg2: memref<1x384xf32, #tpu.memory_space<vmem>>, %arg3: memref<1x384xf32, #tpu.memory_space<vmem>>, %arg4: memref<384x384xbf16, #tpu.memory_space<vmem>>, %arg5: memref<384x384xbf16, #tpu.memory_space<vmem>>, %arg6: memref<384x384xbf16, #tpu.memory_space<vmem>>, %arg7: memref<384x384xbf16, #tpu.memory_space<vmem>>, %arg8: memref<1x384xf32, #tpu.memory_space<vmem>>, %arg9: memref<1x8x384xf32, #tpu.memory_space<vmem>>) attributes {dimension_semantics = [#tpu.dimension_semantics<parallel>], iteration_bounds = array<i64: 2>, scalar_prefetch = 0 : i64, scratch_operands = 0 : i64, tpu.core_type = #tpu.core_type<tc>, window_params = [{transform_indices = @transform_0, window_bounds = array<i64: 1, 8, 384>}, {pipeline_mode = #tpu.pipeline_mode<synchronous>, transform_indices = @transform_1, window_bounds = array<i64: 1, 384>}, {pipeline_mode = #tpu.pipeline_mode<synchronous>, transform_indices = @transform_2, window_bounds = array<i64: 1, 384>}, {pipeline_mode = #tpu.pipeline_mode<synchronous>, transform_indices = @transform_3, window_bounds = array<i64: 384, 384>}, {pipeline_mode = #tpu.pipeline_mode<synchronous>, transform_indices = @transform_4, window_bounds = array<i64: 384, 384>}, {pipeline_mode = #tpu.pipeline_mode<synchronous>, transform_indices = @transform_5, window_bounds = array<i64: 384, 384>}, {pipeline_mode = #tpu.pipeline_mode<synchronous>, transform_indices = @transform_6, window_bounds = array<i64: 384, 384>}, {pipeline_mode = #tpu.pipeline_mode<synchronous>, transform_indices = @transform_7, window_bounds = array<i64: 1, 384>}, {transform_indices = @transform_8, window_bounds = array<i64: 1, 8, 384>}]} {
    %c0 = arith.constant 0 : index
    %c0_0 = arith.constant 0 : index
    %c0_1 = arith.constant 0 : index
    %0 = vector.load %arg1[%c0, %c0_0, %c0_1] : memref<1x8x384xf32, #tpu.memory_space<vmem>>, vector<1x8x384xf32>
    %1 = vector.shape_cast %0 : vector<1x8x384xf32> to vector<8x384xf32>
    %c0_2 = arith.constant 0 : index
    %c0_3 = arith.constant 0 : index
    %2 = vector.load %arg2[%c0_2, %c0_3] : memref<1x384xf32, #tpu.memory_space<vmem>>, vector<1x384xf32>
    %c0_4 = arith.constant 0 : index
    %c0_5 = arith.constant 0 : index
    %3 = vector.load %arg3[%c0_4, %c0_5] : memref<1x384xf32, #tpu.memory_space<vmem>>, vector<1x384xf32>
    %cst = arith.constant dense<0.000000e+00> : vector<8xf32>
    %4 = vector.multi_reduction <add>, %1, %cst [1] : vector<8x384xf32> to vector<8xf32>
    %5 = vector.shape_cast %4 : vector<8xf32> to vector<8x1xf32>
    %cst_6 = arith.constant 3.840000e+02 : f32
    %6 = vector.broadcast %cst_6 : f32 to vector<8x1xf32>
    %7 = arith.divf %5, %6 : vector<8x1xf32>
    %8 = vector.broadcast %7 : vector<8x1xf32> to vector<8x384xf32>
    %9 = arith.subf %1, %8 : vector<8x384xf32>
    %10 = arith.mulf %9, %9 : vector<8x384xf32>
    %cst_7 = arith.constant dense<0.000000e+00> : vector<8xf32>
    %11 = vector.multi_reduction <add>, %10, %cst_7 [1] : vector<8x384xf32> to vector<8xf32>
    %12 = vector.shape_cast %11 : vector<8xf32> to vector<8x1xf32>
    %cst_8 = arith.constant 3.840000e+02 : f32
    %13 = vector.broadcast %cst_8 : f32 to vector<8x1xf32>
    %14 = arith.divf %12, %13 : vector<8x1xf32>
    %cst_9 = arith.constant 9.99999974E-6 : f32
    %15 = vector.broadcast %cst_9 : f32 to vector<8x1xf32>
    %16 = arith.addf %14, %15 : vector<8x1xf32>
    %17 = math.rsqrt %16 : vector<8x1xf32>
    %18 = vector.broadcast %17 : vector<8x1xf32> to vector<8x384xf32>
    %19 = arith.mulf %9, %18 : vector<8x384xf32>
    %20 = vector.broadcast %2 : vector<1x384xf32> to vector<8x384xf32>
    %21 = arith.mulf %19, %20 : vector<8x384xf32>
    %22 = vector.broadcast %3 : vector<1x384xf32> to vector<8x384xf32>
    %23 = arith.addf %21, %22 : vector<8x384xf32>
    %24 = arith.truncf %23 : vector<8x384xf32> to vector<8x384xbf16>
    %c0_10 = arith.constant 0 : index
    %c0_11 = arith.constant 0 : index
    %25 = vector.load %arg4[%c0_10, %c0_11] : memref<384x384xbf16, #tpu.memory_space<vmem>>, vector<384x384xbf16>
    %cst_12 = arith.constant dense<0.000000e+00> : vector<8x384xf32>
    %26 = tpu.matmul %24, %25, %cst_12 {dimension_numbers = #tpu.dot_dimension_numbers<[1], [0], [0], [1], [0, 0, 1, 1], [], []>} : vector<8x384xbf16>, vector<384x384xbf16>, vector<8x384xf32> -> vector<8x384xf32>
    %c0_13 = arith.constant 0 : index
    %c0_14 = arith.constant 0 : index
    %27 = vector.load %arg5[%c0_13, %c0_14] : memref<384x384xbf16, #tpu.memory_space<vmem>>, vector<384x384xbf16>
    %cst_15 = arith.constant dense<0.000000e+00> : vector<8x384xf32>
    %28 = tpu.matmul %24, %27, %cst_15 {dimension_numbers = #tpu.dot_dimension_numbers<[1], [0], [0], [1], [0, 0, 1, 1], [], []>} : vector<8x384xbf16>, vector<384x384xbf16>, vector<8x384xf32> -> vector<8x384xf32>
    %c0_16 = arith.constant 0 : index
    %c0_17 = arith.constant 0 : index
    %29 = vector.load %arg6[%c0_16, %c0_17] : memref<384x384xbf16, #tpu.memory_space<vmem>>, vector<384x384xbf16>
    %cst_18 = arith.constant dense<0.000000e+00> : vector<8x384xf32>
    %30 = tpu.matmul %24, %29, %cst_18 {dimension_numbers = #tpu.dot_dimension_numbers<[1], [0], [0], [1], [0, 0, 1, 1], [], []>} : vector<8x384xbf16>, vector<384x384xbf16>, vector<8x384xf32> -> vector<8x384xf32>
    %31 = tpu.iota {dimensions = array<i32: 0>} : vector<8x8xi32>
    %32 = tpu.iota {dimensions = array<i32: 1>} : vector<8x8xi32>
    %33 = arith.cmpi sge, %31, %32 : vector<8x8xi32>
    %cst_19 = arith.constant 0.000000e+00 : f32
    %34 = vector.broadcast %cst_19 : f32 to vector<8x384xf32>
    %35 = vector.extract_strided_slice %26 {offsets = [0, 0], sizes = [8, 64], strides = [1, 1]} : vector<8x384xf32> to vector<8x64xf32>
    %36 = arith.truncf %35 : vector<8x64xf32> to vector<8x64xbf16>
    %37 = vector.extract_strided_slice %28 {offsets = [0, 0], sizes = [8, 64], strides = [1, 1]} : vector<8x384xf32> to vector<8x64xf32>
    %38 = arith.truncf %37 : vector<8x64xf32> to vector<8x64xbf16>
    %39 = vector.extract_strided_slice %30 {offsets = [0, 0], sizes = [8, 64], strides = [1, 1]} : vector<8x384xf32> to vector<8x64xf32>
    %40 = arith.truncf %39 : vector<8x64xf32> to vector<8x64xbf16>
    %cst_20 = arith.constant dense<0.000000e+00> : vector<8x8xf32>
    %41 = tpu.matmul %36, %38, %cst_20 {dimension_numbers = #tpu.dot_dimension_numbers<[1], [1], [0], [0], [0, 0, 1, 0], [], []>} : vector<8x64xbf16>, vector<8x64xbf16>, vector<8x8xf32> -> vector<8x8xf32>
    %cst_21 = arith.constant 1.250000e-01 : f32
    %42 = vector.broadcast %cst_21 : f32 to vector<8x8xf32>
    %43 = arith.mulf %41, %42 : vector<8x8xf32>
    %cst_22 = arith.constant 0xFF800000 : f32
    %44 = vector.broadcast %cst_22 : f32 to vector<8x8xf32>
    %45 = arith.select %33, %43, %44 : vector<8x8xi1>, vector<8x8xf32>
    %cst_23 = arith.constant dense<0xFF800000> : vector<8xf32>
    %46 = vector.multi_reduction <maximumf>, %45, %cst_23 [1] : vector<8x8xf32> to vector<8xf32>
    %47 = vector.shape_cast %46 : vector<8xf32> to vector<8x1xf32>
    %48 = vector.broadcast %47 : vector<8x1xf32> to vector<8x8xf32>
    %49 = arith.subf %45, %48 : vector<8x8xf32>
    %50 = math.exp %49 : vector<8x8xf32>
    %cst_24 = arith.constant dense<0.000000e+00> : vector<8xf32>
    %51 = vector.multi_reduction <add>, %50, %cst_24 [1] : vector<8x8xf32> to vector<8xf32>
    %52 = vector.shape_cast %51 : vector<8xf32> to vector<8x1xf32>
    %53 = vector.broadcast %52 : vector<8x1xf32> to vector<8x8xf32>
    %54 = arith.divf %50, %53 : vector<8x8xf32>
    %55 = arith.truncf %54 : vector<8x8xf32> to vector<8x8xbf16>
    %cst_25 = arith.constant dense<0.000000e+00> : vector<8x64xf32>
    %56 = tpu.matmul %55, %40, %cst_25 {dimension_numbers = #tpu.dot_dimension_numbers<[1], [0], [0], [1], [0, 0, 1, 1], [], []>} : vector<8x8xbf16>, vector<8x64xbf16>, vector<8x64xf32> -> vector<8x64xf32>
    %57 = arith.truncf %56 : vector<8x64xf32> to vector<8x64xbf16>
    %c0_26 = arith.constant 0 : index
    %c0_27 = arith.constant 0 : index
    %58 = vector.load %arg7[%c0_26, %c0_27] : memref<384x384xbf16, #tpu.memory_space<vmem>>, vector<64x384xbf16>
    %cst_28 = arith.constant dense<0.000000e+00> : vector<8x384xf32>
    %59 = tpu.matmul %57, %58, %cst_28 {dimension_numbers = #tpu.dot_dimension_numbers<[1], [0], [0], [1], [0, 0, 1, 1], [], []>} : vector<8x64xbf16>, vector<64x384xbf16>, vector<8x384xf32> -> vector<8x384xf32>
    %60 = arith.addf %34, %59 : vector<8x384xf32>
    %61 = vector.extract_strided_slice %26 {offsets = [0, 64], sizes = [8, 64], strides = [1, 1]} : vector<8x384xf32> to vector<8x64xf32>
    %62 = arith.truncf %61 : vector<8x64xf32> to vector<8x64xbf16>
    %63 = vector.extract_strided_slice %28 {offsets = [0, 64], sizes = [8, 64], strides = [1, 1]} : vector<8x384xf32> to vector<8x64xf32>
    %64 = arith.truncf %63 : vector<8x64xf32> to vector<8x64xbf16>
    %65 = vector.extract_strided_slice %30 {offsets = [0, 64], sizes = [8, 64], strides = [1, 1]} : vector<8x384xf32> to vector<8x64xf32>
    %66 = arith.truncf %65 : vector<8x64xf32> to vector<8x64xbf16>
    %cst_29 = arith.constant dense<0.000000e+00> : vector<8x8xf32>
    %67 = tpu.matmul %62, %64, %cst_29 {dimension_numbers = #tpu.dot_dimension_numbers<[1], [1], [0], [0], [0, 0, 1, 0], [], []>} : vector<8x64xbf16>, vector<8x64xbf16>, vector<8x8xf32> -> vector<8x8xf32>
    %cst_30 = arith.constant 1.250000e-01 : f32
    %68 = vector.broadcast %cst_30 : f32 to vector<8x8xf32>
    %69 = arith.mulf %67, %68 : vector<8x8xf32>
    %cst_31 = arith.constant 0xFF800000 : f32
    %70 = vector.broadcast %cst_31 : f32 to vector<8x8xf32>
    %71 = arith.select %33, %69, %70 : vector<8x8xi1>, vector<8x8xf32>
    %cst_32 = arith.constant dense<0xFF800000> : vector<8xf32>
    %72 = vector.multi_reduction <maximumf>, %71, %cst_32 [1] : vector<8x8xf32> to vector<8xf32>
    %73 = vector.shape_cast %72 : vector<8xf32> to vector<8x1xf32>
    %74 = vector.broadcast %73 : vector<8x1xf32> to vector<8x8xf32>
    %75 = arith.subf %71, %74 : vector<8x8xf32>
    %76 = math.exp %75 : vector<8x8xf32>
    %cst_33 = arith.constant dense<0.000000e+00> : vector<8xf32>
    %77 = vector.multi_reduction <add>, %76, %cst_33 [1] : vector<8x8xf32> to vector<8xf32>
    %78 = vector.shape_cast %77 : vector<8xf32> to vector<8x1xf32>
    %79 = vector.broadcast %78 : vector<8x1xf32> to vector<8x8xf32>
    %80 = arith.divf %76, %79 : vector<8x8xf32>
    %81 = arith.truncf %80 : vector<8x8xf32> to vector<8x8xbf16>
    %cst_34 = arith.constant dense<0.000000e+00> : vector<8x64xf32>
    %82 = tpu.matmul %81, %66, %cst_34 {dimension_numbers = #tpu.dot_dimension_numbers<[1], [0], [0], [1], [0, 0, 1, 1], [], []>} : vector<8x8xbf16>, vector<8x64xbf16>, vector<8x64xf32> -> vector<8x64xf32>
    %83 = arith.truncf %82 : vector<8x64xf32> to vector<8x64xbf16>
    %c64 = arith.constant 64 : index
    %c0_35 = arith.constant 0 : index
    %84 = vector.load %arg7[%c64, %c0_35] : memref<384x384xbf16, #tpu.memory_space<vmem>>, vector<64x384xbf16>
    %cst_36 = arith.constant dense<0.000000e+00> : vector<8x384xf32>
    %85 = tpu.matmul %83, %84, %cst_36 {dimension_numbers = #tpu.dot_dimension_numbers<[1], [0], [0], [1], [0, 0, 1, 1], [], []>} : vector<8x64xbf16>, vector<64x384xbf16>, vector<8x384xf32> -> vector<8x384xf32>
    %86 = arith.addf %60, %85 : vector<8x384xf32>
    %87 = vector.extract_strided_slice %26 {offsets = [0, 128], sizes = [8, 64], strides = [1, 1]} : vector<8x384xf32> to vector<8x64xf32>
    %88 = arith.truncf %87 : vector<8x64xf32> to vector<8x64xbf16>
    %89 = vector.extract_strided_slice %28 {offsets = [0, 128], sizes = [8, 64], strides = [1, 1]} : vector<8x384xf32> to vector<8x64xf32>
    %90 = arith.truncf %89 : vector<8x64xf32> to vector<8x64xbf16>
    %91 = vector.extract_strided_slice %30 {offsets = [0, 128], sizes = [8, 64], strides = [1, 1]} : vector<8x384xf32> to vector<8x64xf32>
    %92 = arith.truncf %91 : vector<8x64xf32> to vector<8x64xbf16>
    %cst_37 = arith.constant dense<0.000000e+00> : vector<8x8xf32>
    %93 = tpu.matmul %88, %90, %cst_37 {dimension_numbers = #tpu.dot_dimension_numbers<[1], [1], [0], [0], [0, 0, 1, 0], [], []>} : vector<8x64xbf16>, vector<8x64xbf16>, vector<8x8xf32> -> vector<8x8xf32>
    %cst_38 = arith.constant 1.250000e-01 : f32
    %94 = vector.broadcast %cst_38 : f32 to vector<8x8xf32>
    %95 = arith.mulf %93, %94 : vector<8x8xf32>
    %cst_39 = arith.constant 0xFF800000 : f32
    %96 = vector.broadcast %cst_39 : f32 to vector<8x8xf32>
    %97 = arith.select %33, %95, %96 : vector<8x8xi1>, vector<8x8xf32>
    %cst_40 = arith.constant dense<0xFF800000> : vector<8xf32>
    %98 = vector.multi_reduction <maximumf>, %97, %cst_40 [1] : vector<8x8xf32> to vector<8xf32>
    %99 = vector.shape_cast %98 : vector<8xf32> to vector<8x1xf32>
    %100 = vector.broadcast %99 : vector<8x1xf32> to vector<8x8xf32>
    %101 = arith.subf %97, %100 : vector<8x8xf32>
    %102 = math.exp %101 : vector<8x8xf32>
    %cst_41 = arith.constant dense<0.000000e+00> : vector<8xf32>
    %103 = vector.multi_reduction <add>, %102, %cst_41 [1] : vector<8x8xf32> to vector<8xf32>
    %104 = vector.shape_cast %103 : vector<8xf32> to vector<8x1xf32>
    %105 = vector.broadcast %104 : vector<8x1xf32> to vector<8x8xf32>
    %106 = arith.divf %102, %105 : vector<8x8xf32>
    %107 = arith.truncf %106 : vector<8x8xf32> to vector<8x8xbf16>
    %cst_42 = arith.constant dense<0.000000e+00> : vector<8x64xf32>
    %108 = tpu.matmul %107, %92, %cst_42 {dimension_numbers = #tpu.dot_dimension_numbers<[1], [0], [0], [1], [0, 0, 1, 1], [], []>} : vector<8x8xbf16>, vector<8x64xbf16>, vector<8x64xf32> -> vector<8x64xf32>
    %109 = arith.truncf %108 : vector<8x64xf32> to vector<8x64xbf16>
    %c128 = arith.constant 128 : index
    %c0_43 = arith.constant 0 : index
    %110 = vector.load %arg7[%c128, %c0_43] : memref<384x384xbf16, #tpu.memory_space<vmem>>, vector<64x384xbf16>
    %cst_44 = arith.constant dense<0.000000e+00> : vector<8x384xf32>
    %111 = tpu.matmul %109, %110, %cst_44 {dimension_numbers = #tpu.dot_dimension_numbers<[1], [0], [0], [1], [0, 0, 1, 1], [], []>} : vector<8x64xbf16>, vector<64x384xbf16>, vector<8x384xf32> -> vector<8x384xf32>
    %112 = arith.addf %86, %111 : vector<8x384xf32>
    %113 = vector.extract_strided_slice %26 {offsets = [0, 192], sizes = [8, 64], strides = [1, 1]} : vector<8x384xf32> to vector<8x64xf32>
    %114 = arith.truncf %113 : vector<8x64xf32> to vector<8x64xbf16>
    %115 = vector.extract_strided_slice %28 {offsets = [0, 192], sizes = [8, 64], strides = [1, 1]} : vector<8x384xf32> to vector<8x64xf32>
    %116 = arith.truncf %115 : vector<8x64xf32> to vector<8x64xbf16>
    %117 = vector.extract_strided_slice %30 {offsets = [0, 192], sizes = [8, 64], strides = [1, 1]} : vector<8x384xf32> to vector<8x64xf32>
    %118 = arith.truncf %117 : vector<8x64xf32> to vector<8x64xbf16>
    %cst_45 = arith.constant dense<0.000000e+00> : vector<8x8xf32>
    %119 = tpu.matmul %114, %116, %cst_45 {dimension_numbers = #tpu.dot_dimension_numbers<[1], [1], [0], [0], [0, 0, 1, 0], [], []>} : vector<8x64xbf16>, vector<8x64xbf16>, vector<8x8xf32> -> vector<8x8xf32>
    %cst_46 = arith.constant 1.250000e-01 : f32
    %120 = vector.broadcast %cst_46 : f32 to vector<8x8xf32>
    %121 = arith.mulf %119, %120 : vector<8x8xf32>
    %cst_47 = arith.constant 0xFF800000 : f32
    %122 = vector.broadcast %cst_47 : f32 to vector<8x8xf32>
    %123 = arith.select %33, %121, %122 : vector<8x8xi1>, vector<8x8xf32>
    %cst_48 = arith.constant dense<0xFF800000> : vector<8xf32>
    %124 = vector.multi_reduction <maximumf>, %123, %cst_48 [1] : vector<8x8xf32> to vector<8xf32>
    %125 = vector.shape_cast %124 : vector<8xf32> to vector<8x1xf32>
    %126 = vector.broadcast %125 : vector<8x1xf32> to vector<8x8xf32>
    %127 = arith.subf %123, %126 : vector<8x8xf32>
    %128 = math.exp %127 : vector<8x8xf32>
    %cst_49 = arith.constant dense<0.000000e+00> : vector<8xf32>
    %129 = vector.multi_reduction <add>, %128, %cst_49 [1] : vector<8x8xf32> to vector<8xf32>
    %130 = vector.shape_cast %129 : vector<8xf32> to vector<8x1xf32>
    %131 = vector.broadcast %130 : vector<8x1xf32> to vector<8x8xf32>
    %132 = arith.divf %128, %131 : vector<8x8xf32>
    %133 = arith.truncf %132 : vector<8x8xf32> to vector<8x8xbf16>
    %cst_50 = arith.constant dense<0.000000e+00> : vector<8x64xf32>
    %134 = tpu.matmul %133, %118, %cst_50 {dimension_numbers = #tpu.dot_dimension_numbers<[1], [0], [0], [1], [0, 0, 1, 1], [], []>} : vector<8x8xbf16>, vector<8x64xbf16>, vector<8x64xf32> -> vector<8x64xf32>
    %135 = arith.truncf %134 : vector<8x64xf32> to vector<8x64xbf16>
    %c192 = arith.constant 192 : index
    %c0_51 = arith.constant 0 : index
    %136 = vector.load %arg7[%c192, %c0_51] : memref<384x384xbf16, #tpu.memory_space<vmem>>, vector<64x384xbf16>
    %cst_52 = arith.constant dense<0.000000e+00> : vector<8x384xf32>
    %137 = tpu.matmul %135, %136, %cst_52 {dimension_numbers = #tpu.dot_dimension_numbers<[1], [0], [0], [1], [0, 0, 1, 1], [], []>} : vector<8x64xbf16>, vector<64x384xbf16>, vector<8x384xf32> -> vector<8x384xf32>
    %138 = arith.addf %112, %137 : vector<8x384xf32>
    %139 = vector.extract_strided_slice %26 {offsets = [0, 256], sizes = [8, 64], strides = [1, 1]} : vector<8x384xf32> to vector<8x64xf32>
    %140 = arith.truncf %139 : vector<8x64xf32> to vector<8x64xbf16>
    %141 = vector.extract_strided_slice %28 {offsets = [0, 256], sizes = [8, 64], strides = [1, 1]} : vector<8x384xf32> to vector<8x64xf32>
    %142 = arith.truncf %141 : vector<8x64xf32> to vector<8x64xbf16>
    %143 = vector.extract_strided_slice %30 {offsets = [0, 256], sizes = [8, 64], strides = [1, 1]} : vector<8x384xf32> to vector<8x64xf32>
    %144 = arith.truncf %143 : vector<8x64xf32> to vector<8x64xbf16>
    %cst_53 = arith.constant dense<0.000000e+00> : vector<8x8xf32>
    %145 = tpu.matmul %140, %142, %cst_53 {dimension_numbers = #tpu.dot_dimension_numbers<[1], [1], [0], [0], [0, 0, 1, 0], [], []>} : vector<8x64xbf16>, vector<8x64xbf16>, vector<8x8xf32> -> vector<8x8xf32>
    %cst_54 = arith.constant 1.250000e-01 : f32
    %146 = vector.broadcast %cst_54 : f32 to vector<8x8xf32>
    %147 = arith.mulf %145, %146 : vector<8x8xf32>
    %cst_55 = arith.constant 0xFF800000 : f32
    %148 = vector.broadcast %cst_55 : f32 to vector<8x8xf32>
    %149 = arith.select %33, %147, %148 : vector<8x8xi1>, vector<8x8xf32>
    %cst_56 = arith.constant dense<0xFF800000> : vector<8xf32>
    %150 = vector.multi_reduction <maximumf>, %149, %cst_56 [1] : vector<8x8xf32> to vector<8xf32>
    %151 = vector.shape_cast %150 : vector<8xf32> to vector<8x1xf32>
    %152 = vector.broadcast %151 : vector<8x1xf32> to vector<8x8xf32>
    %153 = arith.subf %149, %152 : vector<8x8xf32>
    %154 = math.exp %153 : vector<8x8xf32>
    %cst_57 = arith.constant dense<0.000000e+00> : vector<8xf32>
    %155 = vector.multi_reduction <add>, %154, %cst_57 [1] : vector<8x8xf32> to vector<8xf32>
    %156 = vector.shape_cast %155 : vector<8xf32> to vector<8x1xf32>
    %157 = vector.broadcast %156 : vector<8x1xf32> to vector<8x8xf32>
    %158 = arith.divf %154, %157 : vector<8x8xf32>
    %159 = arith.truncf %158 : vector<8x8xf32> to vector<8x8xbf16>
    %cst_58 = arith.constant dense<0.000000e+00> : vector<8x64xf32>
    %160 = tpu.matmul %159, %144, %cst_58 {dimension_numbers = #tpu.dot_dimension_numbers<[1], [0], [0], [1], [0, 0, 1, 1], [], []>} : vector<8x8xbf16>, vector<8x64xbf16>, vector<8x64xf32> -> vector<8x64xf32>
    %161 = arith.truncf %160 : vector<8x64xf32> to vector<8x64xbf16>
    %c256 = arith.constant 256 : index
    %c0_59 = arith.constant 0 : index
    %162 = vector.load %arg7[%c256, %c0_59] : memref<384x384xbf16, #tpu.memory_space<vmem>>, vector<64x384xbf16>
    %cst_60 = arith.constant dense<0.000000e+00> : vector<8x384xf32>
    %163 = tpu.matmul %161, %162, %cst_60 {dimension_numbers = #tpu.dot_dimension_numbers<[1], [0], [0], [1], [0, 0, 1, 1], [], []>} : vector<8x64xbf16>, vector<64x384xbf16>, vector<8x384xf32> -> vector<8x384xf32>
    %164 = arith.addf %138, %163 : vector<8x384xf32>
    %165 = vector.extract_strided_slice %26 {offsets = [0, 320], sizes = [8, 64], strides = [1, 1]} : vector<8x384xf32> to vector<8x64xf32>
    %166 = arith.truncf %165 : vector<8x64xf32> to vector<8x64xbf16>
    %167 = vector.extract_strided_slice %28 {offsets = [0, 320], sizes = [8, 64], strides = [1, 1]} : vector<8x384xf32> to vector<8x64xf32>
    %168 = arith.truncf %167 : vector<8x64xf32> to vector<8x64xbf16>
    %169 = vector.extract_strided_slice %30 {offsets = [0, 320], sizes = [8, 64], strides = [1, 1]} : vector<8x384xf32> to vector<8x64xf32>
    %170 = arith.truncf %169 : vector<8x64xf32> to vector<8x64xbf16>
    %cst_61 = arith.constant dense<0.000000e+00> : vector<8x8xf32>
    %171 = tpu.matmul %166, %168, %cst_61 {dimension_numbers = #tpu.dot_dimension_numbers<[1], [1], [0], [0], [0, 0, 1, 0], [], []>} : vector<8x64xbf16>, vector<8x64xbf16>, vector<8x8xf32> -> vector<8x8xf32>
    %cst_62 = arith.constant 1.250000e-01 : f32
    %172 = vector.broadcast %cst_62 : f32 to vector<8x8xf32>
    %173 = arith.mulf %171, %172 : vector<8x8xf32>
    %cst_63 = arith.constant 0xFF800000 : f32
    %174 = vector.broadcast %cst_63 : f32 to vector<8x8xf32>
    %175 = arith.select %33, %173, %174 : vector<8x8xi1>, vector<8x8xf32>
    %cst_64 = arith.constant dense<0xFF800000> : vector<8xf32>
    %176 = vector.multi_reduction <maximumf>, %175, %cst_64 [1] : vector<8x8xf32> to vector<8xf32>
    %177 = vector.shape_cast %176 : vector<8xf32> to vector<8x1xf32>
    %178 = vector.broadcast %177 : vector<8x1xf32> to vector<8x8xf32>
    %179 = arith.subf %175, %178 : vector<8x8xf32>
    %180 = math.exp %179 : vector<8x8xf32>
    %cst_65 = arith.constant dense<0.000000e+00> : vector<8xf32>
    %181 = vector.multi_reduction <add>, %180, %cst_65 [1] : vector<8x8xf32> to vector<8xf32>
    %182 = vector.shape_cast %181 : vector<8xf32> to vector<8x1xf32>
    %183 = vector.broadcast %182 : vector<8x1xf32> to vector<8x8xf32>
    %184 = arith.divf %180, %183 : vector<8x8xf32>
    %185 = arith.truncf %184 : vector<8x8xf32> to vector<8x8xbf16>
    %cst_66 = arith.constant dense<0.000000e+00> : vector<8x64xf32>
    %186 = tpu.matmul %185, %170, %cst_66 {dimension_numbers = #tpu.dot_dimension_numbers<[1], [0], [0], [1], [0, 0, 1, 1], [], []>} : vector<8x8xbf16>, vector<8x64xbf16>, vector<8x64xf32> -> vector<8x64xf32>
    %187 = arith.truncf %186 : vector<8x64xf32> to vector<8x64xbf16>
    %c320 = arith.constant 320 : index
    %c0_67 = arith.constant 0 : index
    %188 = vector.load %arg7[%c320, %c0_67] : memref<384x384xbf16, #tpu.memory_space<vmem>>, vector<64x384xbf16>
    %cst_68 = arith.constant dense<0.000000e+00> : vector<8x384xf32>
    %189 = tpu.matmul %187, %188, %cst_68 {dimension_numbers = #tpu.dot_dimension_numbers<[1], [0], [0], [1], [0, 0, 1, 1], [], []>} : vector<8x64xbf16>, vector<64x384xbf16>, vector<8x384xf32> -> vector<8x384xf32>
    %190 = arith.addf %164, %189 : vector<8x384xf32>
    %191 = arith.addf %1, %190 : vector<8x384xf32>
    %c0_69 = arith.constant 0 : index
    %c0_70 = arith.constant 0 : index
    %192 = vector.load %arg8[%c0_69, %c0_70] : memref<1x384xf32, #tpu.memory_space<vmem>>, vector<1x384xf32>
    %193 = vector.broadcast %192 : vector<1x384xf32> to vector<8x384xf32>
    %194 = arith.addf %191, %193 : vector<8x384xf32>
    %c0_71 = arith.constant 0 : index
    %c0_72 = arith.constant 0 : index
    %c0_73 = arith.constant 0 : index
    %195 = vector.load %arg9[%c0_71, %c0_72, %c0_73] : memref<1x8x384xf32, #tpu.memory_space<vmem>>, vector<1x8x384xf32>
    %196 = vector.shape_cast %195 : vector<1x8x384xf32> to vector<8x384xf32>
    %197 = vector.shape_cast %194 : vector<8x384xf32> to vector<1x8x384xf32>
    tpu.vector_store %arg9[%c0_71, %c0_72, %c0_73], %197 {strides = array<i32>} : memref<1x8x384xf32, #tpu.memory_space<vmem>>, vector<1x8x384xf32>,
    return
  }
  func.func @transform_0(%arg0: i32) -> (i32, i32, i32) {
    %c0_i32 = arith.constant 0 : i32
    %c0_i32_0 = arith.constant 0 : i32
    %c0_i32_1 = arith.constant 0 : i32
    return %arg0, %c0_i32, %c0_i32_0 : i32, i32, i32
  }
  func.func @transform_1(%arg0: i32) -> (i32, i32) {
    %c0_i32 = arith.constant 0 : i32
    %c0_i32_0 = arith.constant 0 : i32
    %c0_i32_1 = arith.constant 0 : i32
    return %c0_i32, %c0_i32_0 : i32, i32
  }
  func.func @transform_2(%arg0: i32) -> (i32, i32) {
    %c0_i32 = arith.constant 0 : i32
    %c0_i32_0 = arith.constant 0 : i32
    %c0_i32_1 = arith.constant 0 : i32
    return %c0_i32, %c0_i32_0 : i32, i32
  }
  func.func @transform_3(%arg0: i32) -> (i32, i32) {
    %c0_i32 = arith.constant 0 : i32
    %c0_i32_0 = arith.constant 0 : i32
    %c0_i32_1 = arith.constant 0 : i32
    return %c0_i32, %c0_i32_0 : i32, i32
  }
  func.func @transform_4(%arg0: i32) -> (i32, i32) {
    %c0_i32 = arith.constant 0 : i32
    %c0_i32_0 = arith.constant 0 : i32
    %c0_i32_1 = arith.constant 0 : i32
    return %c0_i32, %c0_i32_0 : i32, i32
  }
  func.func @transform_5(%arg0: i32) -> (i32, i32) {
    %c0_i32 = arith.constant 0 : i32
    %c0_i32_0 = arith.constant 0 : i32
    %c0_i32_1 = arith.constant 0 : i32
    return %c0_i32, %c0_i32_0 : i32, i32
  }
  func.func @transform_6(%arg0: i32) -> (i32, i32) {
    %c0_i32 = arith.constant 0 : i32
    %c0_i32_0 = arith.constant 0 : i32
    %c0_i32_1 = arith.constant 0 : i32
    return %c0_i32, %c0_i32_0 : i32, i32
  }
  func.func @transform_7(%arg0: i32) -> (i32, i32) {
    %c0_i32 = arith.constant 0 : i32
    %c0_i32_0 = arith.constant 0 : i32
    %c0_i32_1 = arith.constant 0 : i32
    return %c0_i32, %c0_i32_0 : i32, i32
  }
  func.func @transform_8(%arg0: i32) -> (i32, i32, i32) {
    %c0_i32 = arith.constant 0 : i32
    %c0_i32_0 = arith.constant 0 : i32
    %c0_i32_1 = arith.constant 0 : i32
    return %arg0, %c0_i32, %c0_i32_0 : i32, i32, i32
  }
}

module attributes {stable_mosaic.version = 11 : i64} {
  func.func @_ffn_block_kernel(%arg0: i32, %arg1: i32, %arg2: memref<16x384xf32, #tpu.memory_space<vmem>>, %arg3: memref<1x384xf32, #tpu.memory_space<vmem>>, %arg4: memref<1x384xf32, #tpu.memory_space<vmem>>, %arg5: memref<384x512xbf16, #tpu.memory_space<vmem>>, %arg6: memref<1x512xf32, #tpu.memory_space<vmem>>, %arg7: memref<512x384xbf16, #tpu.memory_space<vmem>>, %arg8: memref<1x384xf32, #tpu.memory_space<vmem>>, %arg9: memref<16x384xf32, #tpu.memory_space<vmem>>, %arg10: memref<16x384xf32, #tpu.memory_space<vmem>>, %arg11: memref<16x384xbf16, #tpu.memory_space<vmem>>) attributes {dimension_semantics = [#tpu.dimension_semantics<parallel>, #tpu.dimension_semantics<arbitrary>], iteration_bounds = array<i64: 1, 3>, scalar_prefetch = 0 : i64, scratch_operands = 2 : i64, tpu.core_type = #tpu.core_type<tc>, window_params = [{transform_indices = @transform_0, window_bounds = array<i64: 16, 384>}, {pipeline_mode = #tpu.pipeline_mode<synchronous>, transform_indices = @transform_1, window_bounds = array<i64: 1, 384>}, {pipeline_mode = #tpu.pipeline_mode<synchronous>, transform_indices = @transform_2, window_bounds = array<i64: 1, 384>}, {transform_indices = @transform_3, window_bounds = array<i64: 384, 512>}, {transform_indices = @transform_4, window_bounds = array<i64: 1, 512>}, {transform_indices = @transform_5, window_bounds = array<i64: 512, 384>}, {pipeline_mode = #tpu.pipeline_mode<synchronous>, transform_indices = @transform_6, window_bounds = array<i64: 1, 384>}, {transform_indices = @transform_7, window_bounds = array<i64: 16, 384>}]} {
    %c0_i32 = arith.constant 0 : i32
    %0 = arith.cmpi eq, %arg1, %c0_i32 : i32
    %1 = arith.extui %0 : i1 to i32
    %c0_i32_0 = arith.constant 0 : i32
    %2 = arith.cmpi ne, %1, %c0_i32_0 : i32
    scf.if %2 {
      %cst_15 = arith.constant 0.000000e+00 : f32
      %20 = vector.broadcast %cst_15 : f32 to vector<16x384xf32>
      %c0_16 = arith.constant 0 : index
      %c0_17 = arith.constant 0 : index
      %21 = vector.load %arg10[%c0_16, %c0_17] : memref<16x384xf32, #tpu.memory_space<vmem>>, vector<16x384xf32>
      tpu.vector_store %arg10[%c0_16, %c0_17], %20 {strides = array<i32>} : memref<16x384xf32, #tpu.memory_space<vmem>>, vector<16x384xf32>,
      %c0_18 = arith.constant 0 : index
      %c0_19 = arith.constant 0 : index
      %22 = vector.load %arg2[%c0_18, %c0_19] : memref<16x384xf32, #tpu.memory_space<vmem>>, vector<16x384xf32>
      %c0_20 = arith.constant 0 : index
      %c0_21 = arith.constant 0 : index
      %23 = vector.load %arg3[%c0_20, %c0_21] : memref<1x384xf32, #tpu.memory_space<vmem>>, vector<1x384xf32>
      %c0_22 = arith.constant 0 : index
      %c0_23 = arith.constant 0 : index
      %24 = vector.load %arg4[%c0_22, %c0_23] : memref<1x384xf32, #tpu.memory_space<vmem>>, vector<1x384xf32>
      %cst_24 = arith.constant dense<0.000000e+00> : vector<16xf32>
      %25 = vector.multi_reduction <add>, %22, %cst_24 [1] : vector<16x384xf32> to vector<16xf32>
      %26 = vector.shape_cast %25 : vector<16xf32> to vector<16x1xf32>
      %cst_25 = arith.constant 3.840000e+02 : f32
      %27 = vector.broadcast %cst_25 : f32 to vector<16x1xf32>
      %28 = arith.divf %26, %27 : vector<16x1xf32>
      %29 = vector.broadcast %28 : vector<16x1xf32> to vector<16x384xf32>
      %30 = arith.subf %22, %29 : vector<16x384xf32>
      %31 = arith.mulf %30, %30 : vector<16x384xf32>
      %cst_26 = arith.constant dense<0.000000e+00> : vector<16xf32>
      %32 = vector.multi_reduction <add>, %31, %cst_26 [1] : vector<16x384xf32> to vector<16xf32>
      %33 = vector.shape_cast %32 : vector<16xf32> to vector<16x1xf32>
      %cst_27 = arith.constant 3.840000e+02 : f32
      %34 = vector.broadcast %cst_27 : f32 to vector<16x1xf32>
      %35 = arith.divf %33, %34 : vector<16x1xf32>
      %cst_28 = arith.constant 9.99999974E-6 : f32
      %36 = vector.broadcast %cst_28 : f32 to vector<16x1xf32>
      %37 = arith.addf %35, %36 : vector<16x1xf32>
      %38 = math.rsqrt %37 : vector<16x1xf32>
      %39 = vector.broadcast %38 : vector<16x1xf32> to vector<16x384xf32>
      %40 = arith.mulf %30, %39 : vector<16x384xf32>
      %41 = vector.broadcast %23 : vector<1x384xf32> to vector<16x384xf32>
      %42 = arith.mulf %40, %41 : vector<16x384xf32>
      %43 = vector.broadcast %24 : vector<1x384xf32> to vector<16x384xf32>
      %44 = arith.addf %42, %43 : vector<16x384xf32>
      %45 = arith.truncf %44 : vector<16x384xf32> to vector<16x384xbf16>
      %c0_29 = arith.constant 0 : index
      %c0_30 = arith.constant 0 : index
      %46 = vector.load %arg11[%c0_29, %c0_30] : memref<16x384xbf16, #tpu.memory_space<vmem>>, vector<16x384xbf16>
      tpu.vector_store %arg11[%c0_29, %c0_30], %45 {strides = array<i32>} : memref<16x384xbf16, #tpu.memory_space<vmem>>, vector<16x384xbf16>,
    } else {
    }
    %c0 = arith.constant 0 : index
    %c0_1 = arith.constant 0 : index
    %3 = vector.load %arg11[%c0, %c0_1] : memref<16x384xbf16, #tpu.memory_space<vmem>>, vector<16x384xbf16>
    %c0_2 = arith.constant 0 : index
    %c0_3 = arith.constant 0 : index
    %4 = vector.load %arg5[%c0_2, %c0_3] : memref<384x512xbf16, #tpu.memory_space<vmem>>, vector<384x512xbf16>
    %cst = arith.constant dense<0.000000e+00> : vector<16x512xf32>
    %5 = tpu.matmul %3, %4, %cst {dimension_numbers = #tpu.dot_dimension_numbers<[1], [0], [0], [1], [0, 0, 1, 1], [], []>} : vector<16x384xbf16>, vector<384x512xbf16>, vector<16x512xf32> -> vector<16x512xf32>
    %c0_4 = arith.constant 0 : index
    %c0_5 = arith.constant 0 : index
    %6 = vector.load %arg6[%c0_4, %c0_5] : memref<1x512xf32, #tpu.memory_space<vmem>>, vector<1x512xf32>
    %7 = vector.broadcast %6 : vector<1x512xf32> to vector<16x512xf32>
    %8 = arith.addf %5, %7 : vector<16x512xf32>
    %cst_6 = arith.constant 0.000000e+00 : f32
    %9 = vector.broadcast %cst_6 : f32 to vector<16x512xf32>
    %10 = arith.maximumf %8, %9 : vector<16x512xf32>
    %c0_7 = arith.constant 0 : index
    %c0_8 = arith.constant 0 : index
    %11 = vector.load %arg10[%c0_7, %c0_8] : memref<16x384xf32, #tpu.memory_space<vmem>>, vector<16x384xf32>
    %12 = arith.truncf %10 : vector<16x512xf32> to vector<16x512xbf16>
    %c0_9 = arith.constant 0 : index
    %c0_10 = arith.constant 0 : index
    %13 = vector.load %arg7[%c0_9, %c0_10] : memref<512x384xbf16, #tpu.memory_space<vmem>>, vector<512x384xbf16>
    %cst_11 = arith.constant dense<0.000000e+00> : vector<16x384xf32>
    %14 = tpu.matmul %12, %13, %cst_11 {dimension_numbers = #tpu.dot_dimension_numbers<[1], [0], [0], [1], [0, 0, 1, 1], [], []>} : vector<16x512xbf16>, vector<512x384xbf16>, vector<16x384xf32> -> vector<16x384xf32>
    %15 = arith.addf %11, %14 : vector<16x384xf32>
    %c0_12 = arith.constant 0 : index
    %c0_13 = arith.constant 0 : index
    %16 = vector.load %arg10[%c0_12, %c0_13] : memref<16x384xf32, #tpu.memory_space<vmem>>, vector<16x384xf32>
    tpu.vector_store %arg10[%c0_12, %c0_13], %15 {strides = array<i32>} : memref<16x384xf32, #tpu.memory_space<vmem>>, vector<16x384xf32>,
    %c2_i32 = arith.constant 2 : i32
    %17 = arith.cmpi eq, %arg1, %c2_i32 : i32
    %18 = arith.extui %17 : i1 to i32
    %c0_i32_14 = arith.constant 0 : i32
    %19 = arith.cmpi ne, %18, %c0_i32_14 : i32
    scf.if %19 {
      %c0_15 = arith.constant 0 : index
      %c0_16 = arith.constant 0 : index
      %20 = vector.load %arg2[%c0_15, %c0_16] : memref<16x384xf32, #tpu.memory_space<vmem>>, vector<16x384xf32>
      %c0_17 = arith.constant 0 : index
      %c0_18 = arith.constant 0 : index
      %21 = vector.load %arg10[%c0_17, %c0_18] : memref<16x384xf32, #tpu.memory_space<vmem>>, vector<16x384xf32>
      %22 = arith.addf %20, %21 : vector<16x384xf32>
      %c0_19 = arith.constant 0 : index
      %c0_20 = arith.constant 0 : index
      %23 = vector.load %arg8[%c0_19, %c0_20] : memref<1x384xf32, #tpu.memory_space<vmem>>, vector<1x384xf32>
      %24 = vector.broadcast %23 : vector<1x384xf32> to vector<16x384xf32>
      %25 = arith.addf %22, %24 : vector<16x384xf32>
      %c0_21 = arith.constant 0 : index
      %c0_22 = arith.constant 0 : index
      %26 = vector.load %arg9[%c0_21, %c0_22] : memref<16x384xf32, #tpu.memory_space<vmem>>, vector<16x384xf32>
      tpu.vector_store %arg9[%c0_21, %c0_22], %25 {strides = array<i32>} : memref<16x384xf32, #tpu.memory_space<vmem>>, vector<16x384xf32>,
    } else {
    }
    return
  }
  func.func @transform_0(%arg0: i32, %arg1: i32) -> (i32, i32) {
    %c0_i32 = arith.constant 0 : i32
    %c0_i32_0 = arith.constant 0 : i32
    return %arg0, %c0_i32 : i32, i32
  }
  func.func @transform_1(%arg0: i32, %arg1: i32) -> (i32, i32) {
    %c0_i32 = arith.constant 0 : i32
    %c0_i32_0 = arith.constant 0 : i32
    %c0_i32_1 = arith.constant 0 : i32
    return %c0_i32, %c0_i32_0 : i32, i32
  }
  func.func @transform_2(%arg0: i32, %arg1: i32) -> (i32, i32) {
    %c0_i32 = arith.constant 0 : i32
    %c0_i32_0 = arith.constant 0 : i32
    %c0_i32_1 = arith.constant 0 : i32
    return %c0_i32, %c0_i32_0 : i32, i32
  }
  func.func @transform_3(%arg0: i32, %arg1: i32) -> (i32, i32) {
    %c0_i32 = arith.constant 0 : i32
    %c0_i32_0 = arith.constant 0 : i32
    return %c0_i32, %arg1 : i32, i32
  }
  func.func @transform_4(%arg0: i32, %arg1: i32) -> (i32, i32) {
    %c0_i32 = arith.constant 0 : i32
    %c0_i32_0 = arith.constant 0 : i32
    return %c0_i32, %arg1 : i32, i32
  }
  func.func @transform_5(%arg0: i32, %arg1: i32) -> (i32, i32) {
    %c0_i32 = arith.constant 0 : i32
    %c0_i32_0 = arith.constant 0 : i32
    return %arg1, %c0_i32 : i32, i32
  }
  func.func @transform_6(%arg0: i32, %arg1: i32) -> (i32, i32) {
    %c0_i32 = arith.constant 0 : i32
    %c0_i32_0 = arith.constant 0 : i32
    %c0_i32_1 = arith.constant 0 : i32
    return %c0_i32, %c0_i32_0 : i32, i32
  }
  func.func @transform_7(%arg0: i32, %arg1: i32) -> (i32, i32) {
    %c0_i32 = arith.constant 0 : i32
    %c0_i32_0 = arith.constant 0 : i32
    return %arg0, %c0_i32 : i32, i32
  }
}

module attributes {stable_mosaic.version = 11 : i64} {
  func.func @_lm_head_kernel(%arg0: i32, %arg1: memref<16x384xf32, #tpu.memory_space<vmem>>, %arg2: memref<1x384xf32, #tpu.memory_space<vmem>>, %arg3: memref<1x384xf32, #tpu.memory_space<vmem>>, %arg4: memref<384x128xbf16, #tpu.memory_space<vmem>>, %arg5: memref<1x128xf32, #tpu.memory_space<vmem>>, %arg6: memref<16x128xf32, #tpu.memory_space<vmem>>) attributes {dimension_semantics = [#tpu.dimension_semantics<parallel>], iteration_bounds = array<i64: 1>, scalar_prefetch = 0 : i64, scratch_operands = 0 : i64, tpu.core_type = #tpu.core_type<tc>, window_params = [{transform_indices = @transform_0, window_bounds = array<i64: 16, 384>}, {pipeline_mode = #tpu.pipeline_mode<synchronous>, transform_indices = @transform_1, window_bounds = array<i64: 1, 384>}, {pipeline_mode = #tpu.pipeline_mode<synchronous>, transform_indices = @transform_2, window_bounds = array<i64: 1, 384>}, {pipeline_mode = #tpu.pipeline_mode<synchronous>, transform_indices = @transform_3, window_bounds = array<i64: 384, 128>}, {pipeline_mode = #tpu.pipeline_mode<synchronous>, transform_indices = @transform_4, window_bounds = array<i64: 1, 128>}, {transform_indices = @transform_5, window_bounds = array<i64: 16, 128>}]} {
    %c0 = arith.constant 0 : index
    %c0_0 = arith.constant 0 : index
    %0 = vector.load %arg1[%c0, %c0_0] : memref<16x384xf32, #tpu.memory_space<vmem>>, vector<16x384xf32>
    %c0_1 = arith.constant 0 : index
    %c0_2 = arith.constant 0 : index
    %1 = vector.load %arg2[%c0_1, %c0_2] : memref<1x384xf32, #tpu.memory_space<vmem>>, vector<1x384xf32>
    %c0_3 = arith.constant 0 : index
    %c0_4 = arith.constant 0 : index
    %2 = vector.load %arg3[%c0_3, %c0_4] : memref<1x384xf32, #tpu.memory_space<vmem>>, vector<1x384xf32>
    %cst = arith.constant dense<0.000000e+00> : vector<16xf32>
    %3 = vector.multi_reduction <add>, %0, %cst [1] : vector<16x384xf32> to vector<16xf32>
    %4 = vector.shape_cast %3 : vector<16xf32> to vector<16x1xf32>
    %cst_5 = arith.constant 3.840000e+02 : f32
    %5 = vector.broadcast %cst_5 : f32 to vector<16x1xf32>
    %6 = arith.divf %4, %5 : vector<16x1xf32>
    %7 = vector.broadcast %6 : vector<16x1xf32> to vector<16x384xf32>
    %8 = arith.subf %0, %7 : vector<16x384xf32>
    %9 = arith.mulf %8, %8 : vector<16x384xf32>
    %cst_6 = arith.constant dense<0.000000e+00> : vector<16xf32>
    %10 = vector.multi_reduction <add>, %9, %cst_6 [1] : vector<16x384xf32> to vector<16xf32>
    %11 = vector.shape_cast %10 : vector<16xf32> to vector<16x1xf32>
    %cst_7 = arith.constant 3.840000e+02 : f32
    %12 = vector.broadcast %cst_7 : f32 to vector<16x1xf32>
    %13 = arith.divf %11, %12 : vector<16x1xf32>
    %cst_8 = arith.constant 9.99999974E-6 : f32
    %14 = vector.broadcast %cst_8 : f32 to vector<16x1xf32>
    %15 = arith.addf %13, %14 : vector<16x1xf32>
    %16 = math.rsqrt %15 : vector<16x1xf32>
    %17 = vector.broadcast %16 : vector<16x1xf32> to vector<16x384xf32>
    %18 = arith.mulf %8, %17 : vector<16x384xf32>
    %19 = vector.broadcast %1 : vector<1x384xf32> to vector<16x384xf32>
    %20 = arith.mulf %18, %19 : vector<16x384xf32>
    %21 = vector.broadcast %2 : vector<1x384xf32> to vector<16x384xf32>
    %22 = arith.addf %20, %21 : vector<16x384xf32>
    %23 = arith.truncf %22 : vector<16x384xf32> to vector<16x384xbf16>
    %c0_9 = arith.constant 0 : index
    %c0_10 = arith.constant 0 : index
    %24 = vector.load %arg4[%c0_9, %c0_10] : memref<384x128xbf16, #tpu.memory_space<vmem>>, vector<384x128xbf16>
    %cst_11 = arith.constant dense<0.000000e+00> : vector<16x128xf32>
    %25 = tpu.matmul %23, %24, %cst_11 {dimension_numbers = #tpu.dot_dimension_numbers<[1], [0], [0], [1], [0, 0, 1, 1], [], []>} : vector<16x384xbf16>, vector<384x128xbf16>, vector<16x128xf32> -> vector<16x128xf32>
    %c0_12 = arith.constant 0 : index
    %c0_13 = arith.constant 0 : index
    %26 = vector.load %arg5[%c0_12, %c0_13] : memref<1x128xf32, #tpu.memory_space<vmem>>, vector<1x128xf32>
    %27 = vector.broadcast %26 : vector<1x128xf32> to vector<16x128xf32>
    %28 = arith.addf %25, %27 : vector<16x128xf32>
    %c0_14 = arith.constant 0 : index
    %c0_15 = arith.constant 0 : index
    %29 = vector.load %arg6[%c0_14, %c0_15] : memref<16x128xf32, #tpu.memory_space<vmem>>, vector<16x128xf32>
    tpu.vector_store %arg6[%c0_14, %c0_15], %28 {strides = array<i32>} : memref<16x128xf32, #tpu.memory_space<vmem>>, vector<16x128xf32>,
    return
  }
  func.func @transform_0(%arg0: i32) -> (i32, i32) {
    %c0_i32 = arith.constant 0 : i32
    %c0_i32_0 = arith.constant 0 : i32
    return %arg0, %c0_i32 : i32, i32
  }
  func.func @transform_1(%arg0: i32) -> (i32, i32) {
    %c0_i32 = arith.constant 0 : i32
    %c0_i32_0 = arith.constant 0 : i32
    %c0_i32_1 = arith.constant 0 : i32
    return %c0_i32, %c0_i32_0 : i32, i32
  }
  func.func @transform_2(%arg0: i32) -> (i32, i32) {
    %c0_i32 = arith.constant 0 : i32
    %c0_i32_0 = arith.constant 0 : i32
    %c0_i32_1 = arith.constant 0 : i32
    return %c0_i32, %c0_i32_0 : i32, i32
  }
  func.func @transform_3(%arg0: i32) -> (i32, i32) {
    %c0_i32 = arith.constant 0 : i32
    %c0_i32_0 = arith.constant 0 : i32
    %c0_i32_1 = arith.constant 0 : i32
    return %c0_i32, %c0_i32_0 : i32, i32
  }
  func.func @transform_4(%arg0: i32) -> (i32, i32) {
    %c0_i32 = arith.constant 0 : i32
    %c0_i32_0 = arith.constant 0 : i32
    %c0_i32_1 = arith.constant 0 : i32
    return %c0_i32, %c0_i32_0 : i32, i32
  }
  func.func @transform_5(%arg0: i32) -> (i32, i32) {
    %c0_i32 = arith.constant 0 : i32
    %c0_i32_0 = arith.constant 0 : i32
    return %arg0, %c0_i32 : i32, i32
  }
}

</mosaic_0001>

<bundles_post_ra>
// kernel: bigram_lm_forward.14
= control target key start
LH: loop header
LB: loop body
LE: loop exit
PB: predicated region body
PF: predicated region fallthrough
CT: control target
= control target key end

     0   :  { %s3130_s24 = smov 0   ;;  %s3132_s25 = smov 0   ;;  %s3694_s0 = inlined_call_operand.vmem [shape: f32[16,384], index: 0, kind: input, shape index: {}]   ;;  %s3695_s1 = inlined_call_operand.vmem [shape: f32[1,384], index: 1, kind: input, shape index: {}]   ;;  %s3696_s2 = inlined_call_operand.vmem [shape: f32[1,384], index: 2, kind: input, shape index: {}]   ;;  %s3697_s3 = inlined_call_operand.vmem [shape: bf16[384,1536], index: 3, kind: input, shape index: {}]   ;;  %s3698_s4 = inlined_call_operand.vmem [shape: f32[1,1536], index: 4, kind: input, shape index: {}]   ;;  %s3699_s5 = inlined_call_operand.vmem [shape: bf16[1536,384], index: 5, kind: input, shape index: {}]   ;;  %s3700_s6 = inlined_call_operand.vmem [shape: f32[1,384], index: 6, kind: input, shape index: {}]   ;;  %s3701_s7 = inlined_call_operand.vmem [shape: f32[16,384], index: 7, kind: output, shape index: {}]  }
   0x1   :  { %s3134_s26 = smov 0   ;;  %s3136_s27 = smov 0  }
   0x2   :  { %s3138_s28 = smov 0  }
   0x3 LB: > { %s26_s29 = sadd.s32 1, %s3082_s27  ;;  %p111_p1 = scmp.ne.s32.totalorder %s3074_s25, %s3070_s24  ;;  %s3086_s28 = sphi %s3138_s28, %s17_s28   ;;  %s3082_s27 = sphi %s3136_s27, %s3705_s27   ;;  %s3078_s26 = sphi %s3134_s26, %s3704_s26   ;;  %s3074_s25 = sphi %s3132_s25, %s3703_s25   ;;  %s3070_s24 = sphi %s3130_s24, %s3702_s24  }
   0x4   : > { %p27_p0 = scmp.ge.s32.totalorder %s26_s29, 3  ;;  %p112_p2 = scmp.eq.s32.totalorder %s3086_s28, 0 }
   0x5   : > { %s104_s8 = sadd.s32 1, %s3074_s25  ;;  %p2457_p5 = scmp.ge.s32.totalorder %s3086_s28, 3 }
   0x6   : > { %s3707_s29 = smov (%p27_p0, %s26_s29), 0  ;;  %p113_p3 = por %p112_p2, %p111_p1 }
   0x7   : > { %s101_s30 = ssub.s32 %s3082_s27, %s3707_s29  ;;  %255 = sbr.rel (%p2457_p5) target bundleno = 67 (0x43), region = 32 }
   0x8   : > { %p102_p4 = scmp.eq.s32.totalorder %s101_s30, 0 }
   0xa   : > { %s3165_s9 = scalar_select %p102_p4, %s3074_s25, %s104_s8  }
   0xe   : > { %258 = sbr.rel (!%p113_p3) target bundleno = 67 (0x43), region = 36  ;;  %s260_s10 = sand.u32 (%p113_p3), 1, %s3074_s25  }
   0xf   : > { %s2662_s11 = sshll.u32 (%p113_p3), %s3082_s27, 4  ;;  %s2727_s12 = smul.u32 (%p113_p3), 768, %s260_s10 }
  0x10   : > { %s3173_s15 = scalar_lea.vmem (%p113_p3), %s3697_s3, %s2662_s11 }
  0x11   : > { %v278_v0 = vld [vmem:[%s3173_s15] sm:$0xff] (%p113_p3)  ;;  %v280_v1 = vld [vmem:[%s3173_s15 + $0x8] sm:$0xff] (%p113_p3)  ;;  %v282_v2 = vld [vmem:[%s3173_s15 + $0x30] sm:$0xff] (%p113_p3)  ;;  %s3181_s16 = scalar_lea.vmem (%p113_p3), [#allocation4], %s2727_s12 }
  0x12   : > { %v284_v3 = vld [vmem:[%s3173_s15 + $0x38] sm:$0xff] (%p113_p3)  ;;  %v286_v4 = vld [vmem:[%s3173_s15 + $0x60] sm:$0xff] (%p113_p3)  ;;  %v288_v5 = vld [vmem:[%s3173_s15 + $0x68] sm:$0xff] (%p113_p3)  ;;  %279 = vst [vmem:[%s3181_s16] sm:$0xff] (%p113_p3), %v278_v0 }
  0x13   : > { %281 = vst [vmem:[%s3181_s16 + $0x8] sm:$0xff] (%p113_p3), %v280_v1  ;;  %283 = vst [vmem:[%s3181_s16 + $0x10] sm:$0xff] (%p113_p3), %v282_v2  ;;  %v290_v6 = vld [vmem:[%s3173_s15 + $0x90] sm:$0xff] (%p113_p3)  ;;  %v292_v7 = vld [vmem:[%s3173_s15 + $0x98] sm:$0xff] (%p113_p3) }
  0x14   : > { %285 = vst [vmem:[%s3181_s16 + $0x18] sm:$0xff] (%p113_p3), %v284_v3  ;;  %287 = vst [vmem:[%s3181_s16 + $0x20] sm:$0xff] (%p113_p3), %v286_v4  ;;  %v294_v8 = vld [vmem:[%s3173_s15 + $0xc0] sm:$0xff] (%p113_p3)  ;;  %v296_v9 = vld [vmem:[%s3173_s15 + $0xc8] sm:$0xff] (%p113_p3) }
  0x15   : > { %289 = vst [vmem:[%s3181_s16 + $0x28] sm:$0xff] %v288_v5  ;;  %291 = vst [vmem:[%s3181_s16 + $0x30] sm:$0xff] %v290_v6  ;;  %v298_v10 = vld [vmem:[%s3173_s15 + $0xf0] sm:$0xff]  ;;  %v300_v11 = vld [vmem:[%s3173_s15 + $0xf8] sm:$0xff] }
  0x16   : > { %293 = vst [vmem:[%s3181_s16 + $0x38] sm:$0xff] %v292_v7  ;;  %295 = vst [vmem:[%s3181_s16 + $0x40] sm:$0xff] %v294_v8  ;;  %v302_v12 = vld [vmem:[%s3173_s15 + $0x120] sm:$0xff]  ;;  %v304_v13 = vld [vmem:[%s3173_s15 + $0x128] sm:$0xff] }
  0x17   : > { %297 = vst [vmem:[%s3181_s16 + $0x48] sm:$0xff] %v296_v9  ;;  %299 = vst [vmem:[%s3181_s16 + $0x50] sm:$0xff] %v298_v10  ;;  %v306_v14 = vld [vmem:[%s3173_s15 + $0x150] sm:$0xff]  ;;  %v308_v15 = vld [vmem:[%s3173_s15 + $0x158] sm:$0xff] }
  0x18   : > { %301 = vst [vmem:[%s3181_s16 + $0x58] sm:$0xff] %v300_v11  ;;  %303 = vst [vmem:[%s3181_s16 + $0x60] sm:$0xff] %v302_v12  ;;  %v310_v16 = vld [vmem:[%s3173_s15 + $0x180] sm:$0xff]  ;;  %v312_v17 = vld [vmem:[%s3173_s15 + $0x188] sm:$0xff] }
  0x19   : > { %305 = vst [vmem:[%s3181_s16 + $0x68] sm:$0xff] %v304_v13  ;;  %307 = vst [vmem:[%s3181_s16 + $0x70] sm:$0xff] %v306_v14  ;;  %v314_v18 = vld [vmem:[%s3173_s15 + $0x1b0] sm:$0xff]  ;;  %v316_v19 = vld [vmem:[%s3173_s15 + $0x1b8] sm:$0xff] }
  0x1a   : > { %309 = vst [vmem:[%s3181_s16 + $0x78] sm:$0xff] %v308_v15  ;;  %311 = vst [vmem:[%s3181_s16 + $0x80] sm:$0xff] %v310_v16  ;;  %v318_v20 = vld [vmem:[%s3173_s15 + $0x1e0] sm:$0xff]  ;;  %v320_v21 = vld [vmem:[%s3173_s15 + $0x1e8] sm:$0xff] }
  0x1b   : > { %313 = vst [vmem:[%s3181_s16 + $0x88] sm:$0xff] %v312_v17  ;;  %315 = vst [vmem:[%s3181_s16 + $0x90] sm:$0xff] %v314_v18  ;;  %v322_v22 = vld [vmem:[%s3173_s15 + $0x210] sm:$0xff]  ;;  %v324_v23 = vld [vmem:[%s3173_s15 + $0x218] sm:$0xff] }
  0x1c   : > { %317 = vst [vmem:[%s3181_s16 + $0x98] sm:$0xff] %v316_v19  ;;  %319 = vst [vmem:[%s3181_s16 + $0xa0] sm:$0xff] %v318_v20  ;;  %v326_v24 = vld [vmem:[%s3173_s15 + $0x240] sm:$0xff]  ;;  %v328_v25 = vld [vmem:[%s3173_s15 + $0x248] sm:$0xff] }
  0x1d   : > { %321 = vst [vmem:[%s3181_s16 + $0xa8] sm:$0xff] %v320_v21  ;;  %323 = vst [vmem:[%s3181_s16 + $0xb0] sm:$0xff] %v322_v22  ;;  %v330_v26 = vld [vmem:[%s3173_s15 + $0x270] sm:$0xff]  ;;  %v332_v27 = vld [vmem:[%s3173_s15 + $0x278] sm:$0xff] }
  0x1e   : > { %325 = vst [vmem:[%s3181_s16 + $0xb8] sm:$0xff] %v324_v23  ;;  %327 = vst [vmem:[%s3181_s16 + $0xc0] sm:$0xff] %v326_v24  ;;  %v334_v28 = vld [vmem:[%s3173_s15 + $0x2a0] sm:$0xff]  ;;  %v336_v29 = vld [vmem:[%s3173_s15 + $0x2a8] sm:$0xff] }
  0x1f   : > { %329 = vst [vmem:[%s3181_s16 + $0xc8] sm:$0xff] %v328_v25  ;;  %331 = vst [vmem:[%s3181_s16 + $0xd0] sm:$0xff] %v330_v26  ;;  %v338_v30 = vld [vmem:[%s3173_s15 + $0x2d0] sm:$0xff]  ;;  %v340_v31 = vld [vmem:[%s3173_s15 + $0x2d8] sm:$0xff] }
  0x20   : > { %333 = vst [vmem:[%s3181_s16 + $0xd8] sm:$0xff] %v332_v27  ;;  %335 = vst [vmem:[%s3181_s16 + $0xe0] sm:$0xff] %v334_v28  ;;  %v342_v32 = vld [vmem:[%s3173_s15 + $0x300] sm:$0xff]  ;;  %v344_v33 = vld [vmem:[%s3173_s15 + $0x308] sm:$0xff] }
  0x21   : > { %337 = vst [vmem:[%s3181_s16 + $0xe8] sm:$0xff] %v336_v29  ;;  %339 = vst [vmem:[%s3181_s16 + $0xf0] sm:$0xff] %v338_v30  ;;  %v346_v34 = vld [vmem:[%s3173_s15 + $0x330] sm:$0xff]  ;;  %v348_v35 = vld [vmem:[%s3173_s15 + $0x338] sm:$0xff] }
  0x22   : > { %341 = vst [vmem:[%s3181_s16 + $0xf8] sm:$0xff] %v340_v31  ;;  %343 = vst [vmem:[%s3181_s16 + $0x100] sm:$0xff] %v342_v32  ;;  %v350_v36 = vld [vmem:[%s3173_s15 + $0x360] sm:$0xff]  ;;  %v352_v37 = vld [vmem:[%s3173_s15 + $0x368] sm:$0xff] }
  0x23   : > { %345 = vst [vmem:[%s3181_s16 + $0x108] sm:$0xff] %v344_v33  ;;  %347 = vst [vmem:[%s3181_s16 + $0x110] sm:$0xff] %v346_v34  ;;  %v354_v38 = vld [vmem:[%s3173_s15 + $0x390] sm:$0xff]  ;;  %v356_v39 = vld [vmem:[%s3173_s15 + $0x398] sm:$0xff] }
  0x24   : > { %349 = vst [vmem:[%s3181_s16 + $0x118] sm:$0xff] %v348_v35  ;;  %351 = vst [vmem:[%s3181_s16 + $0x120] sm:$0xff] %v350_v36  ;;  %v358_v40 = vld [vmem:[%s3173_s15 + $0x3c0] sm:$0xff]  ;;  %v360_v41 = vld [vmem:[%s3173_s15 + $0x3c8] sm:$0xff] }
  0x25   : > { %353 = vst [vmem:[%s3181_s16 + $0x128] sm:$0xff] %v352_v37  ;;  %355 = vst [vmem:[%s3181_s16 + $0x130] sm:$0xff] %v354_v38  ;;  %v362_v42 = vld [vmem:[%s3173_s15 + $0x3f0] sm:$0xff]  ;;  %v364_v43 = vld [vmem:[%s3173_s15 + $0x3f8] sm:$0xff] }
  0x26   : > { %357 = vst [vmem:[%s3181_s16 + $0x138] sm:$0xff] %v356_v39  ;;  %359 = vst [vmem:[%s3181_s16 + $0x140] sm:$0xff] %v358_v40  ;;  %v366_v44 = vld [vmem:[%s3173_s15 + $0x420] sm:$0xff]  ;;  %v368_v45 = vld [vmem:[%s3173_s15 + $0x428] sm:$0xff] }
  0x27   : > { %361 = vst [vmem:[%s3181_s16 + $0x148] sm:$0xff] %v360_v41  ;;  %363 = vst [vmem:[%s3181_s16 + $0x150] sm:$0xff] %v362_v42  ;;  %v370_v46 = vld [vmem:[%s3173_s15 + $0x450] sm:$0xff]  ;;  %v372_v47 = vld [vmem:[%s3173_s15 + $0x458] sm:$0xff] }
  0x28   : > { %365 = vst [vmem:[%s3181_s16 + $0x158] sm:$0xff] %v364_v43  ;;  %367 = vst [vmem:[%s3181_s16 + $0x160] sm:$0xff] %v366_v44  ;;  %v374_v48 = vld [vmem:[%s3173_s15 + $0x480] sm:$0xff]  ;;  %v376_v49 = vld [vmem:[%s3173_s15 + $0x488] sm:$0xff] }
  0x29   : > { %369 = vst [vmem:[%s3181_s16 + $0x168] sm:$0xff] %v368_v45  ;;  %371 = vst [vmem:[%s3181_s16 + $0x170] sm:$0xff] %v370_v46  ;;  %v378_v50 = vld [vmem:[%s3173_s15 + $0x4b0] sm:$0xff]  ;;  %v380_v51 = vld [vmem:[%s3173_s15 + $0x4b8] sm:$0xff] }
  0x2a   : > { %373 = vst [vmem:[%s3181_s16 + $0x178] sm:$0xff] %v372_v47  ;;  %375 = vst [vmem:[%s3181_s16 + $0x180] sm:$0xff] %v374_v48  ;;  %v382_v52 = vld [vmem:[%s3173_s15 + $0x4e0] sm:$0xff]  ;;  %v384_v53 = vld [vmem:[%s3173_s15 + $0x4e8] sm:$0xff] }
  0x2b   : > { %377 = vst [vmem:[%s3181_s16 + $0x188] sm:$0xff] %v376_v49  ;;  %379 = vst [vmem:[%s3181_s16 + $0x190] sm:$0xff] %v378_v50  ;;  %v386_v54 = vld [vmem:[%s3173_s15 + $0x510] sm:$0xff]  ;;  %v388_v55 = vld [vmem:[%s3173_s15 + $0x518] sm:$0xff] }
  0x2c   : > { %381 = vst [vmem:[%s3181_s16 + $0x198] sm:$0xff] %v380_v51  ;;  %383 = vst [vmem:[%s3181_s16 + $0x1a0] sm:$0xff] %v382_v52  ;;  %v390_v56 = vld [vmem:[%s3173_s15 + $0x540] sm:$0xff]  ;;  %v392_v57 = vld [vmem:[%s3173_s15 + $0x548] sm:$0xff] }
  0x2d   : > { %385 = vst [vmem:[%s3181_s16 + $0x1a8] sm:$0xff] %v384_v53  ;;  %387 = vst [vmem:[%s3181_s16 + $0x1b0] sm:$0xff] %v386_v54  ;;  %v394_v58 = vld [vmem:[%s3173_s15 + $0x570] sm:$0xff]  ;;  %v396_v59 = vld [vmem:[%s3173_s15 + $0x578] sm:$0xff] }
  0x2e   : > { %389 = vst [vmem:[%s3181_s16 + $0x1b8] sm:$0xff] %v388_v55  ;;  %391 = vst [vmem:[%s3181_s16 + $0x1c0] sm:$0xff] %v390_v56  ;;  %v398_v60 = vld [vmem:[%s3173_s15 + $0x5a0] sm:$0xff]  ;;  %v400_v61 = vld [vmem:[%s3173_s15 + $0x5a8] sm:$0xff] }
  0x2f   : > { %393 = vst [vmem:[%s3181_s16 + $0x1c8] sm:$0xff] %v392_v57  ;;  %395 = vst [vmem:[%s3181_s16 + $0x1d0] sm:$0xff] %v394_v58  ;;  %v402_v62 = vld [vmem:[%s3173_s15 + $0x5d0] sm:$0xff]  ;;  %v404_v63 = vld [vmem:[%s3173_s15 + $0x5d8] sm:$0xff] }
  0x30   : > { %397 = vst [vmem:[%s3181_s16 + $0x1d8] sm:$0xff] %v396_v59  ;;  %399 = vst [vmem:[%s3181_s16 + $0x1e0] sm:$0xff] %v398_v60  ;;  %v406_v0 = vld [vmem:[%s3173_s15 + $0x600] sm:$0xff]  ;;  %v408_v1 = vld [vmem:[%s3173_s15 + $0x608] sm:$0xff] }
  0x31   : > { %401 = vst [vmem:[%s3181_s16 + $0x1e8] sm:$0xff] %v400_v61  ;;  %403 = vst [vmem:[%s3181_s16 + $0x1f0] sm:$0xff] %v402_v62  ;;  %v410_v2 = vld [vmem:[%s3173_s15 + $0x630] sm:$0xff]  ;;  %v412_v3 = vld [vmem:[%s3173_s15 + $0x638] sm:$0xff] }
  0x32   : > { %405 = vst [vmem:[%s3181_s16 + $0x1f8] sm:$0xff] %v404_v63  ;;  %407 = vst [vmem:[%s3181_s16 + $0x200] sm:$0xff] %v406_v0  ;;  %v414_v4 = vld [vmem:[%s3173_s15 + $0x660] sm:$0xff]  ;;  %v416_v5 = vld [vmem:[%s3173_s15 + $0x668] sm:$0xff] }
  0x33   : > { %409 = vst [vmem:[%s3181_s16 + $0x208] sm:$0xff] %v408_v1  ;;  %411 = vst [vmem:[%s3181_s16 + $0x210] sm:$0xff] %v410_v2  ;;  %v418_v6 = vld [vmem:[%s3173_s15 + $0x690] sm:$0xff]  ;;  %v420_v7 = vld [vmem:[%s3173_s15 + $0x698] sm:$0xff] }
  0x34   : > { %413 = vst [vmem:[%s3181_s16 + $0x218] sm:$0xff] %v412_v3  ;;  %415 = vst [vmem:[%s3181_s16 + $0x220] sm:$0xff] %v414_v4  ;;  %v422_v8 = vld [vmem:[%s3173_s15 + $0x6c0] sm:$0xff]  ;;  %v424_v9 = vld [vmem:[%s3173_s15 + $0x6c8] sm:$0xff] }
  0x35   : > { %417 = vst [vmem:[%s3181_s16 + $0x228] sm:$0xff] %v416_v5  ;;  %419 = vst [vmem:[%s3181_s16 + $0x230] sm:$0xff] %v418_v6  ;;  %v426_v10 = vld [vmem:[%s3173_s15 + $0x6f0] sm:$0xff]  ;;  %v428_v11 = vld [vmem:[%s3173_s15 + $0x6f8] sm:$0xff] }
  0x36   : > { %421 = vst [vmem:[%s3181_s16 + $0x238] sm:$0xff] %v420_v7  ;;  %423 = vst [vmem:[%s3181_s16 + $0x240] sm:$0xff] %v422_v8  ;;  %v430_v12 = vld [vmem:[%s3173_s15 + $0x720] sm:$0xff]  ;;  %v432_v13 = vld [vmem:[%s3173_s15 + $0x728] sm:$0xff] }
  0x37   : > { %425 = vst [vmem:[%s3181_s16 + $0x248] sm:$0xff] %v424_v9  ;;  %427 = vst [vmem:[%s3181_s16 + $0x250] sm:$0xff] %v426_v10  ;;  %v434_v14 = vld [vmem:[%s3173_s15 + $0x750] sm:$0xff]  ;;  %v436_v15 = vld [vmem:[%s3173_s15 + $0x758] sm:$0xff] }
  0x38   : > { %429 = vst [vmem:[%s3181_s16 + $0x258] sm:$0xff] %v428_v11  ;;  %431 = vst [vmem:[%s3181_s16 + $0x260] sm:$0xff] %v430_v12  ;;  %v438_v16 = vld [vmem:[%s3173_s15 + $0x780] sm:$0xff]  ;;  %v440_v17 = vld [vmem:[%s3173_s15 + $0x788] sm:$0xff] }
  0x39   : > { %433 = vst [vmem:[%s3181_s16 + $0x268] sm:$0xff] %v432_v13  ;;  %435 = vst [vmem:[%s3181_s16 + $0x270] sm:$0xff] %v434_v14  ;;  %v442_v18 = vld [vmem:[%s3173_s15 + $0x7b0] sm:$0xff]  ;;  %v444_v19 = vld [vmem:[%s3173_s15 + $0x7b8] sm:$0xff] }
  0x3a   : > { %437 = vst [vmem:[%s3181_s16 + $0x278] sm:$0xff] %v436_v15  ;;  %439 = vst [vmem:[%s3181_s16 + $0x280] sm:$0xff] %v438_v16  ;;  %v446_v20 = vld [vmem:[%s3173_s15 + $0x7e0] sm:$0xff]  ;;  %v448_v21 = vld [vmem:[%s3173_s15 + $0x7e8] sm:$0xff] }
  0x3b   : > { %441 = vst [vmem:[%s3181_s16 + $0x288] sm:$0xff] %v440_v17  ;;  %443 = vst [vmem:[%s3181_s16 + $0x290] sm:$0xff] %v442_v18  ;;  %v450_v22 = vld [vmem:[%s3173_s15 + $0x810] sm:$0xff]  ;;  %v452_v23 = vld [vmem:[%s3173_s15 + $0x818] sm:$0xff] }
  0x3c   : > { %445 = vst [vmem:[%s3181_s16 + $0x298] sm:$0xff] %v444_v19  ;;  %447 = vst [vmem:[%s3181_s16 + $0x2a0] sm:$0xff] %v446_v20  ;;  %v454_v24 = vld [vmem:[%s3173_s15 + $0x840] sm:$0xff]  ;;  %v456_v25 = vld [vmem:[%s3173_s15 + $0x848] sm:$0xff] }
  0x3d   : > { %449 = vst [vmem:[%s3181_s16 + $0x2a8] sm:$0xff] %v448_v21  ;;  %451 = vst [vmem:[%s3181_s16 + $0x2b0] sm:$0xff] %v450_v22  ;;  %v458_v26 = vld [vmem:[%s3173_s15 + $0x870] sm:$0xff]  ;;  %v460_v27 = vld [vmem:[%s3173_s15 + $0x878] sm:$0xff] }
  0x3e   : > { %453 = vst [vmem:[%s3181_s16 + $0x2b8] sm:$0xff] %v452_v23  ;;  %455 = vst [vmem:[%s3181_s16 + $0x2c0] sm:$0xff] %v454_v24  ;;  %v462_v28 = vld [vmem:[%s3173_s15 + $0x8a0] sm:$0xff]  ;;  %v464_v29 = vld [vmem:[%s3173_s15 + $0x8a8] sm:$0xff] }
  0x3f   : > { %457 = vst [vmem:[%s3181_s16 + $0x2c8] sm:$0xff] %v456_v25  ;;  %459 = vst [vmem:[%s3181_s16 + $0x2d0] sm:$0xff] %v458_v26  ;;  %v466_v30 = vld [vmem:[%s3173_s15 + $0x8d0] sm:$0xff]  ;;  %v468_v31 = vld [vmem:[%s3173_s15 + $0x8d8] sm:$0xff] }
  0x40   : > { %461 = vst [vmem:[%s3181_s16 + $0x2d8] sm:$0xff] %v460_v27  ;;  %463 = vst [vmem:[%s3181_s16 + $0x2e0] sm:$0xff] %v462_v28 }
  0x41   : > { %465 = vst [vmem:[%s3181_s16 + $0x2e8] sm:$0xff] %v464_v29  ;;  %467 = vst [vmem:[%s3181_s16 + $0x2f0] sm:$0xff] %v466_v30 }
  0x42   : > { %469 = vst [vmem:[%s3181_s16 + $0x2f8] sm:$0xff] %v468_v31 }
  0x43 PF: > { %p2460_p6 = scmp.ge.s32.totalorder %s3086_s28, 1  ;;  %p492_p7 = scmp.lt.s32.totalorder %s3086_s28, 4 }
  0x45   : > { %p493_p8 = pnand %p2460_p6, %p492_p7 }
  0x46   : > { %s499_s17 = sand.u32 (!%p493_p8), 1, %s3070_s24   ;;  %s2461_s18 = sshll.u32 (!%p493_p8), %s3078_s26, 2 }
  0x47   : > { %496 = sbr.rel (%p493_p8) target bundleno = 993 (0x3e1), region = 67  ;;  %p556_p9 = scmp.lt.s32.totalorder (!%p493_p8), %s2461_s18, 11 }
  0x48   : > { %s2728_s19 = smul.u32 (!%p493_p8), 768, %s499_s17  ;;  %s2462_s20 = sshll.u32 (!%p493_p8), %s3078_s26, 6 }
  0x49   : > { %p561_p10 = scmp.lt.s32.totalorder (!%p493_p8), %s2462_s20, 191  ;;  %p2464_p11 = scmp.ne.s32.totalorder (!%p493_p8), %s3078_s26, 0 }
  0x4a   : > { %s3385_s24 = scalar_lea.vmem (!%p493_p8), [#allocation4], %s2728_s19 }
  0x4e   : > { %s3709_s18 = smov (!%p556_p9, %s2461_s18), 11  ;;  %s3711_s20 = smov (!%p561_p10, %s2462_s20), 191 }
  0x4f   : > { %s558_s23 = scalar_lea.vmem %s3698_s4, %s3709_s18  ;;  %s2729_s30 = smul.u32 12, %s3711_s20  ;;  %v585_v32 = vld [vmem:[%s3694_s0] sm:$0xff] (!%p2464_p11)  ;;  %v586_v33 = vld [vmem:[%s3694_s0 + $0x8] sm:$0xff] (!%p2464_p11)  ;;  %v587_v34 = vld [vmem:[%s3694_s0 + $0x10] sm:$0xff] (!%p2464_p11)  ;;  %v3088_v62 = vmov (!%p2464_p11), 0.0   ;;  %v637_v2 = vlaneseq (!%p2464_p11) }
  0x50   : > { %578 = sbr.rel (%p2464_p11) target bundleno = 407 (0x197), region = 75  ;;  %v593_v35 = vadd.f32 (!%p2464_p11), %v586_v33, %v585_v32  ;;  %v588_v36 = vld [vmem:[%s3694_s0 + $0x18] sm:$0xff] (!%p2464_p11)  ;;  %v589_v37 = vld [vmem:[%s3694_s0 + $0x20] sm:$0xff] (!%p2464_p11)  ;;  %v590_v38 = vld [vmem:[%s3694_s0 + $0x28] sm:$0xff] (!%p2464_p11)  ;;  %579 = vst [vmem:[#allocation2] sm:$0xff] (!%p2464_p11), %v3088_v62 }
  0x51   : > { %s3383_s11 = scalar_lea.vmem %s3699_s5, %s2729_s30  ;;  %v597_v39 = vadd.f32 (!%p2464_p11), %v589_v37, %v588_v36  ;;  %580 = vst [vmem:[#allocation2 + $0x8] sm:$0xff] (!%p2464_p11), %v3088_v62  ;;  %581 = vst [vmem:[#allocation2 + $0x10] sm:$0xff] (!%p2464_p11), %v3088_v62  ;;  %v638_v6 = vshrl.u32 (!%p2464_p11), %v637_v2, 7  ;;  %v591_v8 = vld [vmem:[%s3695_s1] sm:$0x7] (!%p2464_p11) }
  0x52   : > { %v594_v40 = vadd.f32 (!%p2464_p11), %v593_v35, %v587_v34  ;;  %582 = vst [vmem:[#allocation2 + $0x18] sm:$0xff] (!%p2464_p11), %v3088_v62  ;;  %583 = vst [vmem:[#allocation2 + $0x20] sm:$0xff] (!%p2464_p11), %v3088_v62  ;;  %v592_v12 = vld [vmem:[%s3696_s2] sm:$0x7] (!%p2464_p11) }
  0x53   : > { %v598_v41 = vadd.f32 (!%p2464_p11), %v597_v39, %v590_v38  ;;  %584 = vst [vmem:[#allocation2 + $0x28] sm:$0xff] (!%p2464_p11), %v3088_v62  ;;  %v639_v7 = vsub.s32 (!%p2464_p11), 0, %v638_v6  ;;  %v643_v9 = vsub.s32 (!%p2464_p11), 1, %v638_v6  ;;  %v647_v10 = vsub.s32 (!%p2464_p11), 2, %v638_v6 }
  0x54   : > { %595 = vadd.xlane.f32.xlu0 (!%p2464_p11), %v594_v40 }
  0x55   : > { %v640_v13 = vrot.slane (!%p2464_p11), %v591_v8, %v639_v7  ;;  %v644_v15 = vrot.slane (!%p2464_p11), %v591_v8, %v643_v9  ;;  %v648_v16 = vrot.slane (!%p2464_p11), %v591_v8, %v647_v10  ;;  %v662_v20 = vrot.slane (!%p2464_p11), %v592_v12, %v639_v7 }
  0x56   : > { %v666_v21 = vrot.slane (!%p2464_p11), %v592_v12, %v643_v9  ;;  %v670_v22 = vrot.slane (!%p2464_p11), %v592_v12, %v647_v10 }
  0x58   : > { %599 = vadd.xlane.f32.xlu0 %v598_v41 }
  0xe1   : > { %v596_v42 = vpop.xlane.xlu0 %595 }
  0xe2   : > { %v602_v43 = vmul.f32 0.0026041667, %v596_v42 }
  0xe4   : > { %v604_v44 = vsub.f32 %v585_v32, %v602_v43  ;;  %v605_v45 = vsub.f32 %v586_v33, %v602_v43  ;;  %v606_v46 = vsub.f32 %v587_v34, %v602_v43 }
  0xe5   : > { %v600_v47 = vpop.xlane.xlu0 %599 }
  0xe6   : > { %v603_v48 = vmul.f32 0.0026041667, %v600_v47  ;;  %v610_v49 = vmul.f32 %v604_v44, %v604_v44  ;;  %v611_v50 = vmul.f32 %v605_v45, %v605_v45  ;;  %v612_v51 = vmul.f32 %v606_v46, %v606_v46 }
  0xe8   : > { %v607_v52 = vsub.f32 %v588_v36, %v603_v48  ;;  %v608_v53 = vsub.f32 %v589_v37, %v603_v48  ;;  %v609_v54 = vsub.f32 %v590_v38, %v603_v48  ;;  %v616_v55 = vadd.f32 %v611_v50, %v610_v49 }
  0xea   : > { %v617_v56 = vadd.f32 %v616_v55, %v612_v51  ;;  %v613_v57 = vmul.f32 %v607_v52, %v607_v52  ;;  %v614_v58 = vmul.f32 %v608_v53, %v608_v53  ;;  %v615_v59 = vmul.f32 %v609_v54, %v609_v54 }
  0xec   : > { %618 = vadd.xlane.f32.xlu1 %v617_v56  ;;  %v620_v60 = vadd.f32 %v614_v58, %v613_v57 }
  0xee   : > { %v621_v61 = vadd.f32 %v620_v60, %v615_v59 }
  0xf0   : > { %622 = vadd.xlane.f32.xlu1 %v621_v61 }
 0x179   : > { %v619_v63 = vpop.xlane.xlu1 %618 }
 0x17a   : > { %v624_v0 = vmul.f32 0.0026041667, %v619_v63 }
 0x17c   : > { %v626_v1 = vadd.f32 1e-05, %v624_v0 }
 0x17d   : > { %v623_v3 = vpop.xlane.xlu1 %622 }
 0x17e   : > { %2772 = vrsqrt.f32 %v626_v1  ;;  %v625_v4 = vmul.f32 0.0026041667, %v623_v3 }
 0x180   : > { %v627_v5 = vadd.f32 1e-05, %v625_v4 }
 0x182   : > { %2774 = vrsqrt.f32 %v627_v5 }
 0x188   : > { %v2773_v11 = vpop.eup %2772 }
 0x189   : > { %v630_v14 = vmul.f32 %v2773_v11, %v604_v44  ;;  %v631_v17 = vmul.f32 %v2773_v11, %v605_v45  ;;  %v632_v18 = vmul.f32 %v2773_v11, %v606_v46 }
 0x18b   : > { %v652_v23 = vmul.f32 %v640_v13, %v630_v14  ;;  %v653_v25 = vmul.f32 %v644_v15, %v631_v17  ;;  %v654_v26 = vmul.f32 %v648_v16, %v632_v18 }
 0x18c   : > { %v2775_v19 = vpop.eup %2774 }
 0x18d   : > { %v633_v24 = vmul.f32 %v2775_v19, %v607_v52  ;;  %v634_v27 = vmul.f32 %v2775_v19, %v608_v53  ;;  %v635_v28 = vmul.f32 %v2775_v19, %v609_v54  ;;  %v674_v32 = vadd.f32 %v662_v20, %v652_v23 }
 0x18e   : > { %v675_v34 = vadd.f32 %v666_v21, %v653_v25  ;;  %v676_v35 = vadd.f32 %v670_v22, %v654_v26 }
 0x18f   : > { %v655_v29 = vmul.f32 %v640_v13, %v633_v24  ;;  %v656_v30 = vmul.f32 %v644_v15, %v634_v27  ;;  %v657_v31 = vmul.f32 %v648_v16, %v635_v28 }
 0x191   : > { %v677_v33 = vadd.f32 %v662_v20, %v655_v29  ;;  %v678_v36 = vadd.f32 %v666_v21, %v656_v30  ;;  %v679_v37 = vadd.f32 %v670_v22, %v657_v31 }
 0x193   : > { %v680_v38 = vpack.c.bf16 %v677_v33, %v674_v32  ;;  %v681_v39 = vpack.c.bf16 %v678_v36, %v675_v34  ;;  %v682_v40 = vpack.c.bf16 %v679_v37, %v676_v35 }
 0x195   : > { %683 = vst [vmem:[#allocation3] sm:$0xff] %v680_v38  ;;  %684 = vst [vmem:[#allocation3 + $0x8] sm:$0xff] %v681_v39 }
 0x196   : > { %685 = vst [vmem:[#allocation3 + $0x10] sm:$0xff] %v682_v40 }
 0x197 PF: > { %v2776_v41 = vld [vmem:[%s3385_s24 + $0x4] ss:$16 sps:$4 sm:$0xff]   ;;  %v3089_v43 = vmov 0   ;;  %v2780_v44 = vld [vmem:[%s3385_s24] ss:$16 sps:$4 sm:$0xff]   ;;  %p2657_p12 = scmp.ne.s32.totalorder %s3078_s26, 2 }
 0x198   : > { %v2778_v42 = vld [vmem:[%s3385_s24 + $0x204] ss:$16 sps:$4 sm:$0xff]   ;;  %1362 = vmatprep.mubr.bf16.mxu1 %v3089_v43  ;;  %1287 = vmatprep.subr.bf16.mxu0 %v2776_v41  ;;  %v2781_v45 = vld [vmem:[%s3385_s24 + $0x200] ss:$16 sps:$4 sm:$0xff]   ;;  %v2828_v11 = vld [vmem:[%s3385_s24 + $0xc] ss:$16 sps:$4 sm:$0xff]  }
 0x199   : > { %1330 = vmatprep.subr.bf16.mxu1 %v2778_v42  ;;  %v2782_v46 = vld [vmem:[%s3385_s24 + $0x24] ss:$16 sps:$4 sm:$0xff]   ;;  %1288 = vmatpush1.bf16.msra.mxu0 %v2780_v44  ;;  %v2786_v48 = vld [vmem:[%s3385_s24 + $0x20] ss:$16 sps:$4 sm:$0xff]   ;;  %v2826_v13 = vld [vmem:[%s3385_s24 + $0x8] ss:$16 sps:$4 sm:$0xff]  }
 0x19a   : > { %1331 = vmatpush1.bf16.msra.mxu1 %v2781_v45  ;;  %v2784_v47 = vld [vmem:[%s3385_s24 + $0x224] ss:$16 sps:$4 sm:$0xff]   ;;  %1289 = vmatprep.subr.bf16.mxu0 %v2782_v46  ;;  %v2787_v49 = vld [vmem:[%s3385_s24 + $0x220] ss:$16 sps:$4 sm:$0xff]   ;;  %v2834_v16 = vld [vmem:[%s3385_s24 + $0x2c] ss:$16 sps:$4 sm:$0xff]  }
 0x19b   : > { %1332 = vmatprep.subr.bf16.mxu1 %v2784_v47  ;;  %v2788_v50 = vld [vmem:[%s3385_s24 + $0x44] ss:$16 sps:$4 sm:$0xff]   ;;  %v2792_v52 = vld [vmem:[%s3385_s24 + $0x40] ss:$16 sps:$4 sm:$0xff]   ;;  %v2832_v17 = vld [vmem:[%s3385_s24 + $0x28] ss:$16 sps:$4 sm:$0xff]  }
 0x19c   : > { %v2790_v51 = vld [vmem:[%s3385_s24 + $0x244] ss:$16 sps:$4 sm:$0xff]   ;;  %v2793_v53 = vld [vmem:[%s3385_s24 + $0x240] ss:$16 sps:$4 sm:$0xff]   ;;  %v2840_v20 = vld [vmem:[%s3385_s24 + $0x4c] ss:$16 sps:$4 sm:$0xff]  }
 0x19d   : > { %1290 = vmatpush1.bf16.msra.mxu0 %v2786_v48  ;;  %v2794_v54 = vld [vmem:[%s3385_s24 + $0x64] ss:$16 sps:$4 sm:$0xff]   ;;  %v2798_v56 = vld [vmem:[%s3385_s24 + $0x60] ss:$16 sps:$4 sm:$0xff]   ;;  %v3447_v12 = vld [vmem:[#allocation3 + $0x10] sm:$0xff] }
 0x19e   : > { %1333 = vmatpush1.bf16.msra.mxu1 %v2787_v49  ;;  %1291 = vmatprep.subr.bf16.mxu0 %v2788_v50  ;;  %v2796_v55 = vld [vmem:[%s3385_s24 + $0x264] ss:$16 sps:$4 sm:$0xff]   ;;  %v2799_v57 = vld [vmem:[%s3385_s24 + $0x260] ss:$16 sps:$4 sm:$0xff]   ;;  %v2838_v21 = vld [vmem:[%s3385_s24 + $0x48] ss:$16 sps:$4 sm:$0xff]  }
 0x19f   : > { %1334 = vmatprep.subr.bf16.mxu1 %v2790_v51  ;;  %v2800_v58 = vld [vmem:[%s3385_s24 + $0x84] ss:$16 sps:$4 sm:$0xff]   ;;  %v2804_v60 = vld [vmem:[%s3385_s24 + $0x80] ss:$16 sps:$4 sm:$0xff]   ;;  %v2846_v24 = vld [vmem:[%s3385_s24 + $0x6c] ss:$16 sps:$4 sm:$0xff]  }
 0x1a0   : > { %v2802_v59 = vld [vmem:[%s3385_s24 + $0x284] ss:$16 sps:$4 sm:$0xff]   ;;  %v2805_v61 = vld [vmem:[%s3385_s24 + $0x280] ss:$16 sps:$4 sm:$0xff]   ;;  %v2844_v25 = vld [vmem:[%s3385_s24 + $0x68] ss:$16 sps:$4 sm:$0xff]  }
 0x1a1   : > { %1292 = vmatpush1.bf16.msra.mxu0 %v2792_v52  ;;  %v2806_v62 = vld [vmem:[%s3385_s24 + $0xa4] ss:$16 sps:$4 sm:$0xff]   ;;  %v2810_v0 = vld [vmem:[%s3385_s24 + $0xa0] ss:$16 sps:$4 sm:$0xff]   ;;  %v2852_v29 = vld [vmem:[%s3385_s24 + $0x8c] ss:$16 sps:$4 sm:$0xff]  }
 0x1a2   : > { %1335 = vmatpush1.bf16.msra.mxu1 %v2793_v53  ;;  %1293 = vmatprep.subr.bf16.mxu0 %v2794_v54  ;;  %v2808_v63 = vld [vmem:[%s3385_s24 + $0x2a4] ss:$16 sps:$4 sm:$0xff]   ;;  %v2811_v1 = vld [vmem:[%s3385_s24 + $0x2a0] ss:$16 sps:$4 sm:$0xff]   ;;  %v2850_v30 = vld [vmem:[%s3385_s24 + $0x88] ss:$16 sps:$4 sm:$0xff]  }
 0x1a3   : > { %1336 = vmatprep.subr.bf16.mxu1 %v2796_v55  ;;  %v2812_v2 = vld [vmem:[%s3385_s24 + $0xc4] ss:$16 sps:$4 sm:$0xff]   ;;  %v2816_v4 = vld [vmem:[%s3385_s24 + $0xc0] ss:$16 sps:$4 sm:$0xff]   ;;  %v2858_v33 = vld [vmem:[%s3385_s24 + $0xac] ss:$16 sps:$4 sm:$0xff]  }
 0x1a4   : > { %v2814_v3 = vld [vmem:[%s3385_s24 + $0x2c4] ss:$16 sps:$4 sm:$0xff]   ;;  %v2817_v5 = vld [vmem:[%s3385_s24 + $0x2c0] ss:$16 sps:$4 sm:$0xff]   ;;  %v2856_v34 = vld [vmem:[%s3385_s24 + $0xa8] ss:$16 sps:$4 sm:$0xff]  }
 0x1a5   : > { %1294 = vmatpush1.bf16.msra.mxu0 %v2798_v56  ;;  %v2818_v6 = vld [vmem:[%s3385_s24 + $0xe4] ss:$16 sps:$4 sm:$0xff]   ;;  %v2822_v8 = vld [vmem:[%s3385_s24 + $0xe0] ss:$16 sps:$4 sm:$0xff]   ;;  %v2864_v37 = vld [vmem:[%s3385_s24 + $0xcc] ss:$16 sps:$4 sm:$0xff]  }
 0x1a6   : > { %1337 = vmatpush1.bf16.msra.mxu1 %v2799_v57  ;;  %1295 = vmatprep.subr.bf16.mxu0 %v2800_v58  ;;  %v2820_v7 = vld [vmem:[%s3385_s24 + $0x2e4] ss:$16 sps:$4 sm:$0xff]   ;;  %v2823_v9 = vld [vmem:[%s3385_s24 + $0x2e0] ss:$16 sps:$4 sm:$0xff]   ;;  %v2862_v38 = vld [vmem:[%s3385_s24 + $0xc8] ss:$16 sps:$4 sm:$0xff]  }
 0x1a7   : > { %1338 = vmatprep.subr.bf16.mxu1 %v2802_v59  ;;  %v2824_v10 = vld [vmem:[%s3385_s24 + $0x104] ss:$16 sps:$4 sm:$0xff]   ;;  %v2829_v14 = vld [vmem:[%s3385_s24 + $0x100] ss:$16 sps:$4 sm:$0xff]   ;;  %v2870_v41 = vld [vmem:[%s3385_s24 + $0xec] ss:$16 sps:$4 sm:$0xff]  }
 0x1a8   : > { %v2830_v15 = vld [vmem:[%s3385_s24 + $0x124] ss:$16 sps:$4 sm:$0xff]   ;;  %v2835_v18 = vld [vmem:[%s3385_s24 + $0x120] ss:$16 sps:$4 sm:$0xff]   ;;  %v2868_v42 = vld [vmem:[%s3385_s24 + $0xe8] ss:$16 sps:$4 sm:$0xff]  }
 0x1a9   : > { %1296 = vmatpush1.bf16.msra.mxu0 %v2804_v60  ;;  %v2836_v19 = vld [vmem:[%s3385_s24 + $0x144] ss:$16 sps:$4 sm:$0xff]   ;;  %v2841_v22 = vld [vmem:[%s3385_s24 + $0x140] ss:$16 sps:$4 sm:$0xff]   ;;  %v2874_v45 = vld [vmem:[%s3385_s24 + $0x10c] ss:$16 sps:$4 sm:$0xff]  }
 0x1aa   : > { %1339 = vmatpush1.bf16.msra.mxu1 %v2805_v61  ;;  %1297 = vmatprep.subr.bf16.mxu0 %v2806_v62  ;;  %v2842_v23 = vld [vmem:[%s3385_s24 + $0x164] ss:$16 sps:$4 sm:$0xff]   ;;  %v2847_v27 = vld [vmem:[%s3385_s24 + $0x160] ss:$16 sps:$4 sm:$0xff]   ;;  %v686_v46 = vld [vmem:[#allocation3] sm:$0xff] }
 0x1ab   : > { %1340 = vmatprep.subr.bf16.mxu1 %v2808_v63  ;;  %v687_v26 = vld [vmem:[#allocation3 + $0x8] sm:$0xff]  ;;  %v2872_v47 = vld [vmem:[%s3385_s24 + $0x108] ss:$16 sps:$4 sm:$0xff]   ;;  %v2877_v48 = vld [vmem:[%s3385_s24 + $0x12c] ss:$16 sps:$4 sm:$0xff]  }
 0x1ac   : > { %v2848_v28 = vld [vmem:[%s3385_s24 + $0x184] ss:$16 sps:$4 sm:$0xff]   ;;  %1319 = vmatprep.mubr.bf16.mxu0 %v687_v26  ;;  %v2853_v31 = vld [vmem:[%s3385_s24 + $0x180] ss:$16 sps:$4 sm:$0xff]   ;;  %v2922_v50 = vld [vmem:[%s3383_s11 + $0x4] ss:$12 sps:$4 sm:$0xff]  }
 0x1ad   : > { %1298 = vmatpush1.bf16.msra.mxu0 %v2810_v0  ;;  %v2854_v32 = vld [vmem:[%s3385_s24 + $0x1a4] ss:$16 sps:$4 sm:$0xff]   ;;  %v2859_v35 = vld [vmem:[%s3385_s24 + $0x1a0] ss:$16 sps:$4 sm:$0xff]   ;;  %v2875_v52 = vld [vmem:[%s3385_s24 + $0x128] ss:$16 sps:$4 sm:$0xff]  }
 0x1ae   : > { %1341 = vmatpush1.bf16.msra.mxu1 %v2811_v1  ;;  %1299 = vmatprep.subr.bf16.mxu0 %v2812_v2  ;;  %v2860_v36 = vld [vmem:[%s3385_s24 + $0x1c4] ss:$16 sps:$4 sm:$0xff]   ;;  %v2865_v39 = vld [vmem:[%s3385_s24 + $0x1c0] ss:$16 sps:$4 sm:$0xff]   ;;  %v2880_v53 = vld [vmem:[%s3385_s24 + $0x14c] ss:$16 sps:$4 sm:$0xff]  }
 0x1af   : > { %1342 = vmatprep.subr.bf16.mxu1 %v2814_v3  ;;  %v2866_v40 = vld [vmem:[%s3385_s24 + $0x1e4] ss:$16 sps:$4 sm:$0xff]   ;;  %v2871_v44 = vld [vmem:[%s3385_s24 + $0x1e0] ss:$16 sps:$4 sm:$0xff]   ;;  %v2878_v55 = vld [vmem:[%s3385_s24 + $0x148] ss:$16 sps:$4 sm:$0xff]  }
 0x1b0   : > { %v2920_v49 = vld [vmem:[%s3383_s11] ss:$12 sps:$4 sm:$0xff]   ;;  %v2925_v51 = vld [vmem:[%s3383_s11 + $0x1c] ss:$12 sps:$4 sm:$0xff]   ;;  %v2923_v54 = vld [vmem:[%s3383_s11 + $0x18] ss:$12 sps:$4 sm:$0xff]  }
 0x1b1   : > { %1300 = vmatpush1.bf16.msra.mxu0 %v2816_v4  ;;  %v2928_v56 = vld [vmem:[%s3383_s11 + $0x34] ss:$12 sps:$4 sm:$0xff]   ;;  %v2926_v58 = vld [vmem:[%s3383_s11 + $0x30] ss:$12 sps:$4 sm:$0xff]   ;;  %v2931_v59 = vld [vmem:[%s3383_s11 + $0x4c] ss:$12 sps:$4 sm:$0xff]  }
 0x1b2   : > { %1343 = vmatpush1.bf16.msra.mxu1 %v2817_v5  ;;  %1301 = vmatprep.subr.bf16.mxu0 %v2818_v6  ;;  %v2883_v57 = vld [vmem:[%s3385_s24 + $0x16c] ss:$16 sps:$4 sm:$0xff]   ;;  %v2881_v60 = vld [vmem:[%s3385_s24 + $0x168] ss:$16 sps:$4 sm:$0xff]  }
 0x1b3   : > { %1344 = vmatprep.subr.bf16.mxu1 %v2820_v7  ;;  %v2886_v61 = vld [vmem:[%s3385_s24 + $0x18c] ss:$16 sps:$4 sm:$0xff]   ;;  %v2884_v0 = vld [vmem:[%s3385_s24 + $0x188] ss:$16 sps:$4 sm:$0xff]  }
 0x1b4   : > { %v2929_v62 = vld [vmem:[%s3383_s11 + $0x48] ss:$12 sps:$4 sm:$0xff]   ;;  %v2934_v63 = vld [vmem:[%s3383_s11 + $0x64] ss:$12 sps:$4 sm:$0xff]   ;;  %v2932_v2 = vld [vmem:[%s3383_s11 + $0x60] ss:$12 sps:$4 sm:$0xff]  }
 0x1b5   : > { %1302 = vmatpush1.bf16.msra.mxu0 %v2822_v8  ;;  %v2889_v1 = vld [vmem:[%s3385_s24 + $0x1ac] ss:$16 sps:$4 sm:$0xff]   ;;  %v2887_v3 = vld [vmem:[%s3385_s24 + $0x1a8] ss:$16 sps:$4 sm:$0xff]  }
 0x1b6   : > { %1345 = vmatpush1.bf16.msra.mxu1 %v2823_v9  ;;  %1303 = vmatprep.subr.bf16.mxu0 %v2824_v10  ;;  %v2892_v4 = vld [vmem:[%s3385_s24 + $0x1cc] ss:$16 sps:$4 sm:$0xff]   ;;  %v2890_v5 = vld [vmem:[%s3385_s24 + $0x1c8] ss:$16 sps:$4 sm:$0xff]  }
 0x1b7   : > { %1373 = vmatprep.subr.bf16.mxu1 %v2828_v11  ;;  %v2895_v6 = vld [vmem:[%s3385_s24 + $0x1ec] ss:$16 sps:$4 sm:$0xff]   ;;  %v2893_v7 = vld [vmem:[%s3385_s24 + $0x1e8] ss:$16 sps:$4 sm:$0xff]  }
 0x1b8   : > { %v2898_v8 = vld [vmem:[%s3385_s24 + $0x20c] ss:$16 sps:$4 sm:$0xff]   ;;  %v2896_v9 = vld [vmem:[%s3385_s24 + $0x208] ss:$16 sps:$4 sm:$0xff]  }
 0x1b9   : > { %1363 = vmatmul.mubr.bf16.vlgmr.msra.gmra.mrb[0].mxu1 %v3447_v12  ;;  %1304 = vmatpush1.bf16.msra.mxu0 %v2829_v14  ;;  %v2901_v10 = vld [vmem:[%s3385_s24 + $0x22c] ss:$16 sps:$4 sm:$0xff]   ;;  %v2899_v11 = vld [vmem:[%s3385_s24 + $0x228] ss:$16 sps:$4 sm:$0xff]  }
 0x1ba   : > { %1374 = vmatpush1.bf16.msra.mxu1 %v2826_v13  ;;  %1305 = vmatprep.subr.bf16.mxu0 %v2830_v15  ;;  %v2904_v13 = vld [vmem:[%s3385_s24 + $0x24c] ss:$16 sps:$4 sm:$0xff]   ;;  %v2902_v14 = vld [vmem:[%s3385_s24 + $0x248] ss:$16 sps:$4 sm:$0xff]  }
 0x1bb   : > { %1375 = vmatprep.subr.bf16.mxu1 %v2834_v16  ;;  %1405 = vmatprep.mubr.bf16.mxu1 %v687_v26  ;;  %v2907_v15 = vld [vmem:[%s3385_s24 + $0x26c] ss:$16 sps:$4 sm:$0xff]   ;;  %v2905_v16 = vld [vmem:[%s3385_s24 + $0x268] ss:$16 sps:$4 sm:$0xff]  }
 0x1bc   : > { %v2938_v26 = vld [vmem:[%s3383_s11 + $0x90] ss:$12 sps:$4 sm:$0xff]  }
 0x1bd   : > { %1306 = vmatpush1.bf16.msra.mxu0 %v2835_v18  ;;  %v2908_v18 = vld [vmem:[%s3385_s24 + $0x288] ss:$16 sps:$4 sm:$0xff]  }
 0x1be   : > { %1376 = vmatpush1.bf16.msra.mxu1 %v2832_v17  ;;  %1307 = vmatprep.subr.bf16.mxu0 %v2836_v19  ;;  %v2910_v17 = vld [vmem:[%s3385_s24 + $0x28c] ss:$16 sps:$4 sm:$0xff]   ;;  %v2911_v19 = vld [vmem:[%s3385_s24 + $0x2a8] ss:$16 sps:$4 sm:$0xff]  }
 0x1bf   : > { %1377 = vmatprep.subr.bf16.mxu1 %v2840_v20  ;;  %v2937_v20 = vld [vmem:[%s3383_s11 + $0x7c] ss:$12 sps:$4 sm:$0xff]  }
 0x1c1   : > { %1308 = vmatpush1.bf16.msra.mxu0 %v2841_v22  ;;  %v2935_v22 = vld [vmem:[%s3383_s11 + $0x78] ss:$12 sps:$4 sm:$0xff]  }
 0x1c2   : > { %1378 = vmatpush1.bf16.msra.mxu1 %v2838_v21  ;;  %1309 = vmatprep.subr.bf16.mxu0 %v2842_v23  ;;  %v2916_v21 = vld [vmem:[%s3385_s24 + $0x2cc] ss:$16 sps:$4 sm:$0xff]   ;;  %v2914_v23 = vld [vmem:[%s3385_s24 + $0x2c8] ss:$16 sps:$4 sm:$0xff]  }
 0x1c3   : > { %1379 = vmatprep.subr.bf16.mxu1 %v2846_v24  ;;  %v2940_v24 = vld [vmem:[%s3383_s11 + $0x94] ss:$12 sps:$4 sm:$0xff]  }
 0x1c5   : > { %1310 = vmatpush1.bf16.msra.mxu0 %v2847_v27  ;;  %v2943_v27 = vld [vmem:[%s3383_s11 + $0xac] ss:$12 sps:$4 sm:$0xff]  }
 0x1c6   : > { %1380 = vmatpush1.bf16.msra.mxu1 %v2844_v25  ;;  %1311 = vmatprep.subr.bf16.mxu0 %v2848_v28  ;;  %v2919_v25 = vld [vmem:[%s3385_s24 + $0x2ec] ss:$16 sps:$4 sm:$0xff]  }
 0x1c7   : > { %1381 = vmatprep.subr.bf16.mxu1 %v2852_v29  ;;  %v2941_v28 = vld [vmem:[%s3383_s11 + $0xa8] ss:$12 sps:$4 sm:$0xff]   ;;  %v2917_v29 = vld [vmem:[%s3385_s24 + $0x2e8] ss:$16 sps:$4 sm:$0xff]  }
 0x1c9   : > { %1312 = vmatpush1.bf16.msra.mxu0 %v2853_v31  ;;  %v2947_v31 = vld [vmem:[%s3383_s11 + $0xc8] ss:$12 sps:$4 sm:$0xff]  }
 0x1ca   : > { %1382 = vmatpush1.bf16.msra.mxu1 %v2850_v30  ;;  %1313 = vmatprep.subr.bf16.mxu0 %v2854_v32  ;;  %v2946_v30 = vld [vmem:[%s3383_s11 + $0xc4] ss:$12 sps:$4 sm:$0xff]   ;;  %v2944_v32 = vld [vmem:[%s3383_s11 + $0xc0] ss:$12 sps:$4 sm:$0xff]  }
 0x1cb   : > { %1383 = vmatprep.subr.bf16.mxu1 %v2858_v33  ;;  %v2948_v33 = vld [vmem:[%s3383_s11 + $0x8] ss:$12 sps:$4 sm:$0xff]  }
 0x1cd   : > { %1314 = vmatpush1.bf16.msra.mxu0 %v2859_v35  ;;  %v2952_v35 = vld [vmem:[%s3383_s11 + $0xe0] ss:$12 sps:$4 sm:$0xff]  }
 0x1ce   : > { %1384 = vmatpush1.bf16.msra.mxu1 %v2856_v34  ;;  %1315 = vmatprep.subr.bf16.mxu0 %v2860_v36  ;;  %v2951_v34 = vld [vmem:[%s3383_s11 + $0xdc] ss:$12 sps:$4 sm:$0xff]   ;;  %v2949_v36 = vld [vmem:[%s3383_s11 + $0xd8] ss:$12 sps:$4 sm:$0xff]  }
 0x1cf   : > { %1385 = vmatprep.subr.bf16.mxu1 %v2864_v37  ;;  %v2953_v37 = vld [vmem:[%s3383_s11 + $0x20] ss:$12 sps:$4 sm:$0xff]  }
 0x1d1   : > { %1316 = vmatpush1.bf16.msra.mxu0 %v2865_v39  ;;  %v2957_v39 = vld [vmem:[%s3383_s11 + $0xf8] ss:$12 sps:$4 sm:$0xff]  }
 0x1d2   : > { %1386 = vmatpush1.bf16.msra.mxu1 %v2862_v38  ;;  %1317 = vmatprep.subr.bf16.mxu0 %v2866_v40  ;;  %v2956_v38 = vld [vmem:[%s3383_s11 + $0xf4] ss:$12 sps:$4 sm:$0xff]   ;;  %v2954_v40 = vld [vmem:[%s3383_s11 + $0xf0] ss:$12 sps:$4 sm:$0xff]  }
 0x1d3   : > { %1387 = vmatprep.subr.bf16.mxu1 %v2870_v41  ;;  %v2958_v41 = vld [vmem:[%s3383_s11 + $0x38] ss:$12 sps:$4 sm:$0xff]  }
 0x1d5   : > { %1318 = vmatpush1.bf16.msra.mxu0 %v2871_v44  ;;  %v2959_v44 = vld [vmem:[%s3383_s11 + $0x108] ss:$12 sps:$4 sm:$0xff]  }
 0x1d6   : > { %1388 = vmatpush1.bf16.msra.mxu1 %v2868_v42  ;;  %2117 = vmatprep.subr.bf16.mxu0 %v2922_v50  ;;  %v2962_v42 = vld [vmem:[%s3383_s11 + $0x110] ss:$12 sps:$4 sm:$0xff]  }
 0x1d7   : > { %1389 = vmatprep.subr.bf16.mxu1 %v2874_v45  ;;  %v2963_v45 = vld [vmem:[%s3383_s11 + $0x50] ss:$12 sps:$4 sm:$0xff]  }
 0x1d8   : > { %1320 = vmatmul.mubr.bf16.vlgmr.msra.gmra.mrb[0].mxu0 %v686_v46  ;;  %v2971_v50 = vld [vmem:[%s3383_s11 + $0x13c] ss:$12 sps:$4 sm:$0xff]  }
 0x1d9   : > { %2118 = vmatpush1.bf16.msra.mxu0 %v2920_v49  ;;  %v2968_v49 = vld [vmem:[%s3383_s11 + $0x68] ss:$12 sps:$4 sm:$0xff]  }
 0x1da   : > { %1390 = vmatpush1.bf16.msra.mxu1 %v2872_v47  ;;  %2119 = vmatprep.subr.bf16.mxu0 %v2925_v51  ;;  %v2967_v47 = vld [vmem:[%s3383_s11 + $0x128] ss:$12 sps:$4 sm:$0xff]   ;;  %v2969_v51 = vld [vmem:[%s3383_s11 + $0x138] ss:$12 sps:$4 sm:$0xff]  }
 0x1db   : > { %1391 = vmatprep.subr.bf16.mxu1 %v2877_v48  ;;  %v2964_v48 = vld [vmem:[%s3383_s11 + $0x120] ss:$12 sps:$4 sm:$0xff]  }
 0x1dd   : > { %2120 = vmatpush1.bf16.msra.mxu0 %v2923_v54  ;;  %v2976_v54 = vld [vmem:[%s3383_s11 + $0x154] ss:$12 sps:$4 sm:$0xff]  }
 0x1de   : > { %1392 = vmatpush1.bf16.msra.mxu1 %v2875_v52  ;;  %2121 = vmatprep.subr.bf16.mxu0 %v2928_v56  ;;  %v2972_v52 = vld [vmem:[%s3383_s11 + $0x140] ss:$12 sps:$4 sm:$0xff]   ;;  %v2977_v56 = vld [vmem:[%s3383_s11 + $0x158] ss:$12 sps:$4 sm:$0xff]  }
 0x1df   : > { %1393 = vmatprep.subr.bf16.mxu1 %v2880_v53  ;;  %v2973_v53 = vld [vmem:[%s3383_s11 + $0x80] ss:$12 sps:$4 sm:$0xff]  }
 0x1e1   : > { %2122 = vmatpush1.bf16.msra.mxu0 %v2926_v58  ;;  %v2981_v58 = vld [vmem:[%s3383_s11 + $0x16c] ss:$12 sps:$4 sm:$0xff]  }
 0x1e2   : > { %1394 = vmatpush1.bf16.msra.mxu1 %v2878_v55  ;;  %2123 = vmatprep.subr.bf16.mxu0 %v2931_v59  ;;  %v2974_v55 = vld [vmem:[%s3383_s11 + $0x150] ss:$12 sps:$4 sm:$0xff]   ;;  %v2979_v59 = vld [vmem:[%s3383_s11 + $0x168] ss:$12 sps:$4 sm:$0xff]  }
 0x1e3   : > { %1395 = vmatprep.subr.bf16.mxu1 %v2883_v57  ;;  %v2978_v57 = vld [vmem:[%s3383_s11 + $0x98] ss:$12 sps:$4 sm:$0xff]  }
 0x1e5   : > { %2124 = vmatpush1.bf16.msra.mxu0 %v2929_v62  ;;  %v2986_v62 = vld [vmem:[%s3383_s11 + $0x184] ss:$12 sps:$4 sm:$0xff]  }
 0x1e6   : > { %1396 = vmatpush1.bf16.msra.mxu1 %v2881_v60  ;;  %2125 = vmatprep.subr.bf16.mxu0 %v2934_v63  ;;  %v2982_v60 = vld [vmem:[%s3383_s11 + $0x170] ss:$12 sps:$4 sm:$0xff]   ;;  %v3008_v63 = vld [vmem:[%s3383_s11 + $0x248] ss:$12 sps:$4 sm:$0xff]  }
 0x1e7   : > { %1397 = vmatprep.subr.bf16.mxu1 %v2886_v61  ;;  %v2983_v61 = vld [vmem:[%s3383_s11 + $0xb0] ss:$12 sps:$4 sm:$0xff]  }
 0x1e9   : > { %2126 = vmatpush1.bf16.msra.mxu0 %v2932_v2 }
 0x1ea   : > { %1398 = vmatpush1.bf16.msra.mxu1 %v2884_v0  ;;  %2127 = vmatprep.subr.bf16.mxu0 %v2937_v20 }
 0x1eb   : > { %1399 = vmatprep.subr.bf16.mxu1 %v2889_v1 }
 0x1ed   : > { %2128 = vmatpush1.bf16.msra.mxu0 %v2935_v22 }
 0x1ee   : > { %1400 = vmatpush1.bf16.msra.mxu1 %v2887_v3  ;;  %2129 = vmatprep.subr.bf16.mxu0 %v2940_v24 }
 0x1ef   : > { %1401 = vmatprep.subr.bf16.mxu1 %v2892_v4  ;;  %v787_v4 = vlaneseq }
 0x1f1   : > { %2130 = vmatpush1.bf16.msra.mxu0 %v2938_v26 }
 0x1f2   : > { %1402 = vmatpush1.bf16.msra.mxu1 %v2890_v5  ;;  %2131 = vmatprep.subr.bf16.mxu0 %v2943_v27  ;;  %v3564_v5 = vshrl.u32 %v787_v4, 7 }
 0x1f3   : > { %1403 = vmatprep.subr.bf16.mxu1 %v2895_v6 }
 0x1f4   : > { %v789_v6 = vsub.s32 0, %v3564_v5  ;;  %v797_v4 = vsub.s32 2, %v3564_v5 }
 0x1f5   : > { %2132 = vmatpush1.bf16.msra.mxu0 %v2941_v28 }
 0x1f6   : > { %1404 = vmatpush1.bf16.msra.mxu1 %v2893_v7  ;;  %2133 = vmatprep.subr.bf16.mxu0 %v2946_v30  ;;  %v3572_v7 = vld [vmem:[%s558_s23] sm:$0xf]  ;;  %v3012_v30 = vld [vmem:[%s3383_s11 + $0x188] ss:$12 sps:$4 sm:$0xff]  }
 0x1f7   : > { %1416 = vmatprep.subr.bf16.mxu1 %v2898_v8  ;;  %v793_v8 = vsub.s32 1, %v3564_v5 }
 0x1f9   : > { %1406 = vmatmul.mubr.bf16.vlgmr.msra.gmra.mrb[4].mxu1 %v686_v46  ;;  %2134 = vmatpush1.bf16.msra.mxu0 %v2944_v32  ;;  %v2966_v46 = vld [vmem:[%s3383_s11 + $0x124] ss:$12 sps:$4 sm:$0xff]   ;;  %v3013_v32 = vld [vmem:[%s3383_s11 + $0x260] ss:$12 sps:$4 sm:$0xff]  }
 0x1fa   : > { %1417 = vmatpush1.bf16.msra.mxu1 %v2896_v9  ;;  %1448 = vmatprep.mubr.bf16.mxu1 %v3089_v43  ;;  %v2913_v43 = vld [vmem:[%s3385_s24 + $0x2ac] ss:$16 sps:$4 sm:$0xff]   ;;  %v790_v9 = vrot.slane %v3572_v7, %v789_v6 }
 0x1fb   : > { %1418 = vmatprep.subr.bf16.mxu1 %v2901_v10  ;;  %2135 = vmatprep.subr.bf16.mxu0 %v2951_v34  ;;  %v794_v10 = vrot.slane %v3572_v7, %v793_v8  ;;  %v3017_v34 = vld [vmem:[%s3383_s11 + $0x1a0] ss:$12 sps:$4 sm:$0xff]  }
 0x1fd   : > { %2136 = vmatpush1.bf16.msra.mxu0 %v2949_v36  ;;  %v3018_v36 = vld [vmem:[%s3383_s11 + $0x278] ss:$12 sps:$4 sm:$0xff]  }
 0x1fe   : > { %1419 = vmatpush1.bf16.msra.mxu1 %v2899_v11  ;;  %2137 = vmatprep.subr.bf16.mxu0 %v2956_v38  ;;  %v3022_v38 = vld [vmem:[%s3383_s11 + $0x1b8] ss:$12 sps:$4 sm:$0xff]  }
 0x1ff   : > { %1420 = vmatprep.subr.bf16.mxu1 %v2904_v13 }
 0x201   : > { %2138 = vmatpush1.bf16.msra.mxu0 %v2954_v40  ;;  %v3023_v40 = vld [vmem:[%s3383_s11 + $0x290] ss:$12 sps:$4 sm:$0xff]  }
 0x202   : > { %1421 = vmatpush1.bf16.msra.mxu1 %v2902_v14 }
 0x203   : > { %1422 = vmatprep.subr.bf16.mxu1 %v2907_v15 }
 0x206   : > { %1423 = vmatpush1.bf16.msra.mxu1 %v2905_v16 }
 0x207   : > { %1424 = vmatprep.subr.bf16.mxu1 %v2910_v17 }
 0x20a   : > { %1425 = vmatpush1.bf16.msra.mxu1 %v2908_v18 }
 0x20b   : > { %1426 = vmatprep.subr.bf16.mxu1 %v2913_v43 }
 0x20e   : > { %1427 = vmatpush1.bf16.msra.mxu1 %v2911_v19 }
 0x20f   : > { %1428 = vmatprep.subr.bf16.mxu1 %v2916_v21 }
 0x212   : > { %1429 = vmatpush1.bf16.msra.mxu1 %v2914_v23 }
 0x213   : > { %1430 = vmatprep.subr.bf16.mxu1 %v2919_v25 }
 0x216   : > { %1431 = vmatpush1.bf16.msra.mxu1 %v2917_v29  ;;  %v2984_v29 = vld [vmem:[%s3383_s11 + $0x180] ss:$12 sps:$4 sm:$0xff]  }
 0x217   : > { %2663 = vmatprep.subr.bf16.mxu1 %v2947_v31  ;;  %v2989_v31 = vld [vmem:[%s3383_s11 + $0x19c] ss:$12 sps:$4 sm:$0xff]  }
 0x219   : > { %1449 = vmatmul.mubr.bf16.vlgmr.msra.gmra.mrb[4].mxu1 %v3447_v12  ;;  %v2961_v12 = vld [vmem:[%s3383_s11 + $0x10c] ss:$12 sps:$4 sm:$0xff]  }
 0x21a   : > { %2664 = vmatpush3.bf16.msra.mxu1 %v2948_v33  ;;  %2139 = vmatprep.subr.bf16.mxu0 %v2961_v12  ;;  %v2987_v33 = vld [vmem:[%s3383_s11 + $0x198] ss:$12 sps:$4 sm:$0xff]   ;;  %v3027_v12 = vld [vmem:[%s3383_s11 + $0x1d0] ss:$12 sps:$4 sm:$0xff]  }
 0x21b   : > { %2665 = vmatprep.subr.bf16.mxu1 %v2952_v35  ;;  %2140 = vmatpush1.bf16.msra.mxu0 %v2959_v44  ;;  %v2992_v35 = vld [vmem:[%s3383_s11 + $0x1b4] ss:$12 sps:$4 sm:$0xff]  }
 0x21c   : > { %2141 = vmatprep.subr.bf16.mxu0 %v2966_v46  ;;  %v3028_v44 = vld [vmem:[%s3383_s11 + $0x2a8] ss:$12 sps:$4 sm:$0xff]  }
 0x21d   : > { %v3032_v46 = vld [vmem:[%s3383_s11 + $0x1e8] ss:$12 sps:$4 sm:$0xff]  }
 0x21e   : > { %2666 = vmatpush3.bf16.msra.mxu1 %v2953_v37  ;;  %v2990_v37 = vld [vmem:[%s3383_s11 + $0x1b0] ss:$12 sps:$4 sm:$0xff]  }
 0x21f   : > { %2667 = vmatprep.subr.bf16.mxu1 %v2957_v39  ;;  %2142 = vmatpush1.bf16.msra.mxu0 %v2964_v48  ;;  %v2995_v39 = vld [vmem:[%s3383_s11 + $0x1cc] ss:$12 sps:$4 sm:$0xff]  }
 0x220   : > { %2143 = vmatprep.subr.bf16.mxu0 %v2971_v50  ;;  %v3033_v48 = vld [vmem:[%s3383_s11 + $0x2c0] ss:$12 sps:$4 sm:$0xff]  }
 0x221   : > { %v3037_v50 = vld [vmem:[%s3383_s11 + $0x200] ss:$12 sps:$4 sm:$0xff]  }
 0x222   : > { %2668 = vmatpush3.bf16.msra.mxu1 %v2958_v41  ;;  %v2993_v41 = vld [vmem:[%s3383_s11 + $0x1c8] ss:$12 sps:$4 sm:$0xff]  }
 0x223   : > { %2669 = vmatprep.subr.bf16.mxu1 %v2962_v42  ;;  %2144 = vmatpush1.bf16.msra.mxu0 %v2969_v51  ;;  %v2998_v42 = vld [vmem:[%s3383_s11 + $0x1e4] ss:$12 sps:$4 sm:$0xff]   ;;  %v3004_v51 = vld [vmem:[%s3383_s11 + $0x214] ss:$12 sps:$4 sm:$0xff]  }
 0x224   : > { %2145 = vmatprep.subr.bf16.mxu0 %v2976_v54  ;;  %v3042_v54 = vld [vmem:[%s3383_s11 + $0x218] ss:$12 sps:$4 sm:$0xff]  }
 0x226   : > { %2670 = vmatpush3.bf16.msra.mxu1 %v2963_v45  ;;  %v2996_v45 = vld [vmem:[%s3383_s11 + $0x1e0] ss:$12 sps:$4 sm:$0xff]  }
 0x227   : > { %2671 = vmatprep.subr.bf16.mxu1 %v2967_v47  ;;  %2146 = vmatpush1.bf16.msra.mxu0 %v2974_v55  ;;  %v3001_v47 = vld [vmem:[%s3383_s11 + $0x1fc] ss:$12 sps:$4 sm:$0xff]   ;;  %v3007_v55 = vld [vmem:[%s3383_s11 + $0x22c] ss:$12 sps:$4 sm:$0xff]  }
 0x228   : > { %2147 = vmatprep.subr.bf16.mxu0 %v2981_v58  ;;  %v3047_v58 = vld [vmem:[%s3383_s11 + $0x230] ss:$12 sps:$4 sm:$0xff]  }
 0x22a   : > { %2672 = vmatpush3.bf16.msra.mxu1 %v2968_v49  ;;  %v2999_v49 = vld [vmem:[%s3383_s11 + $0x1f8] ss:$12 sps:$4 sm:$0xff]  }
 0x22b   : > { %2673 = vmatprep.subr.bf16.mxu1 %v2972_v52  ;;  %2148 = vmatpush1.bf16.msra.mxu0 %v2979_v59  ;;  %v3038_v52 = vld [vmem:[%s3383_s11 + $0x2d8] ss:$12 sps:$4 sm:$0xff]  }
 0x22c   : > { %2160 = vmatprep.subr.bf16.mxu0 %v2986_v62  ;;  %v3011_v59 = vld [vmem:[%s3383_s11 + $0x244] ss:$12 sps:$4 sm:$0xff]  }
 0x22d   : > { %v3014_v62 = vld [vmem:[%s3383_s11 + $0x258] ss:$12 sps:$4 sm:$0xff]  }
 0x22e   : > { %2674 = vmatpush3.bf16.msra.mxu1 %v2973_v53  ;;  %v3002_v53 = vld [vmem:[%s3383_s11 + $0x210] ss:$12 sps:$4 sm:$0xff]  }
 0x22f   : > { %2675 = vmatprep.subr.bf16.mxu1 %v2977_v56  ;;  %v3043_v56 = vld [vmem:[%s3383_s11 + $0x2f0] ss:$12 sps:$4 sm:$0xff]  }
 0x232   : > { %2676 = vmatpush3.bf16.msra.mxu1 %v2978_v57  ;;  %v3005_v57 = vld [vmem:[%s3383_s11 + $0x228] ss:$12 sps:$4 sm:$0xff]  }
 0x233   : > { %2677 = vmatprep.subr.bf16.mxu1 %v2982_v60  ;;  %v3009_v60 = vld [vmem:[%s3383_s11 + $0x240] ss:$12 sps:$4 sm:$0xff]  }
 0x236   : > { %2678 = vmatpush3.bf16.msra.mxu1 %v2983_v61  ;;  %v3016_v61 = vld [vmem:[%s3383_s11 + $0x25c] ss:$12 sps:$4 sm:$0xff]  }
 0x237   : > { %2685 = vmatprep.subr.bf16.mxu1 %v3008_v63  ;;  %v3021_v63 = vld [vmem:[%s3383_s11 + $0x274] ss:$12 sps:$4 sm:$0xff]  }
 0x28c   : > { %v1364_v0 = vpop.f32.mrb[0].mxu1 }
 0x28d   : > { %v1366_v1 = vpop.f32.mrb[1].mxu1 }
 0x28e   : > { %v1368_v2 = vpop.f32.mrb[2].mxu1 }
 0x28f   : > { %v1370_v3 = vpop.f32.mrb[3].mxu1 }
 0x2ab   : > { %v1321_v11 = vpop.f32.mrb[0].mxu0 }
 0x2ac   : > { %v1322_v13 = vadd.f32 %v1321_v11, %v790_v9  ;;  %v1323_v14 = vpop.f32.mrb[1].mxu0  ;;  %v3036_v11 = vld [vmem:[%s3383_s11 + $0x2bc] ss:$12 sps:$4 sm:$0xff]  }
 0x2ad   : > { %v1324_v15 = vadd.f32 %v1323_v14, %v794_v10  ;;  %v1325_v16 = vpop.f32.mrb[2].mxu0  ;;  %v3034_v14 = vld [vmem:[%s3383_s11 + $0x2b8] ss:$12 sps:$4 sm:$0xff]  }
 0x2ae   : > { %v1365_v17 = vadd.f32 %v1364_v0, %v1322_v13  ;;  %v1326_v18 = vadd.f32 %v1325_v16, %v790_v9  ;;  %v1327_v43 = vpop.f32.mrb[3].mxu0  ;;  %v3019_v0 = vld [vmem:[%s3383_s11 + $0x270] ss:$12 sps:$4 sm:$0xff]   ;;  %v3029_v9 = vld [vmem:[%s3383_s11 + $0x2a0] ss:$12 sps:$4 sm:$0xff]   ;;  %v798_v13 = vrot.slane %v3572_v7, %v797_v4 }
 0x2af   : > { %v1367_v19 = vadd.f32 %v1366_v1, %v1324_v15  ;;  %v1328_v20 = vadd.f32 %v1327_v43, %v794_v10  ;;  %v3026_v1 = vld [vmem:[%s3383_s11 + $0x28c] ss:$12 sps:$4 sm:$0xff]   ;;  %v801_v10 = vsub.s32 3, %v3564_v5  ;;  %v3041_v16 = vld [vmem:[%s3383_s11 + $0x2d4] ss:$12 sps:$4 sm:$0xff]  }
 0x2b0   : > { %v1369_v21 = vadd.f32 %v1368_v2, %v1326_v18  ;;  %v1459_v23 = vmax.f32 %v1365_v17, 0.0  ;;  %v3024_v2 = vld [vmem:[%s3383_s11 + $0x288] ss:$12 sps:$4 sm:$0xff]  }
 0x2b1   : > { %v1371_v22 = vadd.f32 %v1370_v3, %v1328_v20  ;;  %v1460_v25 = vmax.f32 %v1367_v19, 0.0  ;;  %v3031_v3 = vld [vmem:[%s3383_s11 + $0x2a4] ss:$12 sps:$4 sm:$0xff]   ;;  %v802_v15 = vrot.slane %v3572_v7, %v801_v10  ;;  %v3044_v7 = vld [vmem:[%s3383_s11 + $0x2e8] ss:$12 sps:$4 sm:$0xff]  }
 0x2b2   : > { %v1463_v24 = vmax.f32 %v1369_v21, 0.0  ;;  %v3039_v21 = vld [vmem:[%s3383_s11 + $0x2d0] ss:$12 sps:$4 sm:$0xff]   ;;  %v2306_v5 = vld [vmem:[%s3694_s0 + $0x28] sm:$0xff] (!%p2657_p12) }
 0x2b3   : > { %v1464_v26 = vmax.f32 %v1371_v22, 0.0 }
 0x2b4   : > { %v1473_v27 = vpack.c.bf16 %v1463_v24, %v1459_v23  ;;  %v3046_v24 = vld [vmem:[%s3383_s11 + $0x2ec] ss:$12 sps:$4 sm:$0xff]  }
 0x2b5   : > { %v1474_v28 = vpack.c.bf16 %v1464_v26, %v1460_v25 }
 0x2b7   : > { %2149 = vmatprep.mubr.bf16.mxu0 %v1474_v28  ;;  %2235 = vmatprep.mubr.bf16.mxu1 %v1474_v28 }
 0x2b8   : > { %2150 = vmatmul.mubr.bf16.vlgmr.msra.gmra.mrb[4].mxu0 %v1473_v27  ;;  %2236 = vmatmul.mubr.bf16.vlgmr.msra.gmra.mrb[8].mxu1 %v1473_v27 }
 0x2b9   : > { %2161 = vmatpush1.bf16.msra.mxu0 %v2984_v29  ;;  %2686 = vmatpush3.bf16.msra.mxu1 %v3012_v30 }
 0x2ba   : > { %2162 = vmatprep.subr.bf16.mxu0 %v2989_v31  ;;  %2687 = vmatprep.subr.bf16.mxu1 %v3013_v32 }
 0x2bd   : > { %2163 = vmatpush1.bf16.msra.mxu0 %v2987_v33  ;;  %2688 = vmatpush3.bf16.msra.mxu1 %v3017_v34 }
 0x2be   : > { %2164 = vmatprep.subr.bf16.mxu0 %v2992_v35  ;;  %2689 = vmatprep.subr.bf16.mxu1 %v3018_v36 }
 0x2c1   : > { %2165 = vmatpush1.bf16.msra.mxu0 %v2990_v37  ;;  %2690 = vmatpush3.bf16.msra.mxu1 %v3022_v38  ;;  %v1467_v38 = vld [vmem:[#allocation2] sm:$0xff] }
 0x2c2   : > { %2166 = vmatprep.subr.bf16.mxu0 %v2995_v39  ;;  %2691 = vmatprep.subr.bf16.mxu1 %v3023_v40  ;;  %v1468_v40 = vld [vmem:[#allocation2 + $0x8] sm:$0xff] }
 0x2c5   : > { %2167 = vmatpush1.bf16.msra.mxu0 %v2993_v41  ;;  %2692 = vmatpush3.bf16.msra.mxu1 %v3027_v12 }
 0x2c6   : > { %2168 = vmatprep.subr.bf16.mxu0 %v2998_v42  ;;  %2693 = vmatprep.subr.bf16.mxu1 %v3028_v44  ;;  %v1470_v42 = vld [vmem:[#allocation2 + $0x18] sm:$0xff] }
 0x2c9   : > { %2169 = vmatpush1.bf16.msra.mxu0 %v2996_v45  ;;  %2694 = vmatpush3.bf16.msra.mxu1 %v3032_v46 }
 0x2ca   : > { %2170 = vmatprep.subr.bf16.mxu0 %v3001_v47  ;;  %2695 = vmatprep.subr.bf16.mxu1 %v3033_v48  ;;  %v1471_v48 = vld [vmem:[#allocation2 + $0x20] sm:$0xff] }
 0x2cd   : > { %2171 = vmatpush1.bf16.msra.mxu0 %v2999_v49  ;;  %2696 = vmatpush3.bf16.msra.mxu1 %v3037_v50  ;;  %v1469_v49 = vld [vmem:[#allocation2 + $0x10] sm:$0xff] }
 0x2ce   : > { %2172 = vmatprep.subr.bf16.mxu0 %v3004_v51  ;;  %2697 = vmatprep.subr.bf16.mxu1 %v3038_v52 }
 0x2d1   : > { %2173 = vmatpush1.bf16.msra.mxu0 %v3002_v53  ;;  %2698 = vmatpush3.bf16.msra.mxu1 %v3042_v54 }
 0x2d2   : > { %2174 = vmatprep.subr.bf16.mxu0 %v3007_v55  ;;  %2699 = vmatprep.subr.bf16.mxu1 %v3043_v56 }
 0x2d5   : > { %2175 = vmatpush1.bf16.msra.mxu0 %v3005_v57  ;;  %2700 = vmatpush3.bf16.msra.mxu1 %v3047_v58  ;;  %v1472_v57 = vld [vmem:[#allocation2 + $0x28] sm:$0xff] }
 0x2d6   : > { %2176 = vmatprep.subr.bf16.mxu0 %v3011_v59 }
 0x2d9   : > { %2177 = vmatpush1.bf16.msra.mxu0 %v3009_v60 }
 0x2da   : > { %2178 = vmatprep.subr.bf16.mxu0 %v3016_v61 }
 0x2dd   : > { %2179 = vmatpush1.bf16.msra.mxu0 %v3014_v62  ;;  %v2301_v62 = vld [vmem:[%s3694_s0] sm:$0xff] (!%p2657_p12) }
 0x2de   : > { %2180 = vmatprep.subr.bf16.mxu0 %v3021_v63 }
 0x2e1   : > { %2181 = vmatpush1.bf16.msra.mxu0 %v3019_v0  ;;  %v2319_v0 = vld [vmem:[%s3700_s6] sm:$0x7] (!%p2657_p12) }
 0x2e2   : > { %2182 = vmatprep.subr.bf16.mxu0 %v3026_v1  ;;  %v2328_v10 = vrot.slane (!%p2657_p12), %v2319_v0, %v793_v8  ;;  %v2305_v8 = vld [vmem:[%s3694_s0 + $0x20] sm:$0xff] (!%p2657_p12) }
 0x2e5   : > { %2183 = vmatpush1.bf16.msra.mxu0 %v3024_v2  ;;  %v2324_v2 = vrot.slane (!%p2657_p12), %v2319_v0, %v789_v6  ;;  %v2304_v6 = vld [vmem:[%s3694_s0 + $0x18] sm:$0xff] (!%p2657_p12) }
 0x2e6   : > { %2184 = vmatprep.subr.bf16.mxu0 %v3031_v3  ;;  %v2302_v3 = vld [vmem:[%s3694_s0 + $0x8] sm:$0xff] (!%p2657_p12) }
 0x2e9   : > { %2185 = vmatpush1.bf16.msra.mxu0 %v3029_v9 }
 0x2ea   : > { %2186 = vmatprep.subr.bf16.mxu0 %v3036_v11  ;;  %v2303_v11 = vld [vmem:[%s3694_s0 + $0x10] sm:$0xff] (!%p2657_p12) }
 0x2ec   : > { %v1450_v17 = vpop.f32.mrb[4].mxu1 }
 0x2ed   : > { %v2715_v18 = vadd.f32 %v1450_v17, %v798_v13  ;;  %v1452_v43 = vpop.f32.mrb[5].mxu1  ;;  %2187 = vmatpush1.bf16.msra.mxu0 %v3034_v14 }
 0x2ee   : > { %v2716_v19 = vadd.f32 %v1452_v43, %v802_v15  ;;  %v1454_v20 = vpop.f32.mrb[6].mxu1  ;;  %2188 = vmatprep.subr.bf16.mxu0 %v3041_v16 }
 0x2ef   : > { %v2717_v22 = vadd.f32 %v1454_v20, %v798_v13  ;;  %v1456_v23 = vpop.f32.mrb[7].mxu1  ;;  %v1461_v26 = vmax.f32 %v2715_v18, 0.0  ;;  %v2332_v13 = vrot.slane (!%p2657_p12), %v2319_v0, %v797_v4 }
 0x2f0   : > { %v2718_v25 = vadd.f32 %v1456_v23, %v802_v15  ;;  %v1462_v28 = vmax.f32 %v2716_v19, 0.0 }
 0x2f1   : > { %v1465_v27 = vmax.f32 %v2717_v22, 0.0  ;;  %2189 = vmatpush1.bf16.msra.mxu0 %v3039_v21 }
 0x2f2   : > { %v1466_v29 = vmax.f32 %v2718_v25, 0.0  ;;  %2190 = vmatprep.subr.bf16.mxu0 %v3046_v24 }
 0x2f3   : > { %v1475_v30 = vpack.c.bf16 %v1465_v27, %v1461_v26 }
 0x2f4   : > { %v1476_v31 = vpack.c.bf16 %v1466_v29, %v1462_v28 }
 0x2f5   : > { %2191 = vmatpush1.bf16.msra.mxu0 %v3044_v7 }
 0x2f6   : > { %2192 = vmatprep.mubr.bf16.mxu0 %v1476_v31  ;;  %2276 = vmatprep.mubr.bf16.mxu1 %v1476_v31 }
 0x2f7   : > { %2277 = vmatmul.mubr.bf16.vlgmr.msra.gmra.mrb[12].mxu1 %v1475_v30 }
 0x2f8   : > { %2193 = vmatmul.mubr.bf16.vlgmr.msra.gmra.mrb[4].mxu0 %v1475_v30 }
 0x38b   : > { %v2679_v32 = vpop.f32.mrb[8].mxu1 }
 0x38c   : > { %v2680_v33 = vpop.f32.mrb[9].mxu1 }
 0x38d   : > { %v2681_v34 = vadd.f32 %v2680_v33, %v2679_v32  ;;  %v2682_v35 = vpop.f32.mrb[10].mxu1 }
 0x38e   : > { %v2683_v36 = vpop.f32.mrb[11].mxu1 }
 0x38f   : > { %v2684_v37 = vadd.f32 %v2683_v36, %v2682_v35 }
 0x3ca   : > { %v2701_v39 = vpop.f32.mrb[12].mxu1 }
 0x3cb   : > { %v2194_v41 = vpop.f32.mrb[4].mxu0  ;;  %v2702_v12 = vpop.f32.mrb[13].mxu1 }
 0x3cc   : > { %v2285_v44 = vadd.f32 %v2194_v41, %v1467_v38  ;;  %v2703_v45 = vadd.f32 %v2702_v12, %v2701_v39  ;;  %v2196_v46 = vpop.f32.mrb[5].mxu0  ;;  %v2704_v47 = vpop.f32.mrb[14].mxu1 }
 0x3cd   : > { %v2286_v50 = vadd.f32 %v2196_v46, %v1468_v40  ;;  %v2198_v51 = vpop.f32.mrb[6].mxu0  ;;  %v2705_v52 = vpop.f32.mrb[15].mxu1 }
 0x3ce   : > { %2291 = vst [vmem:[#allocation2] sm:$0xff] %v2285_v44  ;;  %v2279_v53 = vadd.f32 %v2703_v45, %v2681_v34  ;;  %v2288_v54 = vadd.f32 %v2198_v51, %v1470_v42  ;;  %v2706_v55 = vadd.f32 %v2705_v52, %v2704_v47  ;;  %v2200_v56 = vpop.f32.mrb[7].mxu0  ;;  %2300 = sbr.rel (%p2657_p12) target bundleno = 993 (0x3e1), region = 79 }
 0x3cf   : > { %2292 = vst [vmem:[#allocation2 + $0x8] sm:$0xff] %v2286_v50  ;;  %v2289_v58 = vadd.f32 %v2200_v56, %v1471_v48 }
 0x3d0   : > { %v2287_v59 = vadd.f32 %v2279_v53, %v1469_v49  ;;  %2294 = vst [vmem:[#allocation2 + $0x18] sm:$0xff] %v2288_v54  ;;  %v2282_v60 = vadd.f32 %v2706_v55, %v2684_v37 }
 0x3d1   : > { %2295 = vst [vmem:[#allocation2 + $0x20] sm:$0xff] %v2289_v58 }
 0x3d2   : > { %2293 = vst [vmem:[#allocation2 + $0x10] sm:$0xff] %v2287_v59  ;;  %v2290_v61 = vadd.f32 %v2282_v60, %v1472_v57 }
 0x3d4   : > { %2296 = vst [vmem:[#allocation2 + $0x28] sm:$0xff] %v2290_v61 }
 0x3d5   : > { %v2307_v63 = vld [vmem:[#allocation2] sm:$0xff] }
 0x3d6   : > { %v2313_v1 = vadd.f32 %v2307_v63, %v2301_v62  ;;  %v2308_v9 = vld [vmem:[#allocation2 + $0x8] sm:$0xff] }
 0x3d7   : > { %v2314_v14 = vadd.f32 %v2308_v9, %v2302_v3  ;;  %v2310_v16 = vld [vmem:[#allocation2 + $0x18] sm:$0xff] }
 0x3d8   : > { %v2336_v17 = vadd.f32 %v2324_v2, %v2313_v1  ;;  %v2316_v43 = vadd.f32 %v2310_v16, %v2304_v6  ;;  %v2311_v19 = vld [vmem:[#allocation2 + $0x20] sm:$0xff] }
 0x3d9   : > { %v2309_v15 = vld [vmem:[#allocation2 + $0x10] sm:$0xff]  ;;  %v2337_v4 = vadd.f32 %v2328_v10, %v2314_v14  ;;  %v2317_v20 = vadd.f32 %v2311_v19, %v2305_v8 }
 0x3da   : > { %v2315_v18 = vadd.f32 %v2309_v15, %v2303_v11  ;;  %2342 = vst [vmem:[%s3701_s7] sm:$0xff] %v2336_v17  ;;  %v2339_v23 = vadd.f32 %v2324_v2, %v2316_v43 }
 0x3db   : > { %v2312_v21 = vld [vmem:[#allocation2 + $0x28] sm:$0xff]  ;;  %2343 = vst [vmem:[%s3701_s7 + $0x8] sm:$0xff] %v2337_v4  ;;  %v2340_v25 = vadd.f32 %v2328_v10, %v2317_v20 }
 0x3dc   : > { %v2338_v22 = vadd.f32 %v2332_v13, %v2315_v18  ;;  %v2318_v24 = vadd.f32 %v2312_v21, %v2306_v5  ;;  %2345 = vst [vmem:[%s3701_s7 + $0x18] sm:$0xff] %v2339_v23 }
 0x3dd   : > { %2346 = vst [vmem:[%s3701_s7 + $0x20] sm:$0xff] %v2340_v25 }
 0x3de   : > { %2344 = vst [vmem:[%s3701_s7 + $0x10] sm:$0xff] %v2338_v22  ;;  %v2341_v26 = vadd.f32 %v2332_v13, %v2318_v24 }
 0x3e0   : > { %2347 = vst [vmem:[%s3701_s7 + $0x28] sm:$0xff] %v2341_v26 }
 0x3e1 PF: > { %s17_s28 = sadd.s32 1, %s3086_s28   ;;  %s3702_s24 = smov %s3074_s25 }
 0x3e2   : > { %p14_p13 = scmp.ge.s32.totalorder %s17_s28, 5   ;;  %s3703_s25 = smov %s3165_s9 }
 0x3e3   : > { %s3704_s26 = smov %s3082_s27  ;;  %s3705_s27 = smov %s3707_s29 }
 0x3e4   :  { %16 = sbr.rel (!%p14_p13) target bundleno = 3 (0x3), region = 123 }

// kernel: bigram_lm_forward.25
= control target key start
LH: loop header
LB: loop body
LE: loop exit
PB: predicated region body
PF: predicated region fallthrough
CT: control target
= control target key end

     0   :  { %s737_s0 = inlined_call_operand.vmem [shape: f32[16,384], index: 0, kind: input, shape index: {}]   ;;  %s738_s1 = inlined_call_operand.vmem [shape: f32[1,384], index: 1, kind: input, shape index: {}]   ;;  %s739_s2 = inlined_call_operand.vmem [shape: f32[1,384], index: 2, kind: input, shape index: {}]   ;;  %s740_s3 = inlined_call_operand.vmem [shape: bf16[384,128], index: 3, kind: input, shape index: {}]   ;;  %s741_s4 = inlined_call_operand.vmem [shape: f32[1,128], index: 4, kind: input, shape index: {}]   ;;  %s742_s5 = inlined_call_operand.hbm [shape: f32[16,128], index: 5, kind: output, shape index: {}]  }
   0x1   :  { %v22_v0 = vld [vmem:[%s737_s0] sm:$0xff]  ;;  %v23_v1 = vld [vmem:[%s737_s0 + $0x8] sm:$0xff]  ;;  %v24_v2 = vld [vmem:[%s737_s0 + $0x10] sm:$0xff] }
   0x2   :  { %v30_v3 = vadd.f32 %v23_v1, %v22_v0  ;;  %v25_v4 = vld [vmem:[%s737_s0 + $0x18] sm:$0xff]  ;;  %v26_v5 = vld [vmem:[%s737_s0 + $0x20] sm:$0xff]  ;;  %v27_v6 = vld [vmem:[%s737_s0 + $0x28] sm:$0xff] }
   0x3   :  { %v34_v7 = vadd.f32 %v26_v5, %v25_v4 }
   0x4   :  { %v31_v8 = vadd.f32 %v30_v3, %v24_v2 }
   0x5   :  { %v35_v9 = vadd.f32 %v34_v7, %v27_v6 }
   0x6   :  { %32 = vadd.xlane.f32.xlu0 %v31_v8 }
   0xa   :  { %36 = vadd.xlane.f32.xlu0 %v35_v9 }
   0xb   :  { %10 = vsyncpa [#allocation3], 0  ;;  %v500_v10 = vld [vmem:[%s740_s3 + $0x40] sm:$0xff]   ;;  %v552_v13 = vmov 0.0   ;;  %v503_v34 = vld [vmem:[%s740_s3 + $0x48] sm:$0xff]   ;;  %vm553_vm0 = vmmov 0   ;;  %v74_v59 = vlaneseq }
   0xc   :  { %v501_v11 = vld [vmem:[%s740_s3 + $0x80] sm:$0xff]   ;;  %475 = vmatprep.subr.bf16.mxu1 %v552_v13  ;;  %444 = vmatprep.subr.bf16.mxu0 %v500_v10  ;;  %v504_v35 = vld [vmem:[%s740_s3 + $0x88] sm:$0xff]   ;;  %v506_v37 = vld [vmem:[%s740_s3 + $0x50] sm:$0xff]   ;;  %s554_s29 = smov [#allocation2]  }
   0xd   :  { %v502_v12 = vld [vmem:[%s740_s3] sm:$0xff]   ;;  %476 = vmatpush3.bf16.msra.mxu1 %v501_v11  ;;  %v505_v36 = vld [vmem:[%s740_s3 + $0x8] sm:$0xff]   ;;  %v507_v38 = vld [vmem:[%s740_s3 + $0x90] sm:$0xff]   ;;  %491 = vmatprep.mubr.msk.bf16.mxu1 %vm553_vm0, %v552_v13  ;;  %v75_v62 = vshrl.u32 %v74_v59, 7  ;;  %s408_s30 = sshll.u32 %s554_s29, 4  ;;  %s409_s30 = int_to_ptr.vmem [resolvable:$true] %s408_s30 }
   0xe   :  { %445 = vmatpush3.bf16.msra.mxu0 %v502_v12  ;;  %477 = vmatprep.subr.bf16.mxu1 %v552_v13  ;;  %v508_v39 = vld [vmem:[%s740_s3 + $0x10] sm:$0xff]   ;;  %v509_v40 = vld [vmem:[%s740_s3 + $0x58] sm:$0xff]   ;;  %v512_v43 = vld [vmem:[%s740_s3 + $0x60] sm:$0xff]   ;;  %s528_s6 = scalar_lea.vmem %s409_s30, 256  ;;  %p533_p1 = scmp.lt.s32.totalorder %s409_s30, %s409_s30 }
   0xf   :  { %446 = vmatprep.subr.bf16.mxu0 %v503_v34  ;;  %v510_v41 = vld [vmem:[%s740_s3 + $0x98] sm:$0xff]   ;;  %v513_v44 = vld [vmem:[%s740_s3 + $0xa0] sm:$0xff]   ;;  %v515_v46 = vld [vmem:[%s740_s3 + $0x68] sm:$0xff]   ;;  %v80_v63 = vsub.s32 1, %v75_v62  ;;  %p529_p0 = scmp.ne.s32.totalorder %s409_s30, %s528_s6  ;;  %p534_p2 = scmp.lt.s32.totalorder %s528_s6, %s528_s6 }
  0x10   :  { %v511_v42 = vld [vmem:[%s740_s3 + $0x18] sm:$0xff]   ;;  %v514_v45 = vld [vmem:[%s740_s3 + $0x20] sm:$0xff]   ;;  %v516_v47 = vld [vmem:[%s740_s3 + $0xa8] sm:$0xff]  }
  0x11   :  { %478 = vmatpush3.bf16.msra.mxu1 %v504_v35  ;;  %v517_v48 = vld [vmem:[%s740_s3 + $0x28] sm:$0xff]   ;;  %v518_v49 = vld [vmem:[%s740_s3 + $0x70] sm:$0xff]   ;;  %v521_v52 = vld [vmem:[%s740_s3 + $0x78] sm:$0xff]   ;;  %p535_p3 = por %p534_p2, %p533_p1 }
  0x12   :  { %447 = vmatpush3.bf16.msra.mxu0 %v505_v36  ;;  %479 = vmatprep.subr.bf16.mxu1 %v552_v13  ;;  %v519_v50 = vld [vmem:[%s740_s3 + $0xb0] sm:$0xff]   ;;  %v522_v53 = vld [vmem:[%s740_s3 + $0xb8] sm:$0xff]   ;;  %v419_v36 = vld [vmem:[%s741_s4] ss:$0 sm:$0xff] }
  0x13   :  { %448 = vmatprep.subr.bf16.mxu0 %v506_v37  ;;  %v520_v51 = vld [vmem:[%s740_s3 + $0x30] sm:$0xff]   ;;  %v523_v54 = vld [vmem:[%s740_s3 + $0x38] sm:$0xff]   ;;  %p536_p4 = pnand %p535_p3, %p529_p0 }
  0x15   :  { %480 = vmatpush3.bf16.msra.mxu1 %v507_v38 }
  0x16   :  { %449 = vmatpush3.bf16.msra.mxu0 %v508_v39  ;;  %481 = vmatprep.subr.bf16.mxu1 %v552_v13 }
  0x17   :  { %450 = vmatprep.subr.bf16.mxu0 %v509_v40 }
  0x19   :  { %482 = vmatpush3.bf16.msra.mxu1 %v510_v41 }
  0x1a   :  { %451 = vmatpush3.bf16.msra.mxu0 %v511_v42  ;;  %483 = vmatprep.subr.bf16.mxu1 %v552_v13 }
  0x1b   :  { %452 = vmatprep.subr.bf16.mxu0 %v512_v43 }
  0x1d   :  { %484 = vmatpush3.bf16.msra.mxu1 %v513_v44 }
  0x1e   :  { %453 = vmatpush3.bf16.msra.mxu0 %v514_v45  ;;  %485 = vmatprep.subr.bf16.mxu1 %v552_v13 }
  0x1f   :  { %454 = vmatprep.subr.bf16.mxu0 %v515_v46 }
  0x21   :  { %486 = vmatpush3.bf16.msra.mxu1 %v516_v47 }
  0x22   :  { %455 = vmatpush3.bf16.msra.mxu0 %v517_v48  ;;  %487 = vmatprep.subr.bf16.mxu1 %v552_v13 }
  0x23   :  { %456 = vmatprep.subr.bf16.mxu0 %v518_v49 }
  0x25   :  { %488 = vmatpush3.bf16.msra.mxu1 %v519_v50 }
  0x26   :  { %457 = vmatpush3.bf16.msra.mxu0 %v520_v51  ;;  %489 = vmatprep.subr.bf16.mxu1 %v552_v13 }
  0x27   :  { %458 = vmatprep.subr.bf16.mxu0 %v521_v52 }
  0x29   :  { %490 = vmatpush3.bf16.msra.mxu1 %v522_v53 }
  0x2a   :  { %459 = vmatpush3.bf16.msra.mxu0 %v523_v54 }
  0x93   :  { %v33_v14 = vpop.xlane.xlu0 %32 }
  0x94   :  { %v39_v15 = vmul.f32 0.0026041667, %v33_v14 }
  0x96   :  { %v616_v16 = vsub.f32 %v22_v0, %v39_v15  ;;  %v618_v17 = vsub.f32 %v23_v1, %v39_v15  ;;  %v620_v18 = vsub.f32 %v24_v2, %v39_v15  ;;  %v84_v0 = vsub.s32 2, %v75_v62  ;;  %v28_v1 = vld [vmem:[%s738_s1] sm:$0x7] }
  0x97   :  { %v37_v19 = vpop.xlane.xlu0 %36  ;;  %v76_v2 = vsub.s32 0, %v75_v62 }
  0x98   :  { %v40_v20 = vmul.f32 0.0026041667, %v37_v19  ;;  %v47_v21 = vmul.f32 %v616_v16, %v616_v16  ;;  %v48_v22 = vmul.f32 %v618_v17, %v618_v17  ;;  %v49_v23 = vmul.f32 %v620_v18, %v620_v18 }
  0x99   :  { %v85_v8 = vrot.slane %v28_v1, %v84_v0  ;;  %v77_v10 = vrot.slane %v28_v1, %v76_v2 }
  0x9a   :  { %v628_v24 = vsub.f32 %v25_v4, %v40_v20  ;;  %v630_v25 = vsub.f32 %v26_v5, %v40_v20  ;;  %v632_v26 = vsub.f32 %v27_v6, %v40_v20  ;;  %v53_v27 = vadd.f32 %v48_v22, %v47_v21  ;;  %v29_v4 = vld [vmem:[%s739_s2] sm:$0x7] }
  0x9b   :  { %v81_v6 = vrot.slane %v28_v1, %v80_v63  ;;  %v103_v12 = vrot.slane %v29_v4, %v80_v63  ;;  %v107_v13 = vrot.slane %v29_v4, %v84_v0 }
  0x9c   :  { %v54_v28 = vadd.f32 %v53_v27, %v49_v23  ;;  %v50_v29 = vmul.f32 %v628_v24, %v628_v24  ;;  %v51_v30 = vmul.f32 %v630_v25, %v630_v25  ;;  %v52_v31 = vmul.f32 %v632_v26, %v632_v26 }
  0x9e   :  { %55 = vadd.xlane.f32.xlu1 %v54_v28  ;;  %v57_v32 = vadd.f32 %v51_v30, %v50_v29 }
  0xa0   :  { %v58_v33 = vadd.f32 %v57_v32, %v52_v31 }
  0xa2   :  { %59 = vadd.xlane.f32.xlu1 %v58_v33 }
 0x12b   :  { %v56_v55 = vpop.xlane.xlu1 %55 }
 0x12c   :  { %v61_v56 = vmul.f32 0.0026041667, %v56_v55 }
 0x12e   :  { %v63_v57 = vadd.f32 1e-05, %v61_v56 }
 0x12f   :  { %v60_v58 = vpop.xlane.xlu1 %59 }
 0x130   :  { %524 = vrsqrt.f32 %v63_v57  ;;  %v62_v60 = vmul.f32 0.0026041667, %v60_v58 }
 0x132   :  { %v64_v61 = vadd.f32 1e-05, %v62_v60 }
 0x134   :  { %526 = vrsqrt.f32 %v64_v61 }
 0x13a   :  { %v525_v3 = vpop.eup %524 }
 0x13b   :  { %v68_v5 = vmul.f32 %v525_v3, %v618_v17  ;;  %v69_v7 = vmul.f32 %v525_v3, %v620_v18  ;;  %v67_v9 = vmul.f32 %v525_v3, %v616_v16  ;;  %v99_v17 = vrot.slane %v29_v4, %v76_v2 }
 0x13d   :  { %v90_v15 = vmul.f32 %v81_v6, %v68_v5  ;;  %v91_v20 = vmul.f32 %v85_v8, %v69_v7  ;;  %v89_v22 = vmul.f32 %v77_v10, %v67_v9 }
 0x13e   :  { %v527_v11 = vpop.eup %526 }
 0x13f   :  { %v71_v14 = vmul.f32 %v527_v11, %v630_v25  ;;  %v72_v19 = vmul.f32 %v527_v11, %v632_v26  ;;  %v70_v21 = vmul.f32 %v527_v11, %v628_v24  ;;  %v112_v28 = vadd.f32 %v103_v12, %v90_v15 }
 0x140   :  { %v113_v16 = vadd.f32 %v107_v13, %v91_v20  ;;  %v111_v31 = vadd.f32 %v99_v17, %v89_v22 }
 0x141   :  { %v93_v23 = vmul.f32 %v81_v6, %v71_v14  ;;  %v94_v27 = vmul.f32 %v85_v8, %v72_v19  ;;  %v92_v18 = vmul.f32 %v77_v10, %v70_v21 }
 0x143   :  { %v115_v29 = vadd.f32 %v103_v12, %v93_v23  ;;  %v116_v30 = vadd.f32 %v107_v13, %v94_v27  ;;  %v114_v32 = vadd.f32 %v99_v17, %v92_v18 }
 0x145   :  { %v118_v33 = vpack.c.bf16 %v115_v29, %v112_v28  ;;  %v119_v34 = vpack.c.bf16 %v116_v30, %v113_v16  ;;  %v117_v25 = vpack.c.bf16 %v114_v32, %v111_v31 }
 0x147   :  { %351 = vmatprep.mubr.bf16.mxu0 %v118_v33  ;;  %492 = vmatmul.mubr.bf16.vlgmr.msra.gmra.mrb[0].mxu1 %v119_v34 }
 0x148   :  { %352 = vmatmul.mubr.bf16.vlgmr.msra.gmra.mrb[0].mxu0 %v117_v25 }
 0x21a   :  { %v394_v26 = vpop.f32.mrb[0].mxu1 }
 0x21b   :  { %v460_v35 = vpop.f32.mrb[0].mxu0  ;;  %v493_v24 = vpop.f32.mrb[1].mxu1 }
 0x21c   :  { %v461_v37 = vpop.f32.mrb[1].mxu0  ;;  %v397_v38 = vpop.f32.mrb[2].mxu1 }
 0x21d   :  { %v462_v39 = vadd.f32 %v461_v37, %v460_v35  ;;  %v463_v40 = vpop.f32.mrb[2].mxu0  ;;  %v494_v41 = vpop.f32.mrb[3].mxu1 }
 0x21e   :  { %v464_v42 = vpop.f32.mrb[3].mxu0 }
 0x21f   :  { %v354_v43 = vadd.f32 %v462_v39, %v419_v36  ;;  %v465_v44 = vadd.f32 %v464_v42, %v463_v40 }
 0x221   :  { %v395_v45 = vadd.f32 %v394_v26, %v354_v43  ;;  %v357_v46 = vadd.f32 %v465_v44, %v419_v36 }
 0x223   :  { %401 = vst [vmem:[#allocation2] sm:$0xff] %v395_v45  ;;  %v398_v47 = vadd.f32 %v397_v38, %v357_v46 }
 0x225   :  { %402 = vst [vmem:[#allocation2 + $0x8] sm:$0xff] %v398_v47 }
 0x226   :  { %539 = shalt.err (!%p536_p4)
}
 0x227   :  { %s540_s8 = scalar_lea.hbm %s742_s5, 256 }
 0x228   :  { %p541_p5 = scmp.ne.s32.totalorder %s742_s5, %s540_s8  ;;  %p544_p6 = scmp.lt.u32.totalorder %s540_s8, %s742_s5 }
 0x22a   :  { %p546_p7 = pnand %p544_p6, %p541_p5 }
 0x22c   :  { %549 = shalt.err (!%p546_p7)
}
 0x22d   :  { %s555_s12 = smov 128   ;;  %s556_s13 = smov 8  }
 0x22e   :  { %414 = dma.vmem_to_hbm [thread:$0]  %s409_s30, 256, %s742_s5, [#allocation3], %s555_s12, %s555_s12, %s556_s13  }
 0x22f   :  { %550 = dma.done.wait [#allocation3], 256  }
 0x230   :  { %551 = vsyncadd [#allocation3], 4294967040 }
 0x231   :  { %418 = vsyncpa [#allocation3], 1 }

// kernel: bigram_lm_forward.13
= control target key start
LH: loop header
LB: loop body
LE: loop exit
PB: predicated region body
PF: predicated region fallthrough
CT: control target
= control target key end

     0   :  { %s5231_s27 = smov 0   ;;  %s6468_s0 = inlined_call_operand.vmem [shape: f32[2,8,384], index: 0, kind: input, shape index: {}]   ;;  %s6469_s1 = inlined_call_operand.vmem [shape: f32[1,384], index: 1, kind: input, shape index: {}]   ;;  %s6470_s2 = inlined_call_operand.vmem [shape: f32[1,384], index: 2, kind: input, shape index: {}]   ;;  %s6471_s3 = inlined_call_operand.vmem [shape: bf16[384,384], index: 3, kind: input, shape index: {}]   ;;  %s6472_s4 = inlined_call_operand.vmem [shape: bf16[384,384], index: 4, kind: input, shape index: {}]   ;;  %s6473_s5 = inlined_call_operand.vmem [shape: bf16[384,384], index: 5, kind: input, shape index: {}]   ;;  %s6474_s6 = inlined_call_operand.vmem [shape: bf16[384,384], index: 6, kind: input, shape index: {}]   ;;  %s6475_s7 = inlined_call_operand.vmem [shape: f32[1,384], index: 7, kind: input, shape index: {}]   ;;  %s6476_s8 = inlined_call_operand.vmem [shape: f32[2,8,384], index: 8, kind: output, shape index: {}]  }
   0x1 LB: > { %s4064_s28 = sadd.s32 4294967295, %s5180_s27   ;;  %p4068_p0 = scmp.ge.s32.totalorder %s5180_s27, 1  ;;  %s5180_s27 = sphi %s5231_s27, %s18_s27  }
   0x2   : > { %p262_p1 = scmp.lt.s32.totalorder %s5180_s27, 3 }
   0x4   : > { %p263_p2 = pnand %p4068_p0, %p262_p1 }
   0x5   : > { %p296_p3 = scmp.lt.s32.totalorder (!%p263_p2), %s4064_s28, 1  ;;  %v4761_v5 = vld [vmem:[%s6471_s3 + $0x4] ss:$12 sps:$4 sm:$0xff] (!%p263_p2)   ;;  %v4763_v6 = vld [vmem:[%s6471_s3] ss:$12 sps:$4 sm:$0xff] (!%p263_p2)   ;;  %vm5184_vm0 = vmmov (!%p263_p2), 0  }
   0x6   : > { %266 = sbr.rel (%p263_p2) target bundleno = 5227 (0x146b), region = 52  ;;  %v4764_v7 = vld [vmem:[%s6471_s3 + $0x1c] ss:$12 sps:$4 sm:$0xff] (!%p263_p2)   ;;  %855 = vmatprep.subr.bf16.mxu0 (!%p263_p2), %v4761_v5  ;;  %v4766_v8 = vld [vmem:[%s6471_s3 + $0x18] ss:$12 sps:$4 sm:$0xff] (!%p263_p2)   ;;  %vm2309_vm1 = vcmask (!%p263_p2), 523264  }
   0x7   : > { %856 = vmatpush1.bf16.msra.mxu0 (!%p263_p2), %v4763_v6  ;;  %v4767_v9 = vld [vmem:[%s6471_s3 + $0x34] ss:$12 sps:$4 sm:$0xff] (!%p263_p2)   ;;  %v4769_v12 = vld [vmem:[%s6471_s3 + $0x30] ss:$12 sps:$4 sm:$0xff] (!%p263_p2)   ;;  %v4770_v13 = vld [vmem:[%s6471_s3 + $0x4c] ss:$12 sps:$4 sm:$0xff] (!%p263_p2)  }
   0x8   : > { %857 = vmatprep.subr.bf16.mxu0 (!%p263_p2), %v4764_v7  ;;  %v4787_v10 = vld [vmem:[%s6471_s3 + $0xc8] ss:$12 sps:$4 sm:$0xff] (!%p263_p2)   ;;  %v4792_v14 = vld [vmem:[%s6471_s3 + $0xe0] ss:$12 sps:$4 sm:$0xff] (!%p263_p2)   ;;  %v4797_v16 = vld [vmem:[%s6471_s3 + $0xf8] ss:$12 sps:$4 sm:$0xff] (!%p263_p2)  }
   0x9   : > { %v4789_v11 = vld [vmem:[%s6471_s3 + $0x8] ss:$12 sps:$4 sm:$0xff] (!%p263_p2)   ;;  %4385 = vmatprep.subr.bf16.mxu1 (!%p263_p2), %v4787_v10  ;;  %v4794_v15 = vld [vmem:[%s6471_s3 + $0x20] ss:$12 sps:$4 sm:$0xff] (!%p263_p2)   ;;  %v4773_v18 = vld [vmem:[%s6471_s3 + $0x64] ss:$12 sps:$4 sm:$0xff] (!%p263_p2)  }
   0xa   : > { %4386 = vmatpush3.bf16.msra.mxu1 (!%p263_p2), %v4789_v11  ;;  %v4772_v17 = vld [vmem:[%s6471_s3 + $0x48] ss:$12 sps:$4 sm:$0xff] (!%p263_p2)   ;;  %v4775_v19 = vld [vmem:[%s6471_s3 + $0x60] ss:$12 sps:$4 sm:$0xff] (!%p263_p2)   ;;  %v4778_v21 = vld [vmem:[%s6471_s3 + $0x78] ss:$12 sps:$4 sm:$0xff] (!%p263_p2)  }
   0xb   : > { %858 = vmatpush1.bf16.msra.mxu0 (!%p263_p2), %v4766_v8  ;;  %4387 = vmatprep.subr.bf16.mxu1 (!%p263_p2), %v4792_v14  ;;  %v4776_v20 = vld [vmem:[%s6471_s3 + $0x7c] ss:$12 sps:$4 sm:$0xff] (!%p263_p2)   ;;  %v4779_v22 = vld [vmem:[%s6471_s3 + $0x94] ss:$12 sps:$4 sm:$0xff] (!%p263_p2)   ;;  %v4782_v24 = vld [vmem:[%s6471_s3 + $0xac] ss:$12 sps:$4 sm:$0xff] (!%p263_p2)  }
   0xc   : > { %859 = vmatprep.subr.bf16.mxu0 (!%p263_p2), %v4767_v9  ;;  %v4781_v23 = vld [vmem:[%s6471_s3 + $0x90] ss:$12 sps:$4 sm:$0xff] (!%p263_p2)   ;;  %v4784_v25 = vld [vmem:[%s6471_s3 + $0xa8] ss:$12 sps:$4 sm:$0xff] (!%p263_p2)   ;;  %v4788_v27 = vld [vmem:[%s6471_s3 + $0xc0] ss:$12 sps:$4 sm:$0xff] (!%p263_p2)  }
   0xd   : > { %s6480_s28 = smov (!%p296_p3, %s4064_s28), 1  ;;  %v4785_v26 = vld [vmem:[%s6471_s3 + $0xc4] ss:$12 sps:$4 sm:$0xff]   ;;  %v4790_v28 = vld [vmem:[%s6471_s3 + $0xdc] ss:$12 sps:$4 sm:$0xff]   ;;  %s5185_s15 = smov 64  }
   0xe   : > { %s4748_s29 = smul.u32 24, %s6480_s28  ;;  %4388 = vmatpush3.bf16.msra.mxu1 %v4794_v15  ;;  %v4793_v29 = vld [vmem:[%s6471_s3 + $0xd8] ss:$12 sps:$4 sm:$0xff]   ;;  %v4795_v30 = vld [vmem:[%s6471_s3 + $0xf4] ss:$12 sps:$4 sm:$0xff]   ;;  %vm2374_vm2 = vcmask 1043456  }
   0xf   : > { %860 = vmatpush1.bf16.msra.mxu0 %v4769_v12  ;;  %4389 = vmatprep.subr.bf16.mxu1 %v4797_v16  ;;  %v4798_v41 = vld [vmem:[%s6471_s3 + $0xf0] ss:$12 sps:$4 sm:$0xff]   ;;  %v4799_v42 = vld [vmem:[%s6471_s3 + $0x38] ss:$12 sps:$4 sm:$0xff]   ;;  %v4803_v45 = vld [vmem:[%s6471_s3 + $0x108] ss:$12 sps:$4 sm:$0xff]  }
  0x10   : > { %s5247_s10 = scalar_lea.vmem %s6468_s0, %s4748_s29  ;;  %861 = vmatprep.subr.bf16.mxu0 %v4770_v13  ;;  %v4800_v43 = vld [vmem:[%s6471_s3 + $0x10c] ss:$12 sps:$4 sm:$0xff]   ;;  %v4802_v44 = vld [vmem:[%s6471_s3 + $0x110] ss:$12 sps:$4 sm:$0xff]   ;;  %v4807_v48 = vld [vmem:[%s6471_s3 + $0x128] ss:$12 sps:$4 sm:$0xff]   ;;  %s305_s26 = scalar_lea.vmem %s6476_s8, %s4748_s29 }
  0x11   : > { %v307_v0 = vld [vmem:[%s5247_s10] sm:$0xff]  ;;  %v308_v1 = vld [vmem:[%s5247_s10 + $0x8] sm:$0xff]  ;;  %v309_v2 = vld [vmem:[%s5247_s10 + $0x10] sm:$0xff]  ;;  %vm2358_vm4 = vcmask 64512  }
  0x12   : > { %v312_v3 = vadd.f32 %v308_v1, %v307_v0  ;;  %4390 = vmatpush3.bf16.msra.mxu1 %v4799_v42  ;;  %v4804_v46 = vld [vmem:[%s6471_s3 + $0x50] ss:$12 sps:$4 sm:$0xff]   ;;  %v4808_v49 = vld [vmem:[%s6471_s3 + $0x120] ss:$12 sps:$4 sm:$0xff]   ;;  %v4809_v50 = vld [vmem:[%s6471_s3 + $0x68] ss:$12 sps:$4 sm:$0xff]  }
  0x13   : > { %862 = vmatpush1.bf16.msra.mxu0 %v4772_v17  ;;  %4391 = vmatprep.subr.bf16.mxu1 %v4802_v44  ;;  %v4805_v47 = vld [vmem:[%s6471_s3 + $0x124] ss:$12 sps:$4 sm:$0xff]   ;;  %v4810_v51 = vld [vmem:[%s6471_s3 + $0x13c] ss:$12 sps:$4 sm:$0xff]   ;;  %v4812_v52 = vld [vmem:[%s6471_s3 + $0x140] ss:$12 sps:$4 sm:$0xff]  }
  0x14   : > { %v313_v4 = vadd.f32 %v312_v3, %v309_v2  ;;  %863 = vmatprep.subr.bf16.mxu0 %v4773_v18  ;;  %v4813_v53 = vld [vmem:[%s6471_s3 + $0x138] ss:$12 sps:$4 sm:$0xff]   ;;  %v4814_v54 = vld [vmem:[%s6471_s3 + $0x80] ss:$12 sps:$4 sm:$0xff]   ;;  %v4818_v57 = vld [vmem:[%s6471_s3 + $0x150] ss:$12 sps:$4 sm:$0xff]   ;;  %v335_v3 = vlaneseq }
  0x15   : > { %v4815_v55 = vld [vmem:[%s6471_s3 + $0x154] ss:$12 sps:$4 sm:$0xff]   ;;  %v4817_v56 = vld [vmem:[%s6471_s3 + $0x158] ss:$12 sps:$4 sm:$0xff]   ;;  %v4822_v60 = vld [vmem:[%s6471_s3 + $0x170] ss:$12 sps:$4 sm:$0xff]  }
  0x16   : > { %314 = vadd.xlane.f32.xlu0 %v313_v4  ;;  %4392 = vmatpush3.bf16.msra.mxu1 %v4804_v46  ;;  %v4819_v58 = vld [vmem:[%s6471_s3 + $0x98] ss:$12 sps:$4 sm:$0xff]   ;;  %v4823_v61 = vld [vmem:[%s6471_s3 + $0x168] ss:$12 sps:$4 sm:$0xff]   ;;  %v4824_v62 = vld [vmem:[%s6471_s3 + $0xb0] ss:$12 sps:$4 sm:$0xff]  }
  0x17   : > { %864 = vmatpush1.bf16.msra.mxu0 %v4775_v19  ;;  %4393 = vmatprep.subr.bf16.mxu1 %v4807_v48  ;;  %v4820_v59 = vld [vmem:[%s6471_s3 + $0x16c] ss:$12 sps:$4 sm:$0xff]   ;;  %v4827_v63 = vld [vmem:[%s6471_s3 + $0x184] ss:$12 sps:$4 sm:$0xff]   ;;  %v5413_v5 = vshrl.u32 %v335_v3, 7 }
  0x18   : > { %865 = vmatprep.subr.bf16.mxu0 %v4776_v20  ;;  %v5424_v8 = vld [vmem:[%s6469_s1] sm:$0x7]  ;;  %v4849_v46 = vld [vmem:[%s6471_s3 + $0x210] ss:$12 sps:$4 sm:$0xff]  }
  0x19   : > { %v5416_v6 = vsub.s32 1, %v5413_v5  ;;  %v5419_v7 = vsub.s32 0, %v5413_v5  ;;  %v5429_v9 = vld [vmem:[%s6470_s2] sm:$0x7] }
  0x1a   : > { %4394 = vmatpush3.bf16.msra.mxu1 %v4809_v50  ;;  %v4848_v42 = vld [vmem:[%s6471_s3 + $0x200] ss:$12 sps:$4 sm:$0xff]   ;;  %v4853_v50 = vld [vmem:[%s6471_s3 + $0x228] ss:$12 sps:$4 sm:$0xff]  }
  0x1b   : > { %866 = vmatpush1.bf16.msra.mxu0 %v4778_v21  ;;  %4395 = vmatprep.subr.bf16.mxu1 %v4812_v52  ;;  %v342_v10 = vrot.slane %v5424_v8, %v5416_v6  ;;  %v338_v11 = vrot.slane %v5424_v8, %v5419_v7  ;;  %v361_v14 = vrot.slane %v5429_v9, %v5416_v6 }
  0x1c   : > { %867 = vmatprep.subr.bf16.mxu0 %v4779_v22  ;;  %v357_v16 = vrot.slane %v5429_v9, %v5419_v7  ;;  %v4825_v22 = vld [vmem:[%s6471_s3 + $0x180] ss:$12 sps:$4 sm:$0xff]  }
  0x1e   : > { %4396 = vmatpush3.bf16.msra.mxu1 %v4814_v54  ;;  %v4860_v54 = vld [vmem:[%s6472_s4 + $0xc8] ss:$12 sps:$4 sm:$0xff]  }
  0x1f   : > { %868 = vmatpush1.bf16.msra.mxu0 %v4781_v23  ;;  %4397 = vmatprep.subr.bf16.mxu1 %v4817_v56 }
  0x20   : > { %869 = vmatprep.subr.bf16.mxu0 %v4782_v24  ;;  %v4828_v24 = vld [vmem:[%s6471_s3 + $0x188] ss:$12 sps:$4 sm:$0xff]  }
  0x22   : > { %4398 = vmatpush3.bf16.msra.mxu1 %v4819_v58  ;;  %v4864_v58 = vld [vmem:[%s6472_s4 + $0x1c] ss:$12 sps:$4 sm:$0xff]  }
  0x23   : > { %870 = vmatpush1.bf16.msra.mxu0 %v4784_v25  ;;  %4399 = vmatprep.subr.bf16.mxu1 %v4822_v60  ;;  %v4831_v25 = vld [vmem:[%s6471_s3 + $0x19c] ss:$12 sps:$4 sm:$0xff]   ;;  %v4862_v60 = vld [vmem:[%s6472_s4 + $0x18] ss:$12 sps:$4 sm:$0xff]  }
  0x24   : > { %871 = vmatprep.subr.bf16.mxu0 %v4785_v26  ;;  %v4829_v26 = vld [vmem:[%s6471_s3 + $0x198] ss:$12 sps:$4 sm:$0xff]  }
  0x26   : > { %4400 = vmatpush3.bf16.msra.mxu1 %v4824_v62  ;;  %v4869_v62 = vld [vmem:[%s6472_s4 + $0x34] ss:$12 sps:$4 sm:$0xff]  }
  0x27   : > { %872 = vmatpush1.bf16.msra.mxu0 %v4788_v27  ;;  %v4832_v27 = vld [vmem:[%s6471_s3 + $0x1a0] ss:$12 sps:$4 sm:$0xff]  }
  0x28   : > { %873 = vmatprep.subr.bf16.mxu0 %v4790_v28  ;;  %v4835_v28 = vld [vmem:[%s6471_s3 + $0x1b4] ss:$12 sps:$4 sm:$0xff]  }
  0x2b   : > { %874 = vmatpush1.bf16.msra.mxu0 %v4793_v29  ;;  %v5183_v29 = vmov 0  }
  0x2c   : > { %875 = vmatprep.subr.bf16.mxu0 %v4795_v30  ;;  %v4833_v30 = vld [vmem:[%s6471_s3 + $0x1b0] ss:$12 sps:$4 sm:$0xff]  }
  0x2f   : > { %876 = vmatpush1.bf16.msra.mxu0 %v4798_v41  ;;  %v4845_v41 = vld [vmem:[%s6471_s3 + $0x1f8] ss:$12 sps:$4 sm:$0xff]  }
  0x30   : > { %877 = vmatprep.subr.bf16.mxu0 %v4800_v43  ;;  %v4851_v43 = vld [vmem:[%s6471_s3 + $0x214] ss:$12 sps:$4 sm:$0xff]  }
  0x33   : > { %878 = vmatpush1.bf16.msra.mxu0 %v4803_v45 }
  0x34   : > { %879 = vmatprep.subr.bf16.mxu0 %v4805_v47  ;;  %v4852_v47 = vld [vmem:[%s6471_s3 + $0x218] ss:$12 sps:$4 sm:$0xff]  }
  0x37   : > { %880 = vmatpush1.bf16.msra.mxu0 %v4808_v49 }
  0x38   : > { %881 = vmatprep.subr.bf16.mxu0 %v4810_v51  ;;  %v4856_v51 = vld [vmem:[%s6471_s3 + $0x230] ss:$12 sps:$4 sm:$0xff]  }
  0x3b   : > { %882 = vmatpush1.bf16.msra.mxu0 %v4813_v53  ;;  %v4859_v53 = vld [vmem:[%s6472_s4 + $0x4] ss:$12 sps:$4 sm:$0xff]  }
  0x3c   : > { %883 = vmatprep.subr.bf16.mxu0 %v4815_v55  ;;  %v4857_v55 = vld [vmem:[%s6472_s4] ss:$12 sps:$4 sm:$0xff]  }
  0x3f   : > { %884 = vmatpush1.bf16.msra.mxu0 %v4818_v57  ;;  %v4861_v57 = vld [vmem:[%s6472_s4 + $0x8] ss:$12 sps:$4 sm:$0xff]  }
  0x40   : > { %885 = vmatprep.subr.bf16.mxu0 %v4820_v59  ;;  %v4865_v59 = vld [vmem:[%s6472_s4 + $0xe0] ss:$12 sps:$4 sm:$0xff]  }
  0x43   : > { %886 = vmatpush1.bf16.msra.mxu0 %v4823_v61  ;;  %v4866_v61 = vld [vmem:[%s6472_s4 + $0x20] ss:$12 sps:$4 sm:$0xff]  }
  0x44   : > { %896 = vmatprep.subr.bf16.mxu0 %v4827_v63  ;;  %v4870_v63 = vld [vmem:[%s6472_s4 + $0xf8] ss:$12 sps:$4 sm:$0xff]  }
  0xa3   : > { %v315_v31 = vpop.xlane.xlu0 %314 }
  0xa4   : > { %v317_v32 = vmul.f32 0.0026041667, %v315_v31  ;;  %v4836_v31 = vld [vmem:[%s6471_s3 + $0x1b8] ss:$12 sps:$4 sm:$0xff]  }
  0xa6   : > { %v5330_v33 = vsub.f32 %v307_v0, %v317_v32  ;;  %v5332_v34 = vsub.f32 %v308_v1, %v317_v32  ;;  %v5334_v35 = vsub.f32 %v309_v2, %v317_v32  ;;  %v5182_v0 = vmov 0.0   ;;  %v4839_v32 = vld [vmem:[%s6471_s3 + $0x1cc] ss:$12 sps:$4 sm:$0xff]  }
  0xa7   : > { %4532 = vmatprep.subr.bf16.mxu1 %v5182_v0 }
  0xa8   : > { %v321_v36 = vmul.f32 %v5330_v33, %v5330_v33  ;;  %v322_v37 = vmul.f32 %v5332_v34, %v5332_v34  ;;  %v323_v38 = vmul.f32 %v5334_v35, %v5334_v35 }
  0xaa   : > { %v324_v39 = vadd.f32 %v322_v37, %v321_v36  ;;  %v4843_v36 = vld [vmem:[%s6471_s3 + $0x1e4] ss:$12 sps:$4 sm:$0xff]   ;;  %v4841_v37 = vld [vmem:[%s6471_s3 + $0x1e0] ss:$12 sps:$4 sm:$0xff]  }
  0xac   : > { %v325_v40 = vadd.f32 %v324_v39, %v323_v38  ;;  %v4844_v38 = vld [vmem:[%s6471_s3 + $0x1e8] ss:$12 sps:$4 sm:$0xff]  }
  0xad   : > { %v4847_v39 = vld [vmem:[%s6471_s3 + $0x1fc] ss:$12 sps:$4 sm:$0xff]  }
  0xae   : > { %326 = vadd.xlane.f32.xlu0 %v325_v40  ;;  %v5502_v40 = vsub.s32 2, %v5413_v5 }
  0xb0   : > { %v346_v45 = vrot.slane %v5424_v8, %v5502_v40  ;;  %v365_v49 = vrot.slane %v5429_v9, %v5502_v40  ;;  %v4875_v8 = vld [vmem:[%s6472_s4 + $0x110] ss:$12 sps:$4 sm:$0xff]   ;;  %v4872_v9 = vld [vmem:[%s6472_s4 + $0x48] ss:$12 sps:$4 sm:$0xff]  }
 0x13b   : > { %v327_v1 = vpop.xlane.xlu0 %326 }
 0x13c   : > { %v328_v2 = vmul.f32 0.0026041667, %v327_v1  ;;  %v4867_v1 = vld [vmem:[%s6472_s4 + $0x30] ss:$12 sps:$4 sm:$0xff]  }
 0x13e   : > { %v329_v4 = vadd.f32 1e-05, %v328_v2  ;;  %v4871_v2 = vld [vmem:[%s6472_s4 + $0x38] ss:$12 sps:$4 sm:$0xff]  }
 0x140   : > { %5145 = vrsqrt.f32 %v329_v4  ;;  %v4874_v4 = vld [vmem:[%s6472_s4 + $0x4c] ss:$12 sps:$4 sm:$0xff]  }
 0x14a   : > { %v5146_v12 = vpop.eup %5145 }
 0x14b   : > { %v332_v13 = vmul.f32 %v5146_v12, %v5332_v34  ;;  %v331_v15 = vmul.f32 %v5146_v12, %v5330_v33  ;;  %v4837_v33 = vld [vmem:[%s6471_s3 + $0x1c8] ss:$12 sps:$4 sm:$0xff]   ;;  %v4840_v34 = vld [vmem:[%s6471_s3 + $0x1d0] ss:$12 sps:$4 sm:$0xff]   ;;  %v333_v44 = vmul.f32 %v5146_v12, %v5334_v35  ;;  %v4855_v35 = vld [vmem:[%s6471_s3 + $0x22c] ss:$12 sps:$4 sm:$0xff]  }
 0x14c   : > { %v4880_v12 = vld [vmem:[%s6472_s4 + $0x128] ss:$12 sps:$4 sm:$0xff]  }
 0x14d   : > { %v351_v17 = vmul.f32 %v342_v10, %v332_v13  ;;  %v350_v18 = vmul.f32 %v338_v11, %v331_v15  ;;  %v352_v48 = vmul.f32 %v346_v45, %v333_v44  ;;  %v4876_v10 = vld [vmem:[%s6472_s4 + $0x50] ss:$12 sps:$4 sm:$0xff]   ;;  %v4877_v13 = vld [vmem:[%s6472_s4 + $0x60] ss:$12 sps:$4 sm:$0xff]  }
 0x14e   : > { %v4879_v11 = vld [vmem:[%s6472_s4 + $0x64] ss:$12 sps:$4 sm:$0xff]   ;;  %v4884_v15 = vld [vmem:[%s6472_s4 + $0x7c] ss:$12 sps:$4 sm:$0xff]   ;;  %v4913_v45 = vld [vmem:[%s6472_s4 + $0x120] ss:$12 sps:$4 sm:$0xff]  }
 0x14f   : > { %v370_v19 = vadd.f32 %v361_v14, %v351_v17  ;;  %v369_v20 = vadd.f32 %v357_v16, %v350_v18  ;;  %v371_v52 = vadd.f32 %v365_v49, %v352_v48  ;;  %v4881_v14 = vld [vmem:[%s6472_s4 + $0x68] ss:$12 sps:$4 sm:$0xff]   ;;  %v4885_v16 = vld [vmem:[%s6472_s4 + $0x140] ss:$12 sps:$4 sm:$0xff]   ;;  %v4882_v17 = vld [vmem:[%s6472_s4 + $0x78] ss:$12 sps:$4 sm:$0xff]  }
 0x150   : > { %v4886_v18 = vld [vmem:[%s6472_s4 + $0x80] ss:$12 sps:$4 sm:$0xff]   ;;  %v4915_v44 = vld [vmem:[%s6472_s4 + $0x124] ss:$12 sps:$4 sm:$0xff]  }
 0x151   : > { %v5441_v21 = vpack.c.bf16 %v370_v19, %v370_v19  ;;  %v5446_v23 = vpack.c.bf16 %v369_v20, %v369_v20  ;;  %v5545_v56 = vpack.c.bf16 %v371_v52, %v371_v52  ;;  %v4889_v19 = vld [vmem:[%s6472_s4 + $0x94] ss:$12 sps:$4 sm:$0xff]   ;;  %v4890_v20 = vld [vmem:[%s6472_s4 + $0x158] ss:$12 sps:$4 sm:$0xff]  }
 0x152   : > { %v4920_v48 = vld [vmem:[%s6472_s4 + $0x200] ss:$12 sps:$4 sm:$0xff]  }
 0x153   : > { %887 = vmatprep.mubr.bf16.mxu0 %v5441_v21  ;;  %969 = vmatprep.mubr.bf16.mxu1 %v5441_v21  ;;  %v4923_v49 = vld [vmem:[%s6472_s4 + $0x154] ss:$12 sps:$4 sm:$0xff]   ;;  %v4927_v52 = vld [vmem:[%s6472_s4 + $0x16c] ss:$12 sps:$4 sm:$0xff]  }
 0x154   : > { %888 = vmatmul.mubr.bf16.vlgmr.msra.gmra.mrb[0].mxu0 %v5446_v23  ;;  %970 = vmatmul.mubr.bf16.vlgmr.msra.gmra.mrb[0].mxu1 %v5446_v23 }
 0x155   : > { %897 = vmatpush1.bf16.msra.mxu0 %v4825_v22  ;;  %4533 = vmatpush3.bf16.msra.mxu1 %v4828_v24  ;;  %v4887_v22 = vld [vmem:[%s6472_s4 + $0x90] ss:$12 sps:$4 sm:$0xff]   ;;  %v4891_v24 = vld [vmem:[%s6472_s4 + $0x98] ss:$12 sps:$4 sm:$0xff]  }
 0x156   : > { %898 = vmatprep.subr.bf16.mxu0 %v4831_v25  ;;  %4534 = vmatprep.subr.bf16.mxu1 %v5182_v0  ;;  %v4894_v25 = vld [vmem:[%s6472_s4 + $0xac] ss:$12 sps:$4 sm:$0xff]  }
 0x157   : > { %928 = vmatprep.mubr.bf16.mxu0 %v5183_v29  ;;  %4548 = vmatprep.mubr.msk.bf16.mxu1 %vm5184_vm0, %v5182_v0 }
 0x159   : > { %899 = vmatpush1.bf16.msra.mxu0 %v4829_v26  ;;  %4535 = vmatpush3.bf16.msra.mxu1 %v4832_v27  ;;  %v4895_v26 = vld [vmem:[%s6472_s4 + $0x170] ss:$12 sps:$4 sm:$0xff]   ;;  %v4892_v27 = vld [vmem:[%s6472_s4 + $0xa8] ss:$12 sps:$4 sm:$0xff]  }
 0x15a   : > { %900 = vmatprep.subr.bf16.mxu0 %v4835_v28  ;;  %4536 = vmatprep.subr.bf16.mxu1 %v5182_v0  ;;  %v4896_v28 = vld [vmem:[%s6472_s4 + $0xb0] ss:$12 sps:$4 sm:$0xff]  }
 0x15d   : > { %901 = vmatpush1.bf16.msra.mxu0 %v4833_v30  ;;  %4537 = vmatpush3.bf16.msra.mxu1 %v4836_v31  ;;  %v4899_v30 = vld [vmem:[%s6472_s4 + $0xc4] ss:$12 sps:$4 sm:$0xff]   ;;  %v4897_v31 = vld [vmem:[%s6472_s4 + $0xc0] ss:$12 sps:$4 sm:$0xff]  }
 0x15e   : > { %902 = vmatprep.subr.bf16.mxu0 %v4839_v32  ;;  %4538 = vmatprep.subr.bf16.mxu1 %v5182_v0  ;;  %v4900_v32 = vld [vmem:[%s6472_s4 + $0x188] ss:$12 sps:$4 sm:$0xff]  }
 0x161   : > { %903 = vmatpush1.bf16.msra.mxu0 %v4837_v33  ;;  %4539 = vmatpush3.bf16.msra.mxu1 %v4840_v34  ;;  %v4903_v33 = vld [vmem:[%s6472_s4 + $0xdc] ss:$12 sps:$4 sm:$0xff]   ;;  %v4901_v34 = vld [vmem:[%s6472_s4 + $0xd8] ss:$12 sps:$4 sm:$0xff]  }
 0x162   : > { %904 = vmatprep.subr.bf16.mxu0 %v4843_v36  ;;  %4540 = vmatprep.subr.bf16.mxu1 %v5182_v0  ;;  %v4904_v36 = vld [vmem:[%s6472_s4 + $0x1a0] ss:$12 sps:$4 sm:$0xff]  }
 0x165   : > { %905 = vmatpush1.bf16.msra.mxu0 %v4841_v37  ;;  %4541 = vmatpush3.bf16.msra.mxu1 %v4844_v38  ;;  %v4907_v37 = vld [vmem:[%s6472_s4 + $0xf4] ss:$12 sps:$4 sm:$0xff]   ;;  %v4905_v38 = vld [vmem:[%s6472_s4 + $0xf0] ss:$12 sps:$4 sm:$0xff]  }
 0x166   : > { %906 = vmatprep.subr.bf16.mxu0 %v4847_v39  ;;  %4542 = vmatprep.subr.bf16.mxu1 %v5182_v0  ;;  %v4908_v39 = vld [vmem:[%s6472_s4 + $0x1b8] ss:$12 sps:$4 sm:$0xff]  }
 0x169   : > { %907 = vmatpush1.bf16.msra.mxu0 %v4845_v41  ;;  %4543 = vmatpush3.bf16.msra.mxu1 %v4848_v42  ;;  %v4911_v41 = vld [vmem:[%s6472_s4 + $0x10c] ss:$12 sps:$4 sm:$0xff]   ;;  %v4909_v42 = vld [vmem:[%s6472_s4 + $0x108] ss:$12 sps:$4 sm:$0xff]  }
 0x16a   : > { %908 = vmatprep.subr.bf16.mxu0 %v4851_v43  ;;  %4544 = vmatprep.subr.bf16.mxu1 %v5182_v0  ;;  %v4912_v43 = vld [vmem:[%s6472_s4 + $0x1d0] ss:$12 sps:$4 sm:$0xff]  }
 0x16d   : > { %909 = vmatpush1.bf16.msra.mxu0 %v4849_v46  ;;  %4545 = vmatpush3.bf16.msra.mxu1 %v4852_v47  ;;  %v4916_v46 = vld [vmem:[%s6472_s4 + $0x1e8] ss:$12 sps:$4 sm:$0xff]  }
 0x16e   : > { %910 = vmatprep.subr.bf16.mxu0 %v4855_v35  ;;  %4546 = vmatprep.subr.bf16.mxu1 %v5182_v0  ;;  %v4919_v47 = vld [vmem:[%s6472_s4 + $0x13c] ss:$12 sps:$4 sm:$0xff]   ;;  %v4917_v35 = vld [vmem:[%s6472_s4 + $0x138] ss:$12 sps:$4 sm:$0xff]  }
 0x171   : > { %911 = vmatpush1.bf16.msra.mxu0 %v4853_v50  ;;  %4547 = vmatpush3.bf16.msra.mxu1 %v4856_v51  ;;  %v4921_v50 = vld [vmem:[%s6472_s4 + $0x150] ss:$12 sps:$4 sm:$0xff]   ;;  %v4924_v51 = vld [vmem:[%s6472_s4 + $0x218] ss:$12 sps:$4 sm:$0xff]  }
 0x172   : > { %1497 = vmatprep.subr.bf16.mxu1 %v4859_v53  ;;  %4416 = vmatprep.subr.bf16.mxu0 %v4860_v54  ;;  %v4925_v53 = vld [vmem:[%s6472_s4 + $0x168] ss:$12 sps:$4 sm:$0xff]   ;;  %v4928_v54 = vld [vmem:[%s6472_s4 + $0x230] ss:$12 sps:$4 sm:$0xff]  }
 0x174   : > { %929 = vmatmul.mubr.bf16.vlgmr.msra.gmra.mrb[0].mxu0 %v5545_v56  ;;  %4549 = vmatmul.mubr.bf16.vlgmr.msra.gmra.mrb[4].mxu1 %v5545_v56 }
 0x175   : > { %1498 = vmatpush1.bf16.msra.mxu1 %v4857_v55  ;;  %1529 = vmatprep.mubr.bf16.mxu1 %v5441_v21  ;;  %v4931_v55 = vld [vmem:[%s6472_s4 + $0x184] ss:$12 sps:$4 sm:$0xff]  }
 0x176   : > { %4417 = vmatpush3.bf16.msra.mxu0 %v4861_v57  ;;  %1611 = vmatprep.mubr.bf16.mxu0 %v5441_v21  ;;  %v4934_v57 = vld [vmem:[%s6473_s5 + $0x4] ss:$12 sps:$4 sm:$0xff]  }
 0x177   : > { %1499 = vmatprep.subr.bf16.mxu1 %v4864_v58  ;;  %4418 = vmatprep.subr.bf16.mxu0 %v4865_v59  ;;  %v4929_v58 = vld [vmem:[%s6472_s4 + $0x180] ss:$12 sps:$4 sm:$0xff]  }
 0x178   : > { %v4932_v59 = vld [vmem:[%s6473_s5] ss:$12 sps:$4 sm:$0xff]  }
 0x179   : > { %1500 = vmatpush1.bf16.msra.mxu1 %v4862_v60  ;;  %v4937_v60 = vld [vmem:[%s6472_s4 + $0x19c] ss:$12 sps:$4 sm:$0xff]  }
 0x17a   : > { %4419 = vmatpush3.bf16.msra.mxu0 %v4866_v61  ;;  %1501 = vmatprep.subr.bf16.mxu1 %v4869_v62  ;;  %v4940_v61 = vld [vmem:[%s6473_s5 + $0x1c] ss:$12 sps:$4 sm:$0xff]   ;;  %v4935_v62 = vld [vmem:[%s6472_s4 + $0x198] ss:$12 sps:$4 sm:$0xff]  }
 0x17b   : > { %4420 = vmatprep.subr.bf16.mxu0 %v4870_v63  ;;  %v4938_v63 = vld [vmem:[%s6473_s5 + $0x18] ss:$12 sps:$4 sm:$0xff]  }
 0x17d   : > { %1502 = vmatpush1.bf16.msra.mxu1 %v4867_v1  ;;  %v4943_v1 = vld [vmem:[%s6472_s4 + $0x1b4] ss:$12 sps:$4 sm:$0xff]  }
 0x17e   : > { %4421 = vmatpush3.bf16.msra.mxu0 %v4871_v2  ;;  %1503 = vmatprep.subr.bf16.mxu1 %v4874_v4  ;;  %v4946_v2 = vld [vmem:[%s6473_s5 + $0x34] ss:$12 sps:$4 sm:$0xff]   ;;  %v4941_v4 = vld [vmem:[%s6472_s4 + $0x1b0] ss:$12 sps:$4 sm:$0xff]  }
 0x17f   : > { %4422 = vmatprep.subr.bf16.mxu0 %v4875_v8  ;;  %v4944_v8 = vld [vmem:[%s6473_s5 + $0x30] ss:$12 sps:$4 sm:$0xff]  }
 0x181   : > { %1504 = vmatpush1.bf16.msra.mxu1 %v4872_v9  ;;  %v4949_v9 = vld [vmem:[%s6472_s4 + $0x1cc] ss:$12 sps:$4 sm:$0xff]  }
 0x182   : > { %4423 = vmatpush3.bf16.msra.mxu0 %v4876_v10  ;;  %1505 = vmatprep.subr.bf16.mxu1 %v4879_v11  ;;  %v4952_v10 = vld [vmem:[%s6473_s5 + $0x4c] ss:$12 sps:$4 sm:$0xff]   ;;  %v4947_v11 = vld [vmem:[%s6472_s4 + $0x1c8] ss:$12 sps:$4 sm:$0xff]  }
 0x183   : > { %4424 = vmatprep.subr.bf16.mxu0 %v4880_v12  ;;  %v4950_v12 = vld [vmem:[%s6473_s5 + $0x48] ss:$12 sps:$4 sm:$0xff]  }
 0x185   : > { %1506 = vmatpush1.bf16.msra.mxu1 %v4877_v13  ;;  %v4955_v13 = vld [vmem:[%s6472_s4 + $0x1e4] ss:$12 sps:$4 sm:$0xff]  }
 0x186   : > { %4425 = vmatpush3.bf16.msra.mxu0 %v4881_v14  ;;  %1507 = vmatprep.subr.bf16.mxu1 %v4884_v15  ;;  %v4958_v14 = vld [vmem:[%s6473_s5 + $0x64] ss:$12 sps:$4 sm:$0xff]   ;;  %v4953_v15 = vld [vmem:[%s6472_s4 + $0x1e0] ss:$12 sps:$4 sm:$0xff]  }
 0x187   : > { %4426 = vmatprep.subr.bf16.mxu0 %v4885_v16  ;;  %v4956_v16 = vld [vmem:[%s6473_s5 + $0x60] ss:$12 sps:$4 sm:$0xff]  }
 0x189   : > { %1508 = vmatpush1.bf16.msra.mxu1 %v4882_v17  ;;  %v4961_v17 = vld [vmem:[%s6472_s4 + $0x1fc] ss:$12 sps:$4 sm:$0xff]  }
 0x18a   : > { %4427 = vmatpush3.bf16.msra.mxu0 %v4886_v18  ;;  %1509 = vmatprep.subr.bf16.mxu1 %v4889_v19  ;;  %v4964_v18 = vld [vmem:[%s6473_s5 + $0x7c] ss:$12 sps:$4 sm:$0xff]   ;;  %v4959_v19 = vld [vmem:[%s6472_s4 + $0x1f8] ss:$12 sps:$4 sm:$0xff]  }
 0x18b   : > { %4428 = vmatprep.subr.bf16.mxu0 %v4890_v20  ;;  %v4962_v20 = vld [vmem:[%s6473_s5 + $0x78] ss:$12 sps:$4 sm:$0xff]  }
 0x18d   : > { %1510 = vmatpush1.bf16.msra.mxu1 %v4887_v22  ;;  %v4967_v22 = vld [vmem:[%s6472_s4 + $0x214] ss:$12 sps:$4 sm:$0xff]  }
 0x18e   : > { %4429 = vmatpush3.bf16.msra.mxu0 %v4891_v24  ;;  %1511 = vmatprep.subr.bf16.mxu1 %v4894_v25  ;;  %v4970_v24 = vld [vmem:[%s6473_s5 + $0x94] ss:$12 sps:$4 sm:$0xff]   ;;  %v4965_v25 = vld [vmem:[%s6472_s4 + $0x210] ss:$12 sps:$4 sm:$0xff]  }
 0x18f   : > { %4430 = vmatprep.subr.bf16.mxu0 %v4895_v26  ;;  %v4968_v26 = vld [vmem:[%s6473_s5 + $0x90] ss:$12 sps:$4 sm:$0xff]  }
 0x191   : > { %1512 = vmatpush1.bf16.msra.mxu1 %v4892_v27  ;;  %v4973_v27 = vld [vmem:[%s6472_s4 + $0x22c] ss:$12 sps:$4 sm:$0xff]  }
 0x192   : > { %4431 = vmatpush3.bf16.msra.mxu0 %v4896_v28  ;;  %1513 = vmatprep.subr.bf16.mxu1 %v4899_v30  ;;  %v4976_v28 = vld [vmem:[%s6473_s5 + $0xac] ss:$12 sps:$4 sm:$0xff]   ;;  %v4971_v30 = vld [vmem:[%s6472_s4 + $0x228] ss:$12 sps:$4 sm:$0xff]  }
 0x193   : > { %4552 = vmatprep.subr.bf16.mxu0 %v5182_v0 }
 0x195   : > { %1612 = vmatmul.mubr.bf16.vlgmr.msra.gmra.mrb[4].mxu0 %v5446_v23  ;;  %1514 = vmatpush1.bf16.msra.mxu1 %v4897_v31  ;;  %v4974_v31 = vld [vmem:[%s6473_s5 + $0xa8] ss:$12 sps:$4 sm:$0xff]  }
 0x196   : > { %4553 = vmatpush3.bf16.msra.mxu0 %v4900_v32  ;;  %1515 = vmatprep.subr.bf16.mxu1 %v4903_v33  ;;  %v4980_v32 = vld [vmem:[%s6473_s5 + $0xc8] ss:$12 sps:$4 sm:$0xff]   ;;  %v4979_v33 = vld [vmem:[%s6473_s5 + $0xc4] ss:$12 sps:$4 sm:$0xff]  }
 0x197   : > { %4554 = vmatprep.subr.bf16.mxu0 %v5182_v0  ;;  %4568 = vmatprep.mubr.msk.bf16.mxu0 %vm5184_vm0, %v5182_v0 }
 0x199   : > { %1516 = vmatpush1.bf16.msra.mxu1 %v4901_v34  ;;  %v4981_v34 = vld [vmem:[%s6473_s5 + $0x8] ss:$12 sps:$4 sm:$0xff]  }
 0x19a   : > { %4555 = vmatpush3.bf16.msra.mxu0 %v4904_v36  ;;  %1517 = vmatprep.subr.bf16.mxu1 %v4907_v37  ;;  %v4977_v36 = vld [vmem:[%s6473_s5 + $0xc0] ss:$12 sps:$4 sm:$0xff]  }
 0x19b   : > { %4556 = vmatprep.subr.bf16.mxu0 %v5182_v0  ;;  %v4985_v37 = vld [vmem:[%s6473_s5 + $0xe0] ss:$12 sps:$4 sm:$0xff]  }
 0x19d   : > { %1518 = vmatpush1.bf16.msra.mxu1 %v4905_v38  ;;  %v4984_v38 = vld [vmem:[%s6473_s5 + $0xdc] ss:$12 sps:$4 sm:$0xff]  }
 0x19e   : > { %4557 = vmatpush3.bf16.msra.mxu0 %v4908_v39  ;;  %1519 = vmatprep.subr.bf16.mxu1 %v4911_v41  ;;  %v4986_v39 = vld [vmem:[%s6473_s5 + $0x20] ss:$12 sps:$4 sm:$0xff]   ;;  %v4982_v41 = vld [vmem:[%s6473_s5 + $0xd8] ss:$12 sps:$4 sm:$0xff]  }
 0x19f   : > { %4558 = vmatprep.subr.bf16.mxu0 %v5182_v0 }
 0x1a1   : > { %1520 = vmatpush1.bf16.msra.mxu1 %v4909_v42  ;;  %v4990_v42 = vld [vmem:[%s6473_s5 + $0xf8] ss:$12 sps:$4 sm:$0xff]  }
 0x1a2   : > { %4559 = vmatpush3.bf16.msra.mxu0 %v4912_v43  ;;  %1521 = vmatprep.subr.bf16.mxu1 %v4915_v44  ;;  %v4989_v43 = vld [vmem:[%s6473_s5 + $0xf4] ss:$12 sps:$4 sm:$0xff]   ;;  %v4987_v44 = vld [vmem:[%s6473_s5 + $0xf0] ss:$12 sps:$4 sm:$0xff]  }
 0x1a3   : > { %4560 = vmatprep.subr.bf16.mxu0 %v5182_v0 }
 0x1a5   : > { %1522 = vmatpush1.bf16.msra.mxu1 %v4913_v45  ;;  %v4995_v45 = vld [vmem:[%s6473_s5 + $0x110] ss:$12 sps:$4 sm:$0xff]  }
 0x1a6   : > { %4561 = vmatpush3.bf16.msra.mxu0 %v4916_v46  ;;  %1523 = vmatprep.subr.bf16.mxu1 %v4919_v47  ;;  %v4994_v46 = vld [vmem:[%s6473_s5 + $0x10c] ss:$12 sps:$4 sm:$0xff]   ;;  %v4996_v47 = vld [vmem:[%s6473_s5 + $0x50] ss:$12 sps:$4 sm:$0xff]  }
 0x1a7   : > { %4562 = vmatprep.subr.bf16.mxu0 %v5182_v0 }
 0x1a9   : > { %1524 = vmatpush1.bf16.msra.mxu1 %v4917_v35  ;;  %v4992_v35 = vld [vmem:[%s6473_s5 + $0x108] ss:$12 sps:$4 sm:$0xff]  }
 0x1aa   : > { %4563 = vmatpush3.bf16.msra.mxu0 %v4920_v48  ;;  %1525 = vmatprep.subr.bf16.mxu1 %v4923_v49  ;;  %v5000_v48 = vld [vmem:[%s6473_s5 + $0x128] ss:$12 sps:$4 sm:$0xff]   ;;  %v4999_v49 = vld [vmem:[%s6473_s5 + $0x124] ss:$12 sps:$4 sm:$0xff]  }
 0x1ab   : > { %4564 = vmatprep.subr.bf16.mxu0 %v5182_v0 }
 0x1ad   : > { %1526 = vmatpush1.bf16.msra.mxu1 %v4921_v50  ;;  %v5001_v50 = vld [vmem:[%s6473_s5 + $0x68] ss:$12 sps:$4 sm:$0xff]  }
 0x1ae   : > { %4565 = vmatpush3.bf16.msra.mxu0 %v4924_v51  ;;  %1527 = vmatprep.subr.bf16.mxu1 %v4927_v52  ;;  %v4997_v51 = vld [vmem:[%s6473_s5 + $0x120] ss:$12 sps:$4 sm:$0xff]  }
 0x1af   : > { %4566 = vmatprep.subr.bf16.mxu0 %v5182_v0  ;;  %v5005_v52 = vld [vmem:[%s6473_s5 + $0x140] ss:$12 sps:$4 sm:$0xff]  }
 0x1b1   : > { %1528 = vmatpush1.bf16.msra.mxu1 %v4925_v53  ;;  %v5004_v53 = vld [vmem:[%s6473_s5 + $0x13c] ss:$12 sps:$4 sm:$0xff]  }
 0x1b2   : > { %4567 = vmatpush3.bf16.msra.mxu0 %v4928_v54  ;;  %1538 = vmatprep.subr.bf16.mxu1 %v4931_v55  ;;  %v5006_v54 = vld [vmem:[%s6473_s5 + $0x80] ss:$12 sps:$4 sm:$0xff]   ;;  %v5002_v55 = vld [vmem:[%s6473_s5 + $0x138] ss:$12 sps:$4 sm:$0xff]  }
 0x1b3   : > { %2139 = vmatprep.subr.bf16.mxu0 %v4934_v57  ;;  %v5010_v57 = vld [vmem:[%s6473_s5 + $0x158] ss:$12 sps:$4 sm:$0xff]  }
 0x1b4   : > { %1530 = vmatmul.mubr.bf16.vlgmr.msra.gmra.mrb[8].mxu1 %v5446_v23 }
 0x1b5   : > { %4569 = vmatmul.mubr.bf16.vlgmr.msra.gmra.mrb[8].mxu0 %v5545_v56  ;;  %1539 = vmatpush1.bf16.msra.mxu1 %v4929_v58  ;;  %v5009_v58 = vld [vmem:[%s6473_s5 + $0x154] ss:$12 sps:$4 sm:$0xff]  }
 0x1b6   : > { %2140 = vmatpush1.bf16.msra.mxu0 %v4932_v59  ;;  %2171 = vmatprep.mubr.bf16.mxu0 %v5441_v21  ;;  %v5011_v59 = vld [vmem:[%s6473_s5 + $0x98] ss:$12 sps:$4 sm:$0xff]  }
 0x1b7   : > { %1540 = vmatprep.subr.bf16.mxu1 %v4937_v60  ;;  %2141 = vmatprep.subr.bf16.mxu0 %v4940_v61  ;;  %v5007_v60 = vld [vmem:[%s6473_s5 + $0x150] ss:$12 sps:$4 sm:$0xff]  }
 0x1b8   : > { %1570 = vmatprep.mubr.bf16.mxu1 %v5183_v29  ;;  %v5015_v61 = vld [vmem:[%s6473_s5 + $0x170] ss:$12 sps:$4 sm:$0xff]  }
 0x1b9   : > { %1541 = vmatpush1.bf16.msra.mxu1 %v4935_v62  ;;  %v5014_v62 = vld [vmem:[%s6473_s5 + $0x16c] ss:$12 sps:$4 sm:$0xff]  }
 0x1ba   : > { %2142 = vmatpush1.bf16.msra.mxu0 %v4938_v63  ;;  %1542 = vmatprep.subr.bf16.mxu1 %v4943_v1  ;;  %v5016_v63 = vld [vmem:[%s6473_s5 + $0xb0] ss:$12 sps:$4 sm:$0xff]   ;;  %v5012_v1 = vld [vmem:[%s6473_s5 + $0x168] ss:$12 sps:$4 sm:$0xff]  }
 0x1bb   : > { %2143 = vmatprep.subr.bf16.mxu0 %v4946_v2  ;;  %v5019_v2 = vld [vmem:[%s6473_s5 + $0x184] ss:$12 sps:$4 sm:$0xff]  }
 0x1bd   : > { %1543 = vmatpush1.bf16.msra.mxu1 %v4941_v4  ;;  %v5020_v4 = vld [vmem:[%s6473_s5 + $0x188] ss:$12 sps:$4 sm:$0xff]  }
 0x1be   : > { %2144 = vmatpush1.bf16.msra.mxu0 %v4944_v8  ;;  %1544 = vmatprep.subr.bf16.mxu1 %v4949_v9  ;;  %v5017_v8 = vld [vmem:[%s6473_s5 + $0x180] ss:$12 sps:$4 sm:$0xff]   ;;  %v5023_v9 = vld [vmem:[%s6473_s5 + $0x19c] ss:$12 sps:$4 sm:$0xff]  }
 0x1bf   : > { %2145 = vmatprep.subr.bf16.mxu0 %v4952_v10  ;;  %v5024_v10 = vld [vmem:[%s6473_s5 + $0x1a0] ss:$12 sps:$4 sm:$0xff]  }
 0x1c1   : > { %1545 = vmatpush1.bf16.msra.mxu1 %v4947_v11  ;;  %v5021_v11 = vld [vmem:[%s6473_s5 + $0x198] ss:$12 sps:$4 sm:$0xff]  }
 0x1c2   : > { %2146 = vmatpush1.bf16.msra.mxu0 %v4950_v12  ;;  %1546 = vmatprep.subr.bf16.mxu1 %v4955_v13  ;;  %v5027_v12 = vld [vmem:[%s6473_s5 + $0x1b4] ss:$12 sps:$4 sm:$0xff]   ;;  %v5025_v13 = vld [vmem:[%s6473_s5 + $0x1b0] ss:$12 sps:$4 sm:$0xff]  }
 0x1c3   : > { %2147 = vmatprep.subr.bf16.mxu0 %v4958_v14  ;;  %v5031_v14 = vld [vmem:[%s6473_s5 + $0x1cc] ss:$12 sps:$4 sm:$0xff]  }
 0x1c5   : > { %1547 = vmatpush1.bf16.msra.mxu1 %v4953_v15  ;;  %v5032_v15 = vld [vmem:[%s6473_s5 + $0x1d0] ss:$12 sps:$4 sm:$0xff]  }
 0x1c6   : > { %2148 = vmatpush1.bf16.msra.mxu0 %v4956_v16  ;;  %1548 = vmatprep.subr.bf16.mxu1 %v4961_v17  ;;  %v5029_v16 = vld [vmem:[%s6473_s5 + $0x1c8] ss:$12 sps:$4 sm:$0xff]   ;;  %v5035_v17 = vld [vmem:[%s6473_s5 + $0x1e4] ss:$12 sps:$4 sm:$0xff]  }
 0x1c7   : > { %2149 = vmatprep.subr.bf16.mxu0 %v4964_v18  ;;  %v5036_v18 = vld [vmem:[%s6473_s5 + $0x1e8] ss:$12 sps:$4 sm:$0xff]  }
 0x1c9   : > { %1549 = vmatpush1.bf16.msra.mxu1 %v4959_v19  ;;  %v5033_v19 = vld [vmem:[%s6473_s5 + $0x1e0] ss:$12 sps:$4 sm:$0xff]  }
 0x1ca   : > { %2150 = vmatpush1.bf16.msra.mxu0 %v4962_v20  ;;  %1550 = vmatprep.subr.bf16.mxu1 %v4967_v22  ;;  %v5039_v20 = vld [vmem:[%s6473_s5 + $0x1fc] ss:$12 sps:$4 sm:$0xff]   ;;  %v5040_v22 = vld [vmem:[%s6473_s5 + $0x200] ss:$12 sps:$4 sm:$0xff]  }
 0x1cb   : > { %2151 = vmatprep.subr.bf16.mxu0 %v4970_v24  ;;  %v5037_v24 = vld [vmem:[%s6473_s5 + $0x1f8] ss:$12 sps:$4 sm:$0xff]  }
 0x1cd   : > { %1551 = vmatpush1.bf16.msra.mxu1 %v4965_v25  ;;  %v5043_v25 = vld [vmem:[%s6473_s5 + $0x214] ss:$12 sps:$4 sm:$0xff]  }
 0x1ce   : > { %2152 = vmatpush1.bf16.msra.mxu0 %v4968_v26  ;;  %1552 = vmatprep.subr.bf16.mxu1 %v4973_v27  ;;  %v5044_v26 = vld [vmem:[%s6473_s5 + $0x218] ss:$12 sps:$4 sm:$0xff]   ;;  %v5041_v27 = vld [vmem:[%s6473_s5 + $0x210] ss:$12 sps:$4 sm:$0xff]  }
 0x1cf   : > { %2153 = vmatprep.subr.bf16.mxu0 %v4976_v28  ;;  %v5047_v28 = vld [vmem:[%s6473_s5 + $0x22c] ss:$12 sps:$4 sm:$0xff]  }
 0x1d1   : > { %1553 = vmatpush1.bf16.msra.mxu1 %v4971_v30  ;;  %v5048_v30 = vld [vmem:[%s6473_s5 + $0x230] ss:$12 sps:$4 sm:$0xff]  }
 0x1d2   : > { %2154 = vmatpush1.bf16.msra.mxu0 %v4974_v31  ;;  %4447 = vmatprep.subr.bf16.mxu1 %v4980_v32  ;;  %v5045_v31 = vld [vmem:[%s6473_s5 + $0x228] ss:$12 sps:$4 sm:$0xff]  }
 0x1d3   : > { %2155 = vmatprep.subr.bf16.mxu0 %v4979_v33 }
 0x1d4   : > { %1571 = vmatmul.mubr.bf16.vlgmr.msra.gmra.mrb[8].mxu1 %v5545_v56 }
 0x1d5   : > { %4448 = vmatpush3.bf16.msra.mxu1 %v4981_v34  ;;  %2253 = vmatprep.mubr.bf16.mxu1 %v5441_v21  ;;  %v4991_v21 = vld [vmem:[%s6473_s5 + $0x38] ss:$12 sps:$4 sm:$0xff]  }
 0x1d6   : > { %2156 = vmatpush1.bf16.msra.mxu0 %v4977_v36  ;;  %4449 = vmatprep.subr.bf16.mxu1 %v4985_v37 }
 0x1d7   : > { %2157 = vmatprep.subr.bf16.mxu0 %v4984_v38 }
 0x1d9   : > { %4450 = vmatpush3.bf16.msra.mxu1 %v4986_v39 }
 0x1da   : > { %2158 = vmatpush1.bf16.msra.mxu0 %v4982_v41  ;;  %4451 = vmatprep.subr.bf16.mxu1 %v4990_v42 }
 0x1db   : > { %2159 = vmatprep.subr.bf16.mxu0 %v4989_v43 }
 0x1dd   : > { %4452 = vmatpush3.bf16.msra.mxu1 %v4991_v21 }
 0x1de   : > { %2160 = vmatpush1.bf16.msra.mxu0 %v4987_v44  ;;  %4453 = vmatprep.subr.bf16.mxu1 %v4995_v45 }
 0x1df   : > { %2161 = vmatprep.subr.bf16.mxu0 %v4994_v46 }
 0x1e1   : > { %4454 = vmatpush3.bf16.msra.mxu1 %v4996_v47 }
 0x1e2   : > { %2162 = vmatpush1.bf16.msra.mxu0 %v4992_v35  ;;  %4455 = vmatprep.subr.bf16.mxu1 %v5000_v48 }
 0x1e3   : > { %2163 = vmatprep.subr.bf16.mxu0 %v4999_v49 }
 0x1e5   : > { %4456 = vmatpush3.bf16.msra.mxu1 %v5001_v50 }
 0x1e6   : > { %2164 = vmatpush1.bf16.msra.mxu0 %v4997_v51  ;;  %4457 = vmatprep.subr.bf16.mxu1 %v5005_v52 }
 0x1e7   : > { %2165 = vmatprep.subr.bf16.mxu0 %v5004_v53 }
 0x1e9   : > { %4458 = vmatpush3.bf16.msra.mxu1 %v5006_v54 }
 0x1ea   : > { %2166 = vmatpush1.bf16.msra.mxu0 %v5002_v55  ;;  %4459 = vmatprep.subr.bf16.mxu1 %v5010_v57 }
 0x1eb   : > { %2167 = vmatprep.subr.bf16.mxu0 %v5009_v58 }
 0x1ed   : > { %4460 = vmatpush3.bf16.msra.mxu1 %v5011_v59 }
 0x1ee   : > { %2168 = vmatpush1.bf16.msra.mxu0 %v5007_v60  ;;  %4461 = vmatprep.subr.bf16.mxu1 %v5015_v61 }
 0x1ef   : > { %2169 = vmatprep.subr.bf16.mxu0 %v5014_v62 }
 0x1f1   : > { %4462 = vmatpush3.bf16.msra.mxu1 %v5016_v63 }
 0x1f2   : > { %2170 = vmatpush1.bf16.msra.mxu0 %v5012_v1  ;;  %4572 = vmatprep.subr.bf16.mxu1 %v5182_v0 }
 0x1f3   : > { %2180 = vmatprep.subr.bf16.mxu0 %v5019_v2 }
 0x1f4   : > { %2254 = vmatmul.mubr.bf16.vlgmr.msra.gmra.mrb[12].mxu1 %v5446_v23 }
 0x1f5   : > { %2172 = vmatmul.mubr.bf16.vlgmr.msra.gmra.mrb[12].mxu0 %v5446_v23  ;;  %4573 = vmatpush3.bf16.msra.mxu1 %v5020_v4  ;;  %v5028_v23 = vld [vmem:[%s6473_s5 + $0x1b8] ss:$12 sps:$4 sm:$0xff]  }
 0x1f6   : > { %2181 = vmatpush1.bf16.msra.mxu0 %v5017_v8  ;;  %4574 = vmatprep.subr.bf16.mxu1 %v5182_v0 }
 0x1f7   : > { %2182 = vmatprep.subr.bf16.mxu0 %v5023_v9  ;;  %2212 = vmatprep.mubr.bf16.mxu0 %v5183_v29 }
 0x1f8   : > { %4588 = vmatprep.mubr.msk.bf16.mxu1 %vm5184_vm0, %v5182_v0 }
 0x1f9   : > { %4575 = vmatpush3.bf16.msra.mxu1 %v5024_v10 }
 0x1fa   : > { %2183 = vmatpush1.bf16.msra.mxu0 %v5021_v11  ;;  %4576 = vmatprep.subr.bf16.mxu1 %v5182_v0 }
 0x1fb   : > { %2184 = vmatprep.subr.bf16.mxu0 %v5027_v12 }
 0x1fd   : > { %4577 = vmatpush3.bf16.msra.mxu1 %v5028_v23 }
 0x1fe   : > { %2185 = vmatpush1.bf16.msra.mxu0 %v5025_v13  ;;  %4578 = vmatprep.subr.bf16.mxu1 %v5182_v0 }
 0x1ff   : > { %2186 = vmatprep.subr.bf16.mxu0 %v5031_v14 }
 0x201   : > { %4579 = vmatpush3.bf16.msra.mxu1 %v5032_v15 }
 0x202   : > { %2187 = vmatpush1.bf16.msra.mxu0 %v5029_v16  ;;  %4580 = vmatprep.subr.bf16.mxu1 %v5182_v0 }
 0x203   : > { %2188 = vmatprep.subr.bf16.mxu0 %v5035_v17 }
 0x205   : > { %4581 = vmatpush3.bf16.msra.mxu1 %v5036_v18 }
 0x206   : > { %2189 = vmatpush1.bf16.msra.mxu0 %v5033_v19  ;;  %4582 = vmatprep.subr.bf16.mxu1 %v5182_v0  ;;  %v2304_v19 = vand.u32 127, %v335_v3 }
 0x207   : > { %2190 = vmatprep.subr.bf16.mxu0 %v5039_v20 }
 0x208   : > { %vm6032_vm3 = vcmp.ge.s32.totalorder %v5413_v5, %v2304_v19  ;;  %v5060_v19 = vld [vmem:[%s6474_s6 + $0x98] ss:$12 sps:$4 sm:$0xff]  }
 0x209   : > { %4583 = vmatpush3.bf16.msra.mxu1 %v5040_v22 }
 0x20a   : > { %2191 = vmatpush1.bf16.msra.mxu0 %v5037_v24  ;;  %4584 = vmatprep.subr.bf16.mxu1 %v5182_v0 }
 0x20b   : > { %2192 = vmatprep.subr.bf16.mxu0 %v5043_v25 }
 0x20d   : > { %4585 = vmatpush3.bf16.msra.mxu1 %v5044_v26 }
 0x20e   : > { %2193 = vmatpush1.bf16.msra.mxu0 %v5041_v27  ;;  %4586 = vmatprep.subr.bf16.mxu1 %v5182_v0 }
 0x20f   : > { %2194 = vmatprep.subr.bf16.mxu0 %v5047_v28 }
 0x211   : > { %4587 = vmatpush3.bf16.msra.mxu1 %v5048_v30 }
 0x212   : > { %2195 = vmatpush1.bf16.msra.mxu0 %v5045_v31  ;;  %4592 = vmatprep.subr.bf16.mxu1 %v5182_v0 }
 0x214   : > { %4589 = vmatmul.mubr.bf16.vlgmr.msra.gmra.mrb[16].mxu1 %v5545_v56 }
 0x215   : > { %2213 = vmatmul.mubr.bf16.vlgmr.msra.gmra.mrb[12].mxu0 %v5545_v56  ;;  %4594 = vmatprep.mubr.msk.bf16.mxu1 %vm5184_vm0, %v5182_v0 }
 0x216   : > { %2666 = vmatprep.mubr.bf16.mxu0 %v5183_v29 }
 0x227   : > { %v4401_v32 = vpop.f32.mrb[0].mxu1 }
 0x228   : > { %v4402_v33 = vpop.f32.mrb[1].mxu1 }
 0x229   : > { %v4403_v34 = vadd.f32 %v4402_v33, %v4401_v32  ;;  %v4404_v36 = vpop.f32.mrb[2].mxu1 }
 0x22a   : > { %v4405_v37 = vpop.f32.mrb[3].mxu1 }
 0x247   : > { %v930_v38 = vpop.f32.mrb[0].mxu0  ;;  %v1011_v39 = vpop.f32.mrb[4].mxu1 }
 0x248   : > { %v6010_v41 = vadd.f32 %v4403_v34, %v1011_v39  ;;  %v6012_v42 = vpop.f32.mrb[1].mxu0  ;;  %v4550_v43 = vpop.f32.mrb[5].mxu1  ;;  %v2306_v62 = vpack.c.bf16 %v930_v38, %v930_v38 }
 0x249   : > { %v934_v21 = vpop.f32.mrb[2].mxu0  ;;  %v1014_v44 = vpop.f32.mrb[6].mxu1 }
 0x24a   : > { %v935_v56 = vpop.f32.mrb[3].mxu0  ;;  %v4551_v45 = vpop.f32.mrb[7].mxu1 }
 0x268   : > { %v4432_v46 = vpop.f32.mrb[4].mxu0 }
 0x269   : > { %v4433_v47 = vpop.f32.mrb[5].mxu0 }
 0x26a   : > { %v4434_v35 = vadd.f32 %v4433_v47, %v4432_v46  ;;  %v4435_v48 = vpop.f32.mrb[6].mxu0 }
 0x26b   : > { %v4436_v49 = vpop.f32.mrb[7].mxu0 }
 0x288   : > { %v1653_v50 = vpop.f32.mrb[8].mxu0 }
 0x289   : > { %v6014_v51 = vadd.f32 %v4434_v35, %v1653_v50  ;;  %v4570_v52 = vpop.f32.mrb[9].mxu0 }
 0x28a   : > { %v1656_v53 = vpop.f32.mrb[10].mxu0 }
 0x28b   : > { %v4571_v54 = vpop.f32.mrb[11].mxu0 }
 0x2a7   : > { %v1572_v55 = vpop.f32.mrb[8].mxu1 }
 0x2a8   : > { %v2307_v57 = vpack.c.bf16 %v1572_v55, %v1572_v55  ;;  %v6016_v58 = vpop.f32.mrb[9].mxu1 }
 0x2a9   : > { %v1576_v59 = vpop.f32.mrb[10].mxu1 }
 0x2aa   : > { %v2314_v60 = vsel %vm2309_vm1, %v2307_v57, 0  ;;  %2439 = vrot.lane.b32.xlu0 %v2307_v57, %s5185_s15  ;;  %v1577_v61 = vpop.f32.mrb[11].mxu1 }
 0x2ab   : > { %4593 = vmatpush3.bf16.xpose.msra.mxu1 %v2314_v60  ;;  %v6058_v61 = vpack.c.bf16 %v6012_v42, %v6012_v42  ;;  %v5053_v42 = vld [vmem:[%s6474_s6 + $0x78] ss:$12 sps:$4 sm:$0xff]  }
 0x2ac   : > { %4598 = vmatprep.subr.bf16.mxu1 %v5182_v0 }
 0x2b2   : > { %4595 = vmatmul.mubr.msk.bf16.vlgmr.msra.gmra.mrb[20].mxu1 %vm2309_vm1, %v2306_v62 }
 0x2b3   : > { %4600 = vmatprep.mubr.msk.bf16.mxu1 %vm5184_vm0, %v5182_v0 }
 0x2c7   : > { %v4463_v63 = vpop.f32.mrb[12].mxu1 }
 0x2c8   : > { %v4464_v1 = vpop.f32.mrb[13].mxu1 }
 0x2c9   : > { %v4465_v2 = vadd.f32 %v4464_v1, %v4463_v63  ;;  %v4466_v4 = vpop.f32.mrb[14].mxu1  ;;  %v5051_v63 = vld [vmem:[%s6474_s6 + $0x64] ss:$12 sps:$4 sm:$0xff]   ;;  %v5055_v1 = vld [vmem:[%s6474_s6 + $0x7c] ss:$12 sps:$4 sm:$0xff]  }
 0x2ca   : > { %v4467_v8 = vpop.f32.mrb[15].mxu1  ;;  %2634 = vmatprep.subr.bf16.mxu0 %v5051_v63  ;;  %v5057_v4 = vld [vmem:[%s6474_s6 + $0x90] ss:$12 sps:$4 sm:$0xff]  }
 0x2cb   : > { %v5063_v8 = vld [vmem:[%s6474_s6 + $0xac] ss:$12 sps:$4 sm:$0xff]  }
 0x2e7   : > { %v2295_v9 = vpop.f32.mrb[16].mxu1 }
 0x2e8   : > { %v2214_v10 = vpop.f32.mrb[12].mxu0  ;;  %v6024_v11 = vadd.f32 %v4465_v2, %v2295_v9  ;;  %v4590_v12 = vpop.f32.mrb[17].mxu1  ;;  %v5059_v2 = vld [vmem:[%s6474_s6 + $0x94] ss:$12 sps:$4 sm:$0xff]  }
 0x2e9   : > { %v2308_v23 = vpack.c.bf16 %v2214_v10, %v2214_v10  ;;  %v6026_v13 = vpop.f32.mrb[13].mxu0  ;;  %v2298_v14 = vpop.f32.mrb[18].mxu1  ;;  %v5061_v9 = vld [vmem:[%s6474_s6 + $0xa8] ss:$12 sps:$4 sm:$0xff]  }
 0x2ea   : > { %v2218_v15 = vpop.f32.mrb[14].mxu0  ;;  %v4591_v16 = vpop.f32.mrb[19].mxu1 }
 0x2eb   : > { %v2376_v17 = vsel %vm2374_vm2, %v2308_v23, 0  ;;  %v2219_v18 = vpop.f32.mrb[15].mxu0  ;;  %v5052_v16 = vld [vmem:[%s6474_s6 + $0x68] ss:$12 sps:$4 sm:$0xff]  }
 0x2ec   : > { %4599 = vmatpush3.bf16.msra.mxu1 %v2376_v17  ;;  %v5056_v18 = vld [vmem:[%s6474_s6 + $0x80] ss:$12 sps:$4 sm:$0xff]  }
 0x2ed   : > { %4604 = vmatprep.subr.bf16.mxu1 %v5182_v0 }
 0x31c   : > { %v2440_v38 = vpop.permute.xlu0 %2439 }
 0x31d   : > { %v2445_v43 = vsel %vm2309_vm1, %v2440_v38, 0  ;;  %v5079_v38 = vld [vmem:[%s6474_s6 + $0x4c] ss:$12 sps:$4 sm:$0xff]  }
 0x385   : > { %v2350_v20 = vpop.f32.mrb[20].mxu1 }
 0x386   : > { %v2356_v24 = vmul.f32 0.125, %v2350_v20  ;;  %v4596_v25 = vpop.f32.mrb[21].mxu1  ;;  %v5064_v20 = vld [vmem:[%s6474_s6 + $0xb0] ss:$12 sps:$4 sm:$0xff]  }
 0x387   : > { %v2353_v26 = vpop.f32.mrb[22].mxu1 }
 0x388   : > { %v4597_v27 = vpop.f32.mrb[23].mxu1  ;;  %v2357_v28 = vsel %vm6032_vm3, %v2356_v24, -inf  ;;  %v5067_v24 = vld [vmem:[%s6474_s6 + $0x4] ss:$12 sps:$4 sm:$0xff]   ;;  %v5065_v26 = vld [vmem:[%s6474_s6] ss:$12 sps:$4 sm:$0xff]  }
 0x389   : > { %v2359_v30 = vsel %vm2358_vm4, %v2357_v28, -inf  ;;  %v5068_v27 = vld [vmem:[%s6474_s6 + $0x8] ss:$12 sps:$4 sm:$0xff]  }
 0x38a   : > { %2360 = vmax.xlane.f32.xlu1 %v2359_v30 }
 0x417   : > { %v2361_v31 = vpop.xlane.xlu1 %2360 }
 0x418   : > { %v2362_v32 = vsub.f32 %v2357_v28, %v2361_v31  ;;  %v5071_v31 = vld [vmem:[%s6474_s6 + $0x1c] ss:$12 sps:$4 sm:$0xff]  }
 0x41a   : > { %v2363_v3 = vmul.f32 1.442695, %v2362_v32 }
 0x41c   : > { %5147 = vpow2.f32 %v2363_v3 }
 0x426   : > { %v5148_v33 = vpop.eup %5147 }
 0x427   : > { %v2365_v5 = vsel %vm2358_vm4, %v5148_v33, 0.0 }
 0x428   : > { %2366 = vadd.xlane.f32.xlu1 %v2365_v5  ;;  %v5072_v5 = vld [vmem:[%s6474_s6 + $0x20] ss:$12 sps:$4 sm:$0xff]  }
 0x439   : > { %2436 = vrot.lane.b32.xlu1 %v2306_v62, %s5185_s15  ;;  %v5049_v62 = vld [vmem:[%s6474_s6 + $0x60] ss:$12 sps:$4 sm:$0xff]  }
 0x43a   : > { %2635 = vmatpush1.bf16.msra.mxu0 %v5049_v62 }
 0x43b   : > { %2636 = vmatprep.subr.bf16.mxu0 %v5055_v1 }
 0x43e   : > { %2637 = vmatpush1.bf16.msra.mxu0 %v5053_v42 }
 0x43f   : > { %2638 = vmatprep.subr.bf16.mxu0 %v5059_v2 }
 0x442   : > { %2639 = vmatpush1.bf16.msra.mxu0 %v5057_v4 }
 0x443   : > { %2640 = vmatprep.subr.bf16.mxu0 %v5063_v8 }
 0x446   : > { %2641 = vmatpush1.bf16.msra.mxu0 %v5061_v9 }
 0x447   : > { %2782 = vmatprep.subr.bf16.mxu0 %v5067_v24  ;;  %v5086_v24 = vld [vmem:[%s6474_s6 + $0xdc] ss:$12 sps:$4 sm:$0xff]  }
 0x4b5   : > { %v2367_v34 = vpop.xlane.xlu1 %2366 }
 0x4b6   : > { %5149 = vrcp.f32 %v2367_v34  ;;  %v5075_v34 = vld [vmem:[%s6474_s6 + $0x34] ss:$12 sps:$4 sm:$0xff]  }
 0x4b9   : > { %v2437_v21 = vpop.permute.xlu1 %2436 }
 0x4c0   : > { %v5150_v36 = vpop.eup %5149 }
 0x4c1   : > { %v2369_v37 = vmul.f32 %v5150_v36, %v5148_v33  ;;  %v5069_v33 = vld [vmem:[%s6474_s6 + $0x18] ss:$12 sps:$4 sm:$0xff]   ;;  %v5073_v36 = vld [vmem:[%s6474_s6 + $0x30] ss:$12 sps:$4 sm:$0xff]  }
 0x4c3   : > { %v2370_v39 = vpack.c.bf16 %v2369_v37, %v2369_v37  ;;  %v5076_v37 = vld [vmem:[%s6474_s6 + $0x38] ss:$12 sps:$4 sm:$0xff]  }
 0x4c5   : > { %4601 = vmatmul.mubr.msk.bf16.vlgmr.msra.gmra.mrb[24].mxu1 %vm2358_vm4, %v2370_v39  ;;  %v5077_v39 = vld [vmem:[%s6474_s6 + $0x48] ss:$12 sps:$4 sm:$0xff]  }
 0x4c6   : > { %4605 = vmatpush3.bf16.xpose.msra.mxu1 %v2445_v43  ;;  %4606 = vmatprep.mubr.msk.bf16.mxu1 %vm5184_vm0, %v5182_v0  ;;  %v5080_v43 = vld [vmem:[%s6474_s6 + $0x50] ss:$12 sps:$4 sm:$0xff]  }
 0x4c7   : > { %4610 = vmatprep.subr.bf16.mxu1 %v5182_v0 }
 0x4cd   : > { %4607 = vmatmul.mubr.msk.bf16.vlgmr.msra.gmra.mrb[28].mxu1 %vm2309_vm1, %v2437_v21  ;;  %v6153_v21 = vpack.c.bf16 %v6026_v13, %v6026_v13  ;;  %v2864_v13 = vpack.c.bf16 %v6016_v58, %v6016_v58 }
 0x4ce   : > { %4612 = vmatprep.mubr.msk.bf16.mxu1 %vm5184_vm0, %v5182_v0 }
 0x598   : > { %v6049_v44 = vpop.f32.mrb[24].mxu1 }
 0x599   : > { %v4602_v56 = vpop.f32.mrb[25].mxu1 }
 0x59a   : > { %v2415_v45 = vpop.f32.mrb[26].mxu1  ;;  %v2418_v56 = vpack.c.bf16 %v6049_v44, %v6049_v44  ;;  %v2870_v44 = vsel %vm2309_vm1, %v2864_v13, 0 }
 0x59b   : > { %v4603_v46 = vpop.f32.mrb[27].mxu1  ;;  %v2930_v45 = vsel %vm2374_vm2, %v6153_v21, 0 }
 0x5a0   : > { %v2481_v47 = vpop.f32.mrb[28].mxu1 }
 0x5a1   : > { %v2487_v35 = vmul.f32 0.125, %v2481_v47  ;;  %v4608_v48 = vpop.f32.mrb[29].mxu1 }
 0x5a2   : > { %v2484_v49 = vpop.f32.mrb[30].mxu1 }
 0x5a3   : > { %v4609_v50 = vpop.f32.mrb[31].mxu1  ;;  %v2488_v52 = vsel %vm6032_vm3, %v2487_v35, -inf }
 0x5a4   : > { %v2489_v53 = vsel %vm2358_vm4, %v2488_v52, -inf }
 0x5a5   : > { %2490 = vmax.xlane.f32.xlu1 %v2489_v53 }
 0x632   : > { %v2491_v54 = vpop.xlane.xlu1 %2490 }
 0x633   : > { %v2492_v55 = vsub.f32 %v2488_v52, %v2491_v54 }
 0x635   : > { %v2493_v57 = vmul.f32 1.442695, %v2492_v55 }
 0x637   : > { %5151 = vpow2.f32 %v2493_v57 }
 0x641   : > { %v5152_v59 = vpop.eup %5151 }
 0x642   : > { %v2495_v60 = vsel %vm2358_vm4, %v5152_v59, 0.0 }
 0x643   : > { %2496 = vadd.xlane.f32.xlu0 %v2495_v60 }
 0x659   : > { %2502 = vrot.lane.b32.xlu0 %v2308_v23, %s5185_s15 }
 0x65d   : > { %3141 = vrot.lane.b32.xlu0 %v6058_v61, %s5185_s15 }
 0x6d0   : > { %v2497_v10 = vpop.xlane.xlu0 %2496 }
 0x6d1   : > { %5153 = vrcp.f32 %v2497_v10 }
 0x6d4   : > { %v2503_v12 = vpop.permute.xlu0 %2502 }
 0x6d5   : > { %v2508_v23 = vsel %vm2374_vm2, %v2503_v12, 0 }
 0x6d6   : > { %4611 = vmatpush3.bf16.msra.mxu1 %v2508_v23 }
 0x6d7   : > { %4616 = vmatprep.subr.bf16.mxu1 %v5182_v0 }
 0x6db   : > { %v5154_v14 = vpop.eup %5153 }
 0x6dc   : > { %v2499_v15 = vmul.f32 %v5154_v14, %v5152_v59 }
 0x6de   : > { %v2500_v17 = vpack.c.bf16 %v2499_v15, %v2499_v15 }
 0x6e0   : > { %4613 = vmatmul.mubr.msk.bf16.vlgmr.msra.gmra.mrb[32].mxu1 %vm2358_vm4, %v2500_v17 }
 0x6e1   : > { %4617 = vmatpush3.bf16.msra.mxu1 %v5052_v16  ;;  %4624 = vmatprep.mubr.msk.bf16.mxu1 %vm5184_vm0, %v5182_v0 }
 0x6e2   : > { %4618 = vmatprep.subr.bf16.mxu1 %v5182_v0 }
 0x6e5   : > { %4619 = vmatpush3.bf16.msra.mxu1 %v5056_v18 }
 0x6e6   : > { %4620 = vmatprep.subr.bf16.mxu1 %v5182_v0 }
 0x6e9   : > { %4621 = vmatpush3.bf16.msra.mxu1 %v5060_v19  ;;  %v5081_v19 = vld [vmem:[%s6474_s6 + $0xc0] ss:$12 sps:$4 sm:$0xff]  }
 0x6ea   : > { %4622 = vmatprep.subr.bf16.mxu1 %v5182_v0 }
 0x6ed   : > { %4623 = vmatpush3.bf16.msra.mxu1 %v5064_v20  ;;  %v5083_v20 = vld [vmem:[%s6474_s6 + $0xc4] ss:$12 sps:$4 sm:$0xff]  }
 0x6ee   : > { %4628 = vmatprep.subr.bf16.mxu1 %v5182_v0 }
 0x7b3   : > { %v2544_v25 = vpop.f32.mrb[32].mxu1 }
 0x7b4   : > { %v2550_v28 = vpack.c.bf16 %v2544_v25, %v2544_v25  ;;  %v4614_v30 = vpop.f32.mrb[33].mxu1  ;;  %v5084_v25 = vld [vmem:[%s6474_s6 + $0xd8] ss:$12 sps:$4 sm:$0xff]  }
 0x7b5   : > { %v2547_v32 = vpop.f32.mrb[34].mxu1  ;;  %v5092_v30 = vld [vmem:[%s6474_s6 + $0x108] ss:$12 sps:$4 sm:$0xff]  }
 0x7b6   : > { %v4615_v3 = vpop.f32.mrb[35].mxu1  ;;  %4303 = vmatmul.mubr.msk.bf16.vlgmr.msra.gmra.mrb[16].mxu0 %vm2309_vm1, %v2550_v28  ;;  %4625 = vmatmul.mubr.msk.bf16.vlgmr.msra.gmra.mrb[36].mxu1 %vm2309_vm1, %v2550_v28  ;;  %v5094_v28 = vld [vmem:[%s6474_s6 + $0x10c] ss:$12 sps:$4 sm:$0xff]  }
 0x7b7   : > { %2783 = vmatpush1.bf16.msra.mxu0 %v5065_v26  ;;  %4629 = vmatpush3.bf16.msra.mxu1 %v5068_v27  ;;  %v5090_v26 = vld [vmem:[%s6474_s6 + $0xf4] ss:$12 sps:$4 sm:$0xff]   ;;  %v5088_v27 = vld [vmem:[%s6474_s6 + $0xf0] ss:$12 sps:$4 sm:$0xff]  }
 0x7b8   : > { %2784 = vmatprep.subr.bf16.mxu0 %v5071_v31  ;;  %4630 = vmatprep.subr.bf16.mxu1 %v5182_v0 }
 0x7b9   : > { %2814 = vmatprep.mubr.bf16.mxu0 %v5183_v29  ;;  %4636 = vmatprep.mubr.msk.bf16.mxu1 %vm5184_vm0, %v5182_v0 }
 0x7bb   : > { %2785 = vmatpush1.bf16.msra.mxu0 %v5069_v33  ;;  %4631 = vmatpush3.bf16.msra.mxu1 %v5072_v5  ;;  %v5087_v33 = vld [vmem:[%s6474_s6 + $0xc8] ss:$12 sps:$4 sm:$0xff]  }
 0x7bc   : > { %2786 = vmatprep.subr.bf16.mxu0 %v5075_v34  ;;  %4632 = vmatprep.subr.bf16.mxu1 %v5182_v0  ;;  %v5091_v34 = vld [vmem:[%s6474_s6 + $0xe0] ss:$12 sps:$4 sm:$0xff]  }
 0x7bf   : > { %2787 = vmatpush1.bf16.msra.mxu0 %v5073_v36  ;;  %4633 = vmatpush3.bf16.msra.mxu1 %v5076_v37  ;;  %v5095_v36 = vld [vmem:[%s6474_s6 + $0xf8] ss:$12 sps:$4 sm:$0xff]   ;;  %v5096_v37 = vld [vmem:[%s6474_s6 + $0x110] ss:$12 sps:$4 sm:$0xff]  }
 0x7c0   : > { %2788 = vmatprep.subr.bf16.mxu0 %v5079_v38  ;;  %4634 = vmatprep.subr.bf16.mxu1 %v5182_v0 }
 0x7c3   : > { %2789 = vmatpush1.bf16.msra.mxu0 %v5077_v39  ;;  %4635 = vmatpush3.bf16.msra.mxu1 %v5080_v43 }
 0x7c4   : > { %4646 = vmatprep.subr.bf16.mxu1 %v5182_v0  ;;  %4640 = vmatprep.subr.bf16.mxu0 %v5182_v0 }
 0x7c6   : > { %4317 = vmatmul.mubr.msk.bf16.vlgmr.msra.gmra.mrb[20].mxu0 %vm2309_vm1, %v2418_v56  ;;  %4637 = vmatmul.mubr.msk.bf16.vlgmr.msra.gmra.mrb[40].mxu1 %vm2309_vm1, %v2418_v56 }
 0x7c7   : > { %4647 = vmatpush3.bf16.msra.mxu1 %v2930_v45  ;;  %4642 = vmatprep.mubr.msk.bf16.mxu0 %vm5184_vm0, %v5182_v0 }
 0x7c8   : > { %4648 = vmatprep.mubr.msk.bf16.mxu1 %vm5184_vm0, %v5182_v0  ;;  %4652 = vmatprep.subr.bf16.mxu1 %v5182_v0 }
 0x7cc   : > { %4641 = vmatpush3.bf16.xpose.msra.mxu0 %v2870_v44 }
 0x7cd   : > { %3056 = vmatprep.subr.bf16.mxu0 %v5083_v20 }
 0x7d3   : > { %4643 = vmatmul.mubr.msk.bf16.vlgmr.msra.gmra.mrb[24].mxu0 %vm2309_vm1, %v6058_v61 }
 0x7d4   : > { %3088 = vmatprep.mubr.bf16.mxu0 %v5183_v29  ;;  %3057 = vmatpush1.bf16.msra.mxu0 %v5081_v19 }
 0x7d5   : > { %3058 = vmatprep.subr.bf16.mxu0 %v5086_v24 }
 0x7d8   : > { %3059 = vmatpush1.bf16.msra.mxu0 %v5084_v25 }
 0x7d9   : > { %3060 = vmatprep.subr.bf16.mxu0 %v5090_v26 }
 0x7dc   : > { %3061 = vmatpush1.bf16.msra.mxu0 %v5088_v27  ;;  %v5103_v27 = vld [vmem:[%s6474_s6 + $0x128] ss:$12 sps:$4 sm:$0xff]  }
 0x7dd   : > { %3062 = vmatprep.subr.bf16.mxu0 %v5094_v28 }
 0x7e0   : > { %3063 = vmatpush1.bf16.msra.mxu0 %v5092_v30  ;;  %v5107_v30 = vld [vmem:[%s6474_s6 + $0x140] ss:$12 sps:$4 sm:$0xff]  }
 0x7e1   : > { %4664 = vmatprep.subr.bf16.mxu0 %v5182_v0 }
 0x889   : > { %v2668_v46 = vpop.f32.mrb[16].mxu0  ;;  %v2709_v47 = vpop.f32.mrb[36].mxu1 }
 0x88a   : > { %v2670_v58 = vpop.f32.mrb[17].mxu0  ;;  %v4626_v35 = vpop.f32.mrb[37].mxu1 }
 0x88b   : > { %v2672_v48 = vpop.f32.mrb[18].mxu0  ;;  %v2712_v49 = vpop.f32.mrb[38].mxu1 }
 0x88c   : > { %v2673_v50 = vpop.f32.mrb[19].mxu0  ;;  %v4627_v52 = vpop.f32.mrb[39].mxu1 }
 0x899   : > { %v2816_v53 = vpop.f32.mrb[20].mxu0  ;;  %v2857_v54 = vpop.f32.mrb[40].mxu1 }
 0x89a   : > { %v6174_v55 = vadd.f32 %v2816_v53, %v2668_v46  ;;  %v6176_v57 = vadd.f32 %v2857_v54, %v2709_v47  ;;  %v2818_v59 = vpop.f32.mrb[21].mxu0  ;;  %v4638_v60 = vpop.f32.mrb[41].mxu1 }
 0x89b   : > { %v6178_v62 = vadd.f32 %v2818_v59, %v2670_v58  ;;  %v2820_v61 = vpop.f32.mrb[22].mxu0  ;;  %v2860_v63 = vpop.f32.mrb[42].mxu1 }
 0x89c   : > { %v2821_v1 = vpop.f32.mrb[23].mxu0  ;;  %v4639_v42 = vpop.f32.mrb[43].mxu1 }
 0x89d   : > { %v3142_v46 = vpop.permute.xlu0 %3141 }
 0x8a6   : > { %v2906_v2 = vpop.f32.mrb[24].mxu0 }
 0x8a7   : > { %v2912_v4 = vmul.f32 0.125, %v2906_v2  ;;  %v4644_v8 = vpop.f32.mrb[25].mxu0 }
 0x8a8   : > { %v2909_v9 = vpop.f32.mrb[26].mxu0 }
 0x8a9   : > { %v4645_v10 = vpop.f32.mrb[27].mxu0  ;;  %v2913_v12 = vsel %vm6032_vm3, %v2912_v4, -inf }
 0x8aa   : > { %v2914_v23 = vsel %vm2358_vm4, %v2913_v12, -inf }
 0x8ab   : > { %2915 = vmax.xlane.f32.xlu1 %v2914_v23  ;;  %v5097_v23 = vld [vmem:[%s6474_s6 + $0x120] ss:$12 sps:$4 sm:$0xff]  }
 0x938   : > { %v2916_v14 = vpop.xlane.xlu1 %2915 }
 0x939   : > { %v2917_v15 = vsub.f32 %v2913_v12, %v2916_v14  ;;  %v3423_v12 = vpack.c.bf16 %v6010_v41, %v6010_v41  ;;  %v5099_v14 = vld [vmem:[%s6474_s6 + $0x124] ss:$12 sps:$4 sm:$0xff]  }
 0x93a   : > { %v5100_v41 = vld [vmem:[%s6474_s6 + $0x138] ss:$12 sps:$4 sm:$0xff]  }
 0x93b   : > { %v2918_v16 = vmul.f32 1.442695, %v2917_v15  ;;  %v5102_v15 = vld [vmem:[%s6474_s6 + $0x13c] ss:$12 sps:$4 sm:$0xff]  }
 0x93d   : > { %5155 = vpow2.f32 %v2918_v16  ;;  %v5104_v16 = vld [vmem:[%s6474_s6 + $0x150] ss:$12 sps:$4 sm:$0xff]  }
 0x947   : > { %v5156_v17 = vpop.eup %5155 }
 0x948   : > { %v2920_v18 = vsel %vm2358_vm4, %v5156_v17, 0.0 }
 0x949   : > { %2921 = vadd.xlane.f32.xlu1 %v2920_v18  ;;  %v5108_v18 = vld [vmem:[%s6474_s6 + $0x168] ss:$12 sps:$4 sm:$0xff]  }
 0x95a   : > { %3144 = vrot.lane.b32.xlu1 %v2864_v13, %s5185_s15 }
 0x9d6   : > { %v2922_v31 = vpop.xlane.xlu1 %2921 }
 0x9d7   : > { %5157 = vrcp.f32 %v2922_v31  ;;  %v5111_v31 = vld [vmem:[%s6474_s6 + $0x158] ss:$12 sps:$4 sm:$0xff]  }
 0x9da   : > { %v3145_v38 = vpop.permute.xlu1 %3144 }
 0x9db   : > { %v3150_v13 = vsel %vm2309_vm1, %v3145_v38, 0 }
 0x9e1   : > { %v5158_v32 = vpop.eup %5157 }
 0x9e2   : > { %v2924_v3 = vmul.f32 %v5158_v32, %v5156_v17  ;;  %v5110_v17 = vld [vmem:[%s6474_s6 + $0x16c] ss:$12 sps:$4 sm:$0xff]   ;;  %v5112_v32 = vld [vmem:[%s6474_s6 + $0x170] ss:$12 sps:$4 sm:$0xff]  }
 0x9e4   : > { %v2925_v5 = vpack.c.bf16 %v2924_v3, %v2924_v3  ;;  %v3424_v3 = vpack.c.bf16 %v6014_v51, %v6014_v51 }
 0x9e6   : > { %4649 = vmatmul.mubr.msk.bf16.vlgmr.msra.gmra.mrb[44].mxu1 %vm2358_vm4, %v2925_v5  ;;  %v3430_v38 = vsel %vm2309_vm1, %v3424_v3, 0 }
 0x9e7   : > { %4653 = vmatpush3.bf16.msra.mxu1 %v5087_v33  ;;  %4660 = vmatprep.mubr.msk.bf16.mxu1 %vm5184_vm0, %v5182_v0  ;;  %v6306_v33 = vpack.c.bf16 %v6024_v11, %v6024_v11 }
 0x9e8   : > { %4654 = vmatprep.subr.bf16.mxu1 %v5182_v0 }
 0x9eb   : > { %4655 = vmatpush3.bf16.msra.mxu1 %v5091_v34 }
 0x9ec   : > { %4656 = vmatprep.subr.bf16.mxu1 %v5182_v0 }
 0x9ef   : > { %4657 = vmatpush3.bf16.msra.mxu1 %v5095_v36 }
 0x9f0   : > { %4658 = vmatprep.subr.bf16.mxu1 %v5182_v0 }
 0x9f3   : > { %4659 = vmatpush3.bf16.msra.mxu1 %v5096_v37 }
 0x9f4   : > { %4670 = vmatprep.subr.bf16.mxu1 %v5182_v0 }
 0xab9   : > { %v2966_v39 = vpop.f32.mrb[44].mxu1 }
 0xaba   : > { %v2972_v43 = vpack.c.bf16 %v2966_v39, %v2966_v39  ;;  %v4650_v56 = vpop.f32.mrb[45].mxu1  ;;  %v3490_v39 = vsel %vm2374_vm2, %v6306_v33, 0 }
 0xabb   : > { %v2969_v45 = vpop.f32.mrb[46].mxu1 }
 0xabc   : > { %v4651_v44 = vpop.f32.mrb[47].mxu1  ;;  %4333 = vmatmul.mubr.msk.bf16.vlgmr.msra.gmra.mrb[28].mxu0 %vm2309_vm1, %v2972_v43  ;;  %4661 = vmatmul.mubr.msk.bf16.vlgmr.msra.gmra.mrb[48].mxu1 %vm2309_vm1, %v2972_v43 }
 0xabd   : > { %4665 = vmatpush3.bf16.xpose.msra.mxu0 %v3150_v13  ;;  %4666 = vmatprep.mubr.msk.bf16.mxu0 %vm5184_vm0, %v5182_v0 }
 0xabe   : > { %4672 = vmatprep.mubr.msk.bf16.mxu1 %vm5184_vm0, %v5182_v0  ;;  %3339 = vmatprep.subr.bf16.mxu0 %v5099_v14 }
 0xac4   : > { %4667 = vmatmul.mubr.msk.bf16.vlgmr.msra.gmra.mrb[32].mxu0 %vm2309_vm1, %v3142_v46 }
 0xac5   : > { %3371 = vmatprep.mubr.bf16.mxu0 %v5183_v29  ;;  %3340 = vmatpush1.bf16.msra.mxu0 %v5097_v23 }
 0xac6   : > { %3341 = vmatprep.subr.bf16.mxu0 %v5102_v15 }
 0xac9   : > { %3342 = vmatpush1.bf16.msra.mxu0 %v5100_v41  ;;  %v5119_v41 = vld [vmem:[%s6474_s6 + $0x188] ss:$12 sps:$4 sm:$0xff]  }
 0xb8f   : > { %v3090_v47 = vpop.f32.mrb[28].mxu0  ;;  %v3131_v58 = vpop.f32.mrb[48].mxu1 }
 0xb90   : > { %v6239_v35 = vadd.f32 %v3090_v47, %v6174_v55  ;;  %v6242_v48 = vadd.f32 %v3131_v58, %v6176_v57  ;;  %v3092_v49 = vpop.f32.mrb[29].mxu0  ;;  %v4662_v50 = vpop.f32.mrb[49].mxu1 }
 0xb91   : > { %v6245_v52 = vadd.f32 %v3092_v49, %v6178_v62  ;;  %v3094_v53 = vpop.f32.mrb[30].mxu0  ;;  %v3134_v54 = vpop.f32.mrb[50].mxu1 }
 0xb92   : > { %v3095_v59 = vpop.f32.mrb[31].mxu0  ;;  %v4663_v60 = vpop.f32.mrb[51].mxu1 }
 0xb97   : > { %v3186_v61 = vpop.f32.mrb[32].mxu0 }
 0xb98   : > { %v3192_v63 = vmul.f32 0.125, %v3186_v61  ;;  %v4668_v1 = vpop.f32.mrb[33].mxu0 }
 0xb99   : > { %v3189_v42 = vpop.f32.mrb[34].mxu0 }
 0xb9a   : > { %v4669_v2 = vpop.f32.mrb[35].mxu0  ;;  %v3193_v55 = vsel %vm6032_vm3, %v3192_v63, -inf }
 0xb9b   : > { %v3194_v57 = vsel %vm2358_vm4, %v3193_v55, -inf }
 0xb9c   : > { %3195 = vmax.xlane.f32.xlu1 %v3194_v57  ;;  %v5115_v57 = vld [vmem:[%s6474_s6 + $0x184] ss:$12 sps:$4 sm:$0xff]  }
 0xc29   : > { %v3196_v4 = vpop.xlane.xlu1 %3195 }
 0xc2a   : > { %v3197_v8 = vsub.f32 %v3193_v55, %v3196_v4  ;;  %v5113_v55 = vld [vmem:[%s6474_s6 + $0x180] ss:$12 sps:$4 sm:$0xff]   ;;  %v5118_v4 = vld [vmem:[%s6474_s6 + $0x19c] ss:$12 sps:$4 sm:$0xff]  }
 0xc2c   : > { %v3198_v9 = vmul.f32 1.442695, %v3197_v8  ;;  %v5116_v8 = vld [vmem:[%s6474_s6 + $0x198] ss:$12 sps:$4 sm:$0xff]  }
 0xc2e   : > { %5159 = vpow2.f32 %v3198_v9  ;;  %v5122_v9 = vld [vmem:[%s6474_s6 + $0x1b4] ss:$12 sps:$4 sm:$0xff]  }
 0xc38   : > { %v5160_v62 = vpop.eup %5159 }
 0xc39   : > { %v3200_v10 = vsel %vm2358_vm4, %v5160_v62, 0.0 }
 0xc3a   : > { %3201 = vadd.xlane.f32.xlu0 %v3200_v10  ;;  %v5126_v10 = vld [vmem:[%s6474_s6 + $0x1cc] ss:$12 sps:$4 sm:$0xff]  }
 0xc50   : > { %3207 = vrot.lane.b32.xlu0 %v6153_v21, %s5185_s15  ;;  %v5106_v21 = vld [vmem:[%s6474_s6 + $0x154] ss:$12 sps:$4 sm:$0xff]  }
 0xc51   : > { %3343 = vmatprep.subr.bf16.mxu0 %v5106_v21 }
 0xc52   : > { %3344 = vmatpush1.bf16.msra.mxu0 %v5104_v16  ;;  %v5123_v16 = vld [vmem:[%s6474_s6 + $0x1a0] ss:$12 sps:$4 sm:$0xff]  }
 0xc53   : > { %3345 = vmatprep.subr.bf16.mxu0 %v5110_v17  ;;  %v5127_v17 = vld [vmem:[%s6474_s6 + $0x1b8] ss:$12 sps:$4 sm:$0xff]  }
 0xc54   : > { %3701 = vrot.lane.b32.xlu0 %v3423_v12, %s5185_s15 }
 0xc56   : > { %3346 = vmatpush1.bf16.msra.mxu0 %v5108_v18  ;;  %v5128_v18 = vld [vmem:[%s6474_s6 + $0x1d0] ss:$12 sps:$4 sm:$0xff]  }
 0xc57   : > { %4688 = vmatprep.subr.bf16.mxu0 %v5182_v0 }
 0xcc7   : > { %v3202_v19 = vpop.xlane.xlu0 %3201 }
 0xcc8   : > { %5161 = vrcp.f32 %v3202_v19 }
 0xccb   : > { %v3208_v20 = vpop.permute.xlu0 %3207 }
 0xccc   : > { %v3213_v24 = vsel %vm2374_vm2, %v3208_v20, 0 }
 0xccd   : > { %4671 = vmatpush3.bf16.msra.mxu1 %v3213_v24 }
 0xcce   : > { %4676 = vmatprep.subr.bf16.mxu1 %v5182_v0 }
 0xcd2   : > { %v5162_v25 = vpop.eup %5161 }
 0xcd3   : > { %v3204_v26 = vmul.f32 %v5162_v25, %v5160_v62  ;;  %v5120_v62 = vld [vmem:[%s6474_s6 + $0x1b0] ss:$12 sps:$4 sm:$0xff]  }
 0xcd5   : > { %v3205_v28 = vpack.c.bf16 %v3204_v26, %v3204_v26 }
 0xcd7   : > { %4673 = vmatmul.mubr.msk.bf16.vlgmr.msra.gmra.mrb[52].mxu1 %vm2358_vm4, %v3205_v28 }
 0xcd8   : > { %4677 = vmatpush3.bf16.msra.mxu1 %v5103_v27  ;;  %4684 = vmatprep.mubr.msk.bf16.mxu1 %vm5184_vm0, %v5182_v0 }
 0xcd9   : > { %4678 = vmatprep.subr.bf16.mxu1 %v5182_v0 }
 0xcdc   : > { %4679 = vmatpush3.bf16.msra.mxu1 %v5107_v30  ;;  %v3702_v30 = vpop.permute.xlu0 %3701 }
 0xcdd   : > { %4680 = vmatprep.subr.bf16.mxu1 %v5182_v0 }
 0xce0   : > { %4681 = vmatpush3.bf16.msra.mxu1 %v5111_v31 }
 0xce1   : > { %4682 = vmatprep.subr.bf16.mxu1 %v5182_v0 }
 0xce4   : > { %4683 = vmatpush3.bf16.msra.mxu1 %v5112_v32 }
 0xce5   : > { %4694 = vmatprep.subr.bf16.mxu1 %v5182_v0 }
 0xdaa   : > { %v3249_v5 = vpop.f32.mrb[52].mxu1 }
 0xdab   : > { %v3255_v34 = vpack.c.bf16 %v3249_v5, %v3249_v5  ;;  %v4674_v36 = vpop.f32.mrb[53].mxu1 }
 0xdac   : > { %v3252_v37 = vpop.f32.mrb[54].mxu1 }
 0xdad   : > { %v4675_v43 = vpop.f32.mrb[55].mxu1  ;;  %4349 = vmatmul.mubr.msk.bf16.vlgmr.msra.gmra.mrb[36].mxu0 %vm2309_vm1, %v3255_v34  ;;  %4685 = vmatmul.mubr.msk.bf16.vlgmr.msra.gmra.mrb[56].mxu1 %vm2309_vm1, %v3255_v34 }
 0xdae   : > { %4689 = vmatpush3.bf16.xpose.msra.mxu0 %v3430_v38  ;;  %4695 = vmatpush3.bf16.msra.mxu1 %v3490_v39 }
 0xdaf   : > { %4690 = vmatprep.mubr.msk.bf16.mxu0 %vm5184_vm0, %v5182_v0  ;;  %4696 = vmatprep.mubr.msk.bf16.mxu1 %vm5184_vm0, %v5182_v0 }
 0xdb0   : > { %4700 = vmatprep.subr.bf16.mxu1 %v5182_v0  ;;  %3616 = vmatprep.subr.bf16.mxu0 %v5115_v57 }
 0xdb5   : > { %4691 = vmatmul.mubr.msk.bf16.vlgmr.msra.gmra.mrb[40].mxu0 %vm2309_vm1, %v3423_v12  ;;  %v5124_v12 = vld [vmem:[%s6474_s6 + $0x1c8] ss:$12 sps:$4 sm:$0xff]  }
 0xdb6   : > { %3648 = vmatprep.mubr.bf16.mxu0 %v5183_v29  ;;  %3617 = vmatpush1.bf16.msra.mxu0 %v5113_v55  ;;  %v5132_v55 = vld [vmem:[%s6474_s6 + $0x1e8] ss:$12 sps:$4 sm:$0xff]  }
 0xdb7   : > { %3618 = vmatprep.subr.bf16.mxu0 %v5118_v4  ;;  %v5136_v4 = vld [vmem:[%s6474_s6 + $0x200] ss:$12 sps:$4 sm:$0xff]  }
 0xdba   : > { %3619 = vmatpush1.bf16.msra.mxu0 %v5116_v8  ;;  %v5140_v8 = vld [vmem:[%s6474_s6 + $0x218] ss:$12 sps:$4 sm:$0xff]  }
 0xdbb   : > { %3620 = vmatprep.subr.bf16.mxu0 %v5122_v9  ;;  %v5144_v9 = vld [vmem:[%s6474_s6 + $0x230] ss:$12 sps:$4 sm:$0xff]  }
 0xdbe   : > { %3621 = vmatpush1.bf16.msra.mxu0 %v5120_v62 }
 0xdbf   : > { %3622 = vmatprep.subr.bf16.mxu0 %v5126_v10 }
 0xdc2   : > { %3623 = vmatpush1.bf16.msra.mxu0 %v5124_v12 }
 0xdc3   : > { %4712 = vmatprep.subr.bf16.mxu0 %v5182_v0 }
 0xe80   : > { %v3373_v51 = vpop.f32.mrb[36].mxu0  ;;  %v3414_v11 = vpop.f32.mrb[56].mxu1 }
 0xe81   : > { %v6321_v56 = vadd.f32 %v3373_v51, %v6239_v35  ;;  %v6324_v45 = vadd.f32 %v3414_v11, %v6242_v48  ;;  %v3375_v13 = vpop.f32.mrb[37].mxu0  ;;  %v4686_v44 = vpop.f32.mrb[57].mxu1 }
 0xe82   : > { %v6327_v46 = vadd.f32 %v3375_v13, %v6245_v52  ;;  %v3377_v47 = vpop.f32.mrb[38].mxu0  ;;  %v3417_v58 = vpop.f32.mrb[58].mxu1 }
 0xe83   : > { %v3378_v49 = vpop.f32.mrb[39].mxu0  ;;  %v4687_v50 = vpop.f32.mrb[59].mxu1 }
 0xe88   : > { %v3466_v53 = vpop.f32.mrb[40].mxu0 }
 0xe89   : > { %v3472_v54 = vmul.f32 0.125, %v3466_v53  ;;  %v4692_v59 = vpop.f32.mrb[41].mxu0 }
 0xe8a   : > { %v3469_v60 = vpop.f32.mrb[42].mxu0  ;;  %v5129_v59 = vld [vmem:[%s6474_s6 + $0x1e0] ss:$12 sps:$4 sm:$0xff]  }
 0xe8b   : > { %v4693_v61 = vpop.f32.mrb[43].mxu0  ;;  %v3473_v35 = vsel %vm6032_vm3, %v3472_v54, -inf  ;;  %v5135_v60 = vld [vmem:[%s6474_s6 + $0x1fc] ss:$12 sps:$4 sm:$0xff]  }
 0xe8c   : > { %v3474_v48 = vsel %vm2358_vm4, %v3473_v35, -inf  ;;  %v5133_v61 = vld [vmem:[%s6474_s6 + $0x1f8] ss:$12 sps:$4 sm:$0xff]  }
 0xe8d   : > { %3475 = vmax.xlane.f32.xlu1 %v3474_v48  ;;  %v5137_v48 = vld [vmem:[%s6474_s6 + $0x210] ss:$12 sps:$4 sm:$0xff]  }
 0xf1a   : > { %v3476_v63 = vpop.xlane.xlu1 %3475 }
 0xf1b   : > { %v3477_v1 = vsub.f32 %v3473_v35, %v3476_v63  ;;  %v5139_v35 = vld [vmem:[%s6474_s6 + $0x214] ss:$12 sps:$4 sm:$0xff]   ;;  %v5143_v63 = vld [vmem:[%s6474_s6 + $0x22c] ss:$12 sps:$4 sm:$0xff]  }
 0xf1d   : > { %v3478_v42 = vmul.f32 1.442695, %v3477_v1  ;;  %v5141_v1 = vld [vmem:[%s6474_s6 + $0x228] ss:$12 sps:$4 sm:$0xff]  }
 0xf1f   : > { %5163 = vpow2.f32 %v3478_v42 }
 0xf29   : > { %v5164_v52 = vpop.eup %5163 }
 0xf2a   : > { %v3480_v2 = vsel %vm2358_vm4, %v5164_v52, 0.0 }
 0xf2b   : > { %3481 = vadd.xlane.f32.xlu1 %v3480_v2 }
 0xf3c   : > { %3704 = vrot.lane.b32.xlu1 %v3424_v3, %s5185_s15 }
 0xfb8   : > { %v3482_v23 = vpop.xlane.xlu1 %3481 }
 0xfb9   : > { %5165 = vrcp.f32 %v3482_v23 }
 0xfbc   : > { %v3705_v19 = vpop.permute.xlu1 %3704 }
 0xfbd   : > { %v3710_v27 = vsel %vm2309_vm1, %v3705_v19, 0 }
 0xfc3   : > { %v5166_v14 = vpop.eup %5165 }
 0xfc4   : > { %v3484_v15 = vmul.f32 %v5166_v14, %v5164_v52 }
 0xfc6   : > { %v3485_v21 = vpack.c.bf16 %v3484_v15, %v3484_v15 }
 0xfc8   : > { %4697 = vmatmul.mubr.msk.bf16.vlgmr.msra.gmra.mrb[60].mxu1 %vm2358_vm4, %v3485_v21 }
 0xfc9   : > { %4701 = vmatpush3.bf16.msra.mxu1 %v5119_v41  ;;  %4708 = vmatprep.mubr.msk.bf16.mxu1 %vm5184_vm0, %v5182_v0 }
 0xfca   : > { %4702 = vmatprep.subr.bf16.mxu1 %v5182_v0 }
 0xfcd   : > { %4703 = vmatpush3.bf16.msra.mxu1 %v5123_v16 }
 0xfce   : > { %4704 = vmatprep.subr.bf16.mxu1 %v5182_v0 }
 0xfd1   : > { %4705 = vmatpush3.bf16.msra.mxu1 %v5127_v17 }
 0xfd2   : > { %4706 = vmatprep.subr.bf16.mxu1 %v5182_v0 }
 0xfd5   : > { %4707 = vmatpush3.bf16.msra.mxu1 %v5128_v18 }
 0xfd6   : > { %4718 = vmatprep.subr.bf16.mxu1 %v5182_v0 }
0x109b   : > { %v3526_v20 = vpop.f32.mrb[60].mxu1 }
0x109c   : > { %v3532_v24 = vpack.c.bf16 %v3526_v20, %v3526_v20  ;;  %v4698_v25 = vpop.f32.mrb[61].mxu1 }
0x109d   : > { %v3529_v26 = vpop.f32.mrb[62].mxu1 }
0x109e   : > { %v4699_v28 = vpop.f32.mrb[63].mxu1  ;;  %4365 = vmatmul.mubr.msk.bf16.vlgmr.msra.gmra.mrb[44].mxu0 %vm2309_vm1, %v3532_v24  ;;  %4709 = vmatmul.mubr.msk.bf16.vlgmr.msra.gmra.mrb[64].mxu1 %vm2309_vm1, %v3532_v24 }
0x109f   : > { %4713 = vmatpush3.bf16.xpose.msra.mxu0 %v3710_v27  ;;  %4714 = vmatprep.mubr.msk.bf16.mxu0 %vm5184_vm0, %v5182_v0  ;;  %v5171_v28 = vld [vmem:[%s5247_s10] sm:$0xff] }
0x10a0   : > { %4720 = vmatprep.mubr.msk.bf16.mxu1 %vm5184_vm0, %v5182_v0 }
0x10a6   : > { %4715 = vmatmul.mubr.msk.bf16.vlgmr.msra.gmra.mrb[48].mxu0 %vm2309_vm1, %v3702_v30 }
0x10a7   : > { %3931 = vmatprep.mubr.bf16.mxu0 %v5183_v29 }
0x1171   : > { %v3650_v31 = vpop.f32.mrb[44].mxu0  ;;  %v3691_v32 = vpop.f32.mrb[64].mxu1 }
0x1172   : > { %v6388_v3 = vadd.f32 %v3650_v31, %v6321_v56  ;;  %v6391_v5 = vadd.f32 %v3691_v32, %v6324_v45  ;;  %v3652_v34 = vpop.f32.mrb[45].mxu0  ;;  %v4710_v36 = vpop.f32.mrb[65].mxu1  ;;  %v5172_v31 = vld [vmem:[%s5247_s10 + $0x10] sm:$0xff] }
0x1173   : > { %v6394_v37 = vadd.f32 %v3652_v34, %v6327_v46  ;;  %v3654_v38 = vpop.f32.mrb[46].mxu0  ;;  %v3694_v39 = vpop.f32.mrb[66].mxu1 }
0x1174   : > { %v3655_v43 = vpop.f32.mrb[47].mxu0  ;;  %v4711_v51 = vpop.f32.mrb[67].mxu1 }
0x1179   : > { %v3746_v11 = vpop.f32.mrb[48].mxu0 }
0x117a   : > { %v3752_v13 = vmul.f32 0.125, %v3746_v11  ;;  %v4716_v29 = vpop.f32.mrb[49].mxu0 }
0x117b   : > { %v3749_v44 = vpop.f32.mrb[50].mxu0 }
0x117c   : > { %v4717_v47 = vpop.f32.mrb[51].mxu0  ;;  %v3753_v56 = vsel %vm6032_vm3, %v3752_v13, -inf }
0x117d   : > { %v3754_v45 = vsel %vm2358_vm4, %v3753_v56, -inf }
0x117e   : > { %3755 = vmax.xlane.f32.xlu0 %v3754_v45 }
0x1194   : > { %3767 = vrot.lane.b32.xlu0 %v6306_v33, %s5185_s15  ;;  %v5131_v33 = vld [vmem:[%s6474_s6 + $0x1e4] ss:$12 sps:$4 sm:$0xff]  }
0x1195   : > { %3899 = vmatprep.subr.bf16.mxu0 %v5131_v33 }
0x1196   : > { %3900 = vmatpush1.bf16.msra.mxu0 %v5129_v59 }
0x1197   : > { %3901 = vmatprep.subr.bf16.mxu0 %v5135_v60 }
0x119a   : > { %3902 = vmatpush1.bf16.msra.mxu0 %v5133_v61 }
0x119b   : > { %3903 = vmatprep.subr.bf16.mxu0 %v5139_v35 }
0x119e   : > { %3904 = vmatpush1.bf16.msra.mxu0 %v5137_v48 }
0x119f   : > { %3905 = vmatprep.subr.bf16.mxu0 %v5143_v63 }
0x11a2   : > { %3906 = vmatpush1.bf16.msra.mxu0 %v5141_v1 }
0x120b   : > { %v3756_v46 = vpop.xlane.xlu0 %3755 }
0x120c   : > { %v3757_v58 = vsub.f32 %v3753_v56, %v3756_v46 }
0x120e   : > { %v3758_v49 = vmul.f32 1.442695, %v3757_v58 }
0x120f   : > { %v3768_v50 = vpop.permute.xlu0 %3767 }
0x1210   : > { %5167 = vpow2.f32 %v3758_v49  ;;  %v3773_v53 = vsel %vm2374_vm2, %v3768_v50, 0 }
0x1211   : > { %4719 = vmatpush3.bf16.msra.mxu1 %v3773_v53 }
0x1212   : > { %4724 = vmatprep.subr.bf16.mxu1 %v5182_v0 }
0x121a   : > { %v5168_v54 = vpop.eup %5167 }
0x121b   : > { %v3760_v22 = vsel %vm2358_vm4, %v5168_v54, 0.0 }
0x121c   : > { %3761 = vadd.xlane.f32.xlu1 %v3760_v22 }
0x12a9   : > { %v3762_v42 = vpop.xlane.xlu1 %3761 }
0x12aa   : > { %5169 = vrcp.f32 %v3762_v42 }
0x12b4   : > { %v5170_v52 = vpop.eup %5169 }
0x12b5   : > { %v3764_v2 = vmul.f32 %v5170_v52, %v5168_v54 }
0x12b7   : > { %v3765_v57 = vpack.c.bf16 %v3764_v2, %v3764_v2 }
0x12b9   : > { %4721 = vmatmul.mubr.msk.bf16.vlgmr.msra.gmra.mrb[68].mxu1 %vm2358_vm4, %v3765_v57 }
0x12ba   : > { %4725 = vmatpush3.bf16.msra.mxu1 %v5132_v55  ;;  %4732 = vmatprep.mubr.msk.bf16.mxu1 %vm5184_vm0, %v5182_v0 }
0x12bb   : > { %4726 = vmatprep.subr.bf16.mxu1 %v5182_v0 }
0x12be   : > { %4727 = vmatpush3.bf16.msra.mxu1 %v5136_v4 }
0x12bf   : > { %4728 = vmatprep.subr.bf16.mxu1 %v5182_v0 }
0x12c2   : > { %4729 = vmatpush3.bf16.msra.mxu1 %v5140_v8 }
0x12c3   : > { %4730 = vmatprep.subr.bf16.mxu1 %v5182_v0  ;;  %v3986_v0 = vld [vmem:[%s6475_s7] sm:$0x7] }
0x12c4   : > { %v3991_v16 = vrot.slane %v3986_v0, %v5419_v7  ;;  %v3999_v18 = vrot.slane %v3986_v0, %v5502_v40  ;;  %v3995_v25 = vrot.slane %v3986_v0, %v5416_v6  ;;  %v5173_v7 = vld [vmem:[%s5247_s10 + $0x8] sm:$0xff] }
0x12c6   : > { %4731 = vmatpush3.bf16.msra.mxu1 %v5144_v9 }
0x138c   : > { %v3809_v62 = vpop.f32.mrb[68].mxu1 }
0x138d   : > { %v3815_v10 = vpack.c.bf16 %v3809_v62, %v3809_v62  ;;  %v4722_v12 = vpop.f32.mrb[69].mxu1 }
0x138e   : > { %v3812_v23 = vpop.f32.mrb[70].mxu1 }
0x138f   : > { %v4723_v14 = vpop.f32.mrb[71].mxu1  ;;  %4381 = vmatmul.mubr.msk.bf16.vlgmr.msra.gmra.mrb[52].mxu0 %vm2309_vm1, %v3815_v10  ;;  %4733 = vmatmul.mubr.msk.bf16.vlgmr.msra.gmra.mrb[72].mxu1 %vm2309_vm1, %v3815_v10 }
0x1462   : > { %v3933_v15 = vpop.f32.mrb[52].mxu0  ;;  %v3974_v41 = vpop.f32.mrb[72].mxu1 }
0x1463   : > { %v3980_v21 = vadd.f32 %v3933_v15, %v6388_v3  ;;  %v3982_v17 = vadd.f32 %v3974_v41, %v6391_v5  ;;  %v3935_v19 = vpop.f32.mrb[53].mxu0  ;;  %v4734_v20 = vpop.f32.mrb[73].mxu1 }
0x1464   : > { %v3981_v24 = vadd.f32 %v3935_v19, %v6394_v37  ;;  %v3937_v26 = vpop.f32.mrb[54].mxu0  ;;  %v3977_v27 = vpop.f32.mrb[74].mxu1 }
0x1465   : > { %v3983_v30 = vadd.f32 %v5171_v28, %v3980_v21  ;;  %v3985_v32 = vadd.f32 %v5172_v31, %v3982_v17  ;;  %v3938_v3 = vpop.f32.mrb[55].mxu0  ;;  %v4735_v34 = vpop.f32.mrb[75].mxu1 }
0x1466   : > { %v3984_v40 = vadd.f32 %v5173_v7, %v3981_v24 }
0x1467   : > { %v4003_v5 = vadd.f32 %v3991_v16, %v3983_v30  ;;  %v4005_v36 = vadd.f32 %v3999_v18, %v3985_v32 }
0x1468   : > { %v4004_v37 = vadd.f32 %v3995_v25, %v3984_v40 }
0x1469   : > { %4006 = vst [vmem:[%s305_s26] sm:$0xff] %v4003_v5  ;;  %4008 = vst [vmem:[%s305_s26 + $0x10] sm:$0xff] %v4005_v36 }
0x146a   : > { %4007 = vst [vmem:[%s305_s26 + $0x8] sm:$0xff] %v4004_v37 }
0x146b PF: > { %s18_s27 = sadd.s32 1, %s5180_s27  }
0x146c   : > { %p15_p4 = scmp.ge.s32.totalorder %s18_s27, 4  }
0x146e   :  { %17 = sbr.rel (!%p15_p4) target bundleno = 1 (0x1), region = 82 }

</bundles_post_ra>
